<compile_context>
chip_gen: v7x
topology: tpu7x:2x2x1
jax: 0.10.0
libtpu: 0.0.40
codegen_flags: <defaults>
</compile_context>

<pallas_src>
import functools

import jax
import jax.numpy as jnp
from jax.experimental import pallas as pl
from jax.experimental.pallas import tpu as pltpu


# --------------------------- fused Pallas kernel ----------------------------

def _fused_unet_kernel(x_ref, e_ref, ehs_ref, mask_ref, gmat_ref,
                       cin_w, cin_b,
                       gn1_g, gn1_b, c1_w, c1_b,
                       gn2_g, gn2_b, c2_w, c2_b,
                       q_wt, q_b, kv_w, kv_b, o_wt, o_b,
                       gno_g, gno_b, cout_w, cout_b,
                       out_ref, *, H, W, cm, cpg, eps, scale):
    HW = H * W

    # Static lane shifts for the 9 conv taps; tap (dy, dx) at flat position p
    # reads the activation at p + (dy-1)*W + (dx-1) via an XLU lane rotation,
    # with a precomputed border mask zeroing wrapped (out-of-image) pixels.
    shifts = []
    for dy in range(3):
        for dx in range(3):
            off = (dy - 1) * W + (dx - 1)
            shifts.append((-off) % HW)

    def conv3x3(h_cm, w_ref, b_ref):
        """h_cm: (C, HW) channel-major -> (Cout, HW); 9 accumulating matmuls."""
        acc = None
        for t in range(9):
            if shifts[t] == 0:
                tap = h_cm                               # center tap, full mask
            else:
                tap = pltpu.roll(h_cm, shifts[t], 1) * mask_ref[t]
            part = jnp.dot(w_ref[t], tap, preferred_element_type=jnp.float32)
            acc = part if acc is None else acc + part
        return acc + b_ref[...]

    gmat = gmat_ref[...]                        # (cm, cm) group-membership
    inv_n = 1.0 / (HW * cpg)

    def gn_silu(h_cm, g_ref, b_ref):
        # one-pass stats; lane-reduce first, per-group aggregation via a tiny matmul
        s1 = jnp.sum(h_cm, axis=1, keepdims=True)             # (cm, 1)
        s2 = jnp.sum(h_cm * h_cm, axis=1, keepdims=True)      # (cm, 1)
        mean = jnp.dot(gmat, s1, preferred_element_type=jnp.float32) * inv_n
        ex2 = jnp.dot(gmat, s2, preferred_element_type=jnp.float32) * inv_n
        var = ex2 - mean * mean
        y = (h_cm - mean) * jax.lax.rsqrt(var + eps)
        y = y * g_ref[...] + b_ref[...]
        return y * jax.nn.sigmoid(y)

    # ---- conv_in ------------------------------------------------------------
    x = x_ref[0]                                               # (cin_pad, HW)
    h0 = conv3x3(x, cin_w, cin_b)                              # (cm, HW)

    # ---- ResBlock with time-embedding injection ------------------------------
    h = gn_silu(h0, gn1_g, gn1_b)
    h = conv3x3(h, c1_w, c1_b)
    h = h + e_ref[0]                                           # (cm, 1) bcast
    h = gn_silu(h, gn2_g, gn2_b)
    h = conv3x3(h, c2_w, c2_b)
    h = h + h0

    # ---- cross-attention: spatial tokens (HW) vs text tokens (S), all
    # transposed so the lane axis stays HW -------------------------------------
    qT = jnp.dot(q_wt[...], h, preferred_element_type=jnp.float32) + q_b[...]
    ehs = ehs_ref[0]                                           # (S, cross)
    kv = (jnp.dot(ehs, kv_w[...], preferred_element_type=jnp.float32)
          + kv_b[...])                                         # fused K,V proj
    k = kv[:, :cm]                                             # (S, cm)
    v = kv[:, cm:]                                             # (S, cm)
    sT = jnp.dot(k, qT, preferred_element_type=jnp.float32) * scale   # (S, HW)
    m = jnp.max(sT, axis=0, keepdims=True)                     # (1, HW)
    p = jnp.exp(sT - m)
    l = jnp.sum(p, axis=0, keepdims=True)
    oT = jax.lax.dot_general(v, p, (((0,), (0,)), ((), ())),
                             preferred_element_type=jnp.float32)      # (cm, HW)
    oT = oT * pl.reciprocal(l, approx=True)                    # EUP, not divide
    aT = jnp.dot(o_wt[...], oT, preferred_element_type=jnp.float32) + o_b[...]
    h = h + aT

    # ---- output head: GN+SiLU -> conv_out; output already channel-major ------
    h = gn_silu(h, gno_g, gno_b)
    out = conv3x3(h, cout_w, cout_b)                           # (cout, HW)
    out_ref[0] = out.astype(out_ref.dtype)


def fused_unet_block(x_nchw, e, ehs, params, *, groups=8, eps=1e-5):
    B, cin, H, W = x_nchw.shape
    HW = H * W
    cm = params["cin_w"].shape[-1]
    S, cross = ehs.shape[1], ehs.shape[2]
    cout = params["cout_w"].shape[-1]
    cpg = cm // groups
    cin_pad = 8                                    # sublane-aligned input chans

    # ---- layout / merge prep (tiny XLA ops, weights + flatten only) ----------
    x_cm = x_nchw.reshape(B, cin, HW)              # NCHW is already chan-major
    x_cm = jnp.pad(x_cm, ((0, 0), (0, cin_pad - cin), (0, 0)))

    col = lambda v: v.reshape(-1, 1)

    def conv_w(w, ci, co, ci_pad=None):
        # stored (9*ci, co) tap-major -> (9, co, ci[_pad]) for per-tap matmuls
        wt = w.reshape(9, ci, co).transpose(0, 2, 1)
        if ci_pad is not None and ci_pad != ci:
            wt = jnp.pad(wt, ((0, 0), (0, 0), (0, ci_pad - ci)))
        return wt

    # per-tap border masks: zero where the 3x3 neighbour falls outside the image
    hh = jnp.arange(H)
    ww = jnp.arange(W)
    mask_list = []
    for dy in range(3):
        vh = (hh + dy - 1 >= 0) & (hh + dy - 1 < H)
        for dx in range(3):
            vw = (ww + dx - 1 >= 0) & (ww + dx - 1 < W)
            mask_list.append((vh[:, None] & vw[None, :]).reshape(1, HW))
    mask = jnp.stack(mask_list, axis=0).astype(jnp.float32)     # (9, 1, HW)

    ch = jnp.arange(cm, dtype=jnp.int32) // cpg
    gmat = (ch[:, None] == ch[None, :]).astype(jnp.float32)     # (cm, cm)

    kv_w = jnp.concatenate([params["k_w"], params["v_w"]], axis=1)  # (cross,2cm)
    kv_b = jnp.concatenate([params["k_b"], params["v_b"]]).reshape(1, 2 * cm)

    inputs = (
        x_cm, e.reshape(B, cm, 1), ehs, mask, gmat,
        conv_w(params["cin_w"], cin, cm, cin_pad), col(params["cin_b"]),
        col(params["gn1_g"]), col(params["gn1_b"]),
        conv_w(params["c1_w"], cm, cm), col(params["c1_b"]),
        col(params["gn2_g"]), col(params["gn2_b"]),
        conv_w(params["c2_w"], cm, cm), col(params["c2_b"]),
        params["q_w"].T, col(params["q_b"]),
        kv_w, kv_b,
        params["o_w"].T, col(params["o_b"]),
        col(params["gno_g"]), col(params["gno_b"]),
        conv_w(params["cout_w"], cm, cout), col(params["cout_b"]),
    )

    def batch_spec(shape):
        nd = len(shape)
        return pl.BlockSpec((1,) + tuple(shape[1:]),
                            lambda b, _nd=nd: (b,) + (0,) * (_nd - 1))

    def full_spec(shape):
        nd = len(shape)
        return pl.BlockSpec(tuple(shape), lambda b, _nd=nd: (0,) * _nd)

    in_specs = ([batch_spec(inputs[0].shape),
                 batch_spec(inputs[1].shape),
                 batch_spec(inputs[2].shape)]
                + [full_spec(a.shape) for a in inputs[3:]])

    flops = 2 * B * HW * (9 * cin_pad * cm + 2 * 9 * cm * cm + 9 * cm * cout
                          + 2 * cm * cm + 2 * S * cm)
    flops += 2 * B * S * cross * 2 * cm
    transcendentals = B * HW * (S + 3 * cm + 1)
    bytes_accessed = sum(a.size * a.dtype.itemsize for a in inputs)
    bytes_accessed += B * cout * HW * 4

    out = pl.pallas_call(
        functools.partial(_fused_unet_kernel, H=H, W=W, cm=cm, cpg=cpg,
                          eps=eps, scale=1.0 / (cm ** 0.5)),
        out_shape=jax.ShapeDtypeStruct((B, cout, HW), x_nchw.dtype),
        grid=(B,),
        in_specs=in_specs,
        out_specs=pl.BlockSpec((1, cout, HW), lambda b: (b, 0, 0)),
        compiler_params=pltpu.CompilerParams(
            dimension_semantics=("parallel",),
            vmem_limit_bytes=32 * 1024 * 1024),
        cost_estimate=pl.CostEstimate(flops=int(flops),
                                      transcendentals=int(transcendentals),
                                      bytes_accessed=int(bytes_accessed)),
    )(*inputs)
    return out                                                 # (B, cout, H*W)


# ------------------------------ glue / params ------------------------------

def timestep_embedding(t, dim):
    half = dim // 2
    freqs = jnp.exp(-jnp.log(10000.0) *
                    jnp.arange(half, dtype=jnp.float32) / half)
    args = t.astype(jnp.float32)[:, None] * freqs[None, :]
    return jnp.concatenate([jnp.sin(args), jnp.cos(args)], axis=-1)


def init_params(key, cin=4, cm=32, temb=128, cross=32, text_dim=32,
                time_ids_dim=6):
    ks = jax.random.split(key, 16)

    def dense(k, i, o):
        return (jax.random.normal(k, (i, o), jnp.float32) / (i ** 0.5),
                jnp.zeros((o,), jnp.float32))

    def conv(k, ci, co):   # 3x3 conv kernel stored as (9*ci, co) im2col matrix
        return (jax.random.normal(k, (9 * ci, co), jnp.float32) /
                ((9 * ci) ** 0.5),
                jnp.zeros((co,), jnp.float32))

    p = {}
    p["t1_w"], p["t1_b"] = dense(ks[0], cm, temb)
    p["t2_w"], p["t2_b"] = dense(ks[1], temb, temb)
    p["add_w"], p["add_b"] = dense(ks[2], text_dim + time_ids_dim, temb)
    p["cin_w"], p["cin_b"] = conv(ks[3], cin, cm)
    p["gn1_g"], p["gn1_b"] = jnp.ones((cm,)), jnp.zeros((cm,))
    p["c1_w"], p["c1_b"] = conv(ks[4], cm, cm)
    p["ep_w"], p["ep_b"] = dense(ks[5], temb, cm)
    p["gn2_g"], p["gn2_b"] = jnp.ones((cm,)), jnp.zeros((cm,))
    p["c2_w"], p["c2_b"] = conv(ks[6], cm, cm)
    p["q_w"], p["q_b"] = dense(ks[7], cm, cm)
    p["k_w"], p["k_b"] = dense(ks[8], cross, cm)
    p["v_w"], p["v_b"] = dense(ks[9], cross, cm)
    p["o_w"], p["o_b"] = dense(ks[10], cm, cm)
    p["gno_g"], p["gno_b"] = jnp.ones((cm,)), jnp.zeros((cm,))
    p["cout_w"], p["cout_b"] = conv(ks[11], cm, cin)
    return p


def unet_wrap_forward(sample, timestep, encoder_hidden_states,
                      text_embeds, time_ids, params):
    """Mirrors UNetWrap.forward: returns a tuple (return_dict=False)."""
    B, C, H, W = sample.shape
    cm = params["cin_w"].shape[-1]

    # --- time embedding + added-condition path: M=B(=2) rows; left to plain
    # XLA on purpose (a Pallas call per tiny linear is pure launch/DMA cost).
    t = jnp.broadcast_to(jnp.asarray(timestep, jnp.float32).reshape(-1), (B,))
    emb = timestep_embedding(t, cm) @ params["t1_w"] + params["t1_b"]
    emb = emb * jax.nn.sigmoid(emb)                                  # SiLU
    emb = emb @ params["t2_w"] + params["t2_b"]
    add_in = jnp.concatenate([text_embeds.astype(jnp.float32),
                              time_ids.astype(jnp.float32)], axis=-1)
    emb = emb + (add_in @ params["add_w"] + params["add_b"])
    silu_emb = emb * jax.nn.sigmoid(emb)
    e = silu_emb @ params["ep_w"] + params["ep_b"]                   # (B, cm)

    # --- fused conv_in -> ResBlock -> cross-attn -> conv_out (one kernel) ----
    out = fused_unet_block(sample, e, encoder_hidden_states, params)
    out = out.reshape(B, C, H, W)   # kernel emits channel-major == NCHW
    return (out,)


# --------------------------------- main -------------------------------------

if __name__ == "__main__":
    key = jax.random.PRNGKey(0)
    k1, k2, k3, k4, kp = jax.random.split(key, 5)

    B, C, H, W = 2, 4, 16, 16
    seq, cross_dim, text_dim, time_ids_dim = 8, 32, 32, 6

    sample = jax.random.normal(k1, (B, C, H, W), jnp.float32)
    timestep = jnp.array([10.0, 10.0], jnp.float32)
    encoder_hidden_states = jax.random.normal(k2, (B, seq, cross_dim),
                                              jnp.float32)
    text_embeds = jax.random.normal(k3, (B, text_dim), jnp.float32)
    time_ids = jax.random.normal(k4, (B, time_ids_dim), jnp.float32)

    params = init_params(kp, cin=C, cm=32, temb=128, cross=cross_dim,
                         text_dim=text_dim, time_ids_dim=time_ids_dim)

    fwd = jax.jit(unet_wrap_forward)
    out_tuple = fwd(sample, timestep, encoder_hidden_states,
                    text_embeds, time_ids, params)
    jax.block_until_ready(out_tuple)

    assert isinstance(out_tuple, tuple) and out_tuple[0].shape == (B, C, H, W)
    print("KERNEL_OK")
</pallas_src>

<mosaic_0001>
module attributes {stable_mosaic.version = 11 : i64} {
  func.func @_fused_unet_kernel(%arg0: i32, %arg1: memref<1x8x256xf32, #tpu.memory_space<vmem>>, %arg2: memref<1x32x1xf32, #tpu.memory_space<vmem>>, %arg3: memref<1x8x32xf32, #tpu.memory_space<vmem>>, %arg4: memref<9x1x256xf32, #tpu.memory_space<vmem>>, %arg5: memref<32x32xf32, #tpu.memory_space<vmem>>, %arg6: memref<9x32x8xf32, #tpu.memory_space<vmem>>, %arg7: memref<32x1xf32, #tpu.memory_space<vmem>>, %arg8: memref<32x1xf32, #tpu.memory_space<vmem>>, %arg9: memref<32x1xf32, #tpu.memory_space<vmem>>, %arg10: memref<9x32x32xf32, #tpu.memory_space<vmem>>, %arg11: memref<32x1xf32, #tpu.memory_space<vmem>>, %arg12: memref<32x1xf32, #tpu.memory_space<vmem>>, %arg13: memref<32x1xf32, #tpu.memory_space<vmem>>, %arg14: memref<9x32x32xf32, #tpu.memory_space<vmem>>, %arg15: memref<32x1xf32, #tpu.memory_space<vmem>>, %arg16: memref<32x32xf32, #tpu.memory_space<vmem>>, %arg17: memref<32x1xf32, #tpu.memory_space<vmem>>, %arg18: memref<32x64xf32, #tpu.memory_space<vmem>>, %arg19: memref<1x64xf32, #tpu.memory_space<vmem>>, %arg20: memref<32x32xf32, #tpu.memory_space<vmem>>, %arg21: memref<32x1xf32, #tpu.memory_space<vmem>>, %arg22: memref<32x1xf32, #tpu.memory_space<vmem>>, %arg23: memref<32x1xf32, #tpu.memory_space<vmem>>, %arg24: memref<9x4x32xf32, #tpu.memory_space<vmem>>, %arg25: memref<4x1xf32, #tpu.memory_space<vmem>>, %arg26: memref<1x4x256xf32, #tpu.memory_space<vmem>>) attributes {dimension_semantics = [#tpu.dimension_semantics<parallel>], iteration_bounds = array<i64: 2>, scalar_prefetch = 0 : i64, scratch_operands = 0 : i64, tpu.core_type = #tpu.core_type<tc>, window_params = [{transform_indices = @transform_0, window_bounds = array<i64: 1, 8, 256>}, {transform_indices = @transform_1, window_bounds = array<i64: 1, 32, 1>}, {transform_indices = @transform_2, window_bounds = array<i64: 1, 8, 32>}, {pipeline_mode = #tpu.pipeline_mode<synchronous>, transform_indices = @transform_3, window_bounds = array<i64: 9, 1, 256>}, {pipeline_mode = #tpu.pipeline_mode<synchronous>, transform_indices = @transform_4, window_bounds = array<i64: 32, 32>}, {pipeline_mode = #tpu.pipeline_mode<synchronous>, transform_indices = @transform_5, window_bounds = array<i64: 9, 32, 8>}, {pipeline_mode = #tpu.pipeline_mode<synchronous>, transform_indices = @transform_6, window_bounds = array<i64: 32, 1>}, {pipeline_mode = #tpu.pipeline_mode<synchronous>, transform_indices = @transform_7, window_bounds = array<i64: 32, 1>}, {pipeline_mode = #tpu.pipeline_mode<synchronous>, transform_indices = @transform_8, window_bounds = array<i64: 32, 1>}, {pipeline_mode = #tpu.pipeline_mode<synchronous>, transform_indices = @transform_9, window_bounds = array<i64: 9, 32, 32>}, {pipeline_mode = #tpu.pipeline_mode<synchronous>, transform_indices = @transform_10, window_bounds = array<i64: 32, 1>}, {pipeline_mode = #tpu.pipeline_mode<synchronous>, transform_indices = @transform_11, window_bounds = array<i64: 32, 1>}, {pipeline_mode = #tpu.pipeline_mode<synchronous>, transform_indices = @transform_12, window_bounds = array<i64: 32, 1>}, {pipeline_mode = #tpu.pipeline_mode<synchronous>, transform_indices = @transform_13, window_bounds = array<i64: 9, 32, 32>}, {pipeline_mode = #tpu.pipeline_mode<synchronous>, transform_indices = @transform_14, window_bounds = array<i64: 32, 1>}, {pipeline_mode = #tpu.pipeline_mode<synchronous>, transform_indices = @transform_15, window_bounds = array<i64: 32, 32>}, {pipeline_mode = #tpu.pipeline_mode<synchronous>, transform_indices = @transform_16, window_bounds = array<i64: 32, 1>}, {pipeline_mode = #tpu.pipeline_mode<synchronous>, transform_indices = @transform_17, window_bounds = array<i64: 32, 64>}, {pipeline_mode = #tpu.pipeline_mode<synchronous>, transform_indices = @transform_18, window_bounds = array<i64: 1, 64>}, {pipeline_mode = #tpu.pipeline_mode<synchronous>, transform_indices = @transform_19, window_bounds = array<i64: 32, 32>}, {pipeline_mode = #tpu.pipeline_mode<synchronous>, transform_indices = @transform_20, window_bounds = array<i64: 32, 1>}, {pipeline_mode = #tpu.pipeline_mode<synchronous>, transform_indices = @transform_21, window_bounds = array<i64: 32, 1>}, {pipeline_mode = #tpu.pipeline_mode<synchronous>, transform_indices = @transform_22, window_bounds = array<i64: 32, 1>}, {pipeline_mode = #tpu.pipeline_mode<synchronous>, transform_indices = @transform_23, window_bounds = array<i64: 9, 4, 32>}, {pipeline_mode = #tpu.pipeline_mode<synchronous>, transform_indices = @transform_24, window_bounds = array<i64: 4, 1>}, {transform_indices = @transform_25, window_bounds = array<i64: 1, 4, 256>}]} {
    %c0 = arith.constant 0 : index
    %c0_0 = arith.constant 0 : index
    %0 = vector.load %arg5[%c0, %c0_0] : memref<32x32xf32, #tpu.memory_space<vmem>>, vector<32x32xf32>
    %c0_1 = arith.constant 0 : index
    %c0_2 = arith.constant 0 : index
    %c0_3 = arith.constant 0 : index
    %1 = vector.load %arg1[%c0_1, %c0_2, %c0_3] : memref<1x8x256xf32, #tpu.memory_space<vmem>>, vector<1x8x256xf32>
    %2 = vector.shape_cast %1 : vector<1x8x256xf32> to vector<8x256xf32>
    %c17_i32 = arith.constant 17 : i32
    %3 = tpu.dynamic_rotate %2 by %c17_i32 dim 1 : vector<8x256xf32>, i32 -> vector<8x256xf32>
    %c0_4 = arith.constant 0 : index
    %c0_5 = arith.constant 0 : index
    %c0_6 = arith.constant 0 : index
    %4 = vector.load %arg4[%c0_4, %c0_5, %c0_6] : memref<9x1x256xf32, #tpu.memory_space<vmem>>, vector<1x1x256xf32>
    %5 = vector.shape_cast %4 : vector<1x1x256xf32> to vector<1x256xf32>
    %6 = vector.broadcast %5 : vector<1x256xf32> to vector<8x256xf32>
    %7 = arith.mulf %3, %6 : vector<8x256xf32>
    %c0_7 = arith.constant 0 : index
    %c0_8 = arith.constant 0 : index
    %c0_9 = arith.constant 0 : index
    %8 = vector.load %arg6[%c0_7, %c0_8, %c0_9] : memref<9x32x8xf32, #tpu.memory_space<vmem>>, vector<1x32x8xf32>
    %9 = vector.shape_cast %8 : vector<1x32x8xf32> to vector<32x8xf32>
    %cst = arith.constant dense<0.000000e+00> : vector<32x256xf32>
    %10 = tpu.matmul %9, %7, %cst {dimension_numbers = #tpu.dot_dimension_numbers<[1], [0], [0], [1], [0, 0, 1, 1], [], []>} : vector<32x8xf32>, vector<8x256xf32>, vector<32x256xf32> -> vector<32x256xf32>
    %c16_i32 = arith.constant 16 : i32
    %11 = tpu.dynamic_rotate %2 by %c16_i32 dim 1 : vector<8x256xf32>, i32 -> vector<8x256xf32>
    %c1 = arith.constant 1 : index
    %c0_10 = arith.constant 0 : index
    %c0_11 = arith.constant 0 : index
    %12 = vector.load %arg4[%c1, %c0_10, %c0_11] : memref<9x1x256xf32, #tpu.memory_space<vmem>>, vector<1x1x256xf32>
    %13 = vector.shape_cast %12 : vector<1x1x256xf32> to vector<1x256xf32>
    %14 = vector.broadcast %13 : vector<1x256xf32> to vector<8x256xf32>
    %15 = arith.mulf %11, %14 : vector<8x256xf32>
    %c1_12 = arith.constant 1 : index
    %c0_13 = arith.constant 0 : index
    %c0_14 = arith.constant 0 : index
    %16 = vector.load %arg6[%c1_12, %c0_13, %c0_14] : memref<9x32x8xf32, #tpu.memory_space<vmem>>, vector<1x32x8xf32>
    %17 = vector.shape_cast %16 : vector<1x32x8xf32> to vector<32x8xf32>
    %cst_15 = arith.constant dense<0.000000e+00> : vector<32x256xf32>
    %18 = tpu.matmul %17, %15, %cst_15 {dimension_numbers = #tpu.dot_dimension_numbers<[1], [0], [0], [1], [0, 0, 1, 1], [], []>} : vector<32x8xf32>, vector<8x256xf32>, vector<32x256xf32> -> vector<32x256xf32>
    %19 = arith.addf %10, %18 : vector<32x256xf32>
    %c15_i32 = arith.constant 15 : i32
    %20 = tpu.dynamic_rotate %2 by %c15_i32 dim 1 : vector<8x256xf32>, i32 -> vector<8x256xf32>
    %c2 = arith.constant 2 : index
    %c0_16 = arith.constant 0 : index
    %c0_17 = arith.constant 0 : index
    %21 = vector.load %arg4[%c2, %c0_16, %c0_17] : memref<9x1x256xf32, #tpu.memory_space<vmem>>, vector<1x1x256xf32>
    %22 = vector.shape_cast %21 : vector<1x1x256xf32> to vector<1x256xf32>
    %23 = vector.broadcast %22 : vector<1x256xf32> to vector<8x256xf32>
    %24 = arith.mulf %20, %23 : vector<8x256xf32>
    %c2_18 = arith.constant 2 : index
    %c0_19 = arith.constant 0 : index
    %c0_20 = arith.constant 0 : index
    %25 = vector.load %arg6[%c2_18, %c0_19, %c0_20] : memref<9x32x8xf32, #tpu.memory_space<vmem>>, vector<1x32x8xf32>
    %26 = vector.shape_cast %25 : vector<1x32x8xf32> to vector<32x8xf32>
    %cst_21 = arith.constant dense<0.000000e+00> : vector<32x256xf32>
    %27 = tpu.matmul %26, %24, %cst_21 {dimension_numbers = #tpu.dot_dimension_numbers<[1], [0], [0], [1], [0, 0, 1, 1], [], []>} : vector<32x8xf32>, vector<8x256xf32>, vector<32x256xf32> -> vector<32x256xf32>
    %28 = arith.addf %19, %27 : vector<32x256xf32>
    %c1_i32 = arith.constant 1 : i32
    %29 = tpu.dynamic_rotate %2 by %c1_i32 dim 1 : vector<8x256xf32>, i32 -> vector<8x256xf32>
    %c3 = arith.constant 3 : index
    %c0_22 = arith.constant 0 : index
    %c0_23 = arith.constant 0 : index
    %30 = vector.load %arg4[%c3, %c0_22, %c0_23] : memref<9x1x256xf32, #tpu.memory_space<vmem>>, vector<1x1x256xf32>
    %31 = vector.shape_cast %30 : vector<1x1x256xf32> to vector<1x256xf32>
    %32 = vector.broadcast %31 : vector<1x256xf32> to vector<8x256xf32>
    %33 = arith.mulf %29, %32 : vector<8x256xf32>
    %c3_24 = arith.constant 3 : index
    %c0_25 = arith.constant 0 : index
    %c0_26 = arith.constant 0 : index
    %34 = vector.load %arg6[%c3_24, %c0_25, %c0_26] : memref<9x32x8xf32, #tpu.memory_space<vmem>>, vector<1x32x8xf32>
    %35 = vector.shape_cast %34 : vector<1x32x8xf32> to vector<32x8xf32>
    %cst_27 = arith.constant dense<0.000000e+00> : vector<32x256xf32>
    %36 = tpu.matmul %35, %33, %cst_27 {dimension_numbers = #tpu.dot_dimension_numbers<[1], [0], [0], [1], [0, 0, 1, 1], [], []>} : vector<32x8xf32>, vector<8x256xf32>, vector<32x256xf32> -> vector<32x256xf32>
    %37 = arith.addf %28, %36 : vector<32x256xf32>
    %c4 = arith.constant 4 : index
    %c0_28 = arith.constant 0 : index
    %c0_29 = arith.constant 0 : index
    %38 = vector.load %arg6[%c4, %c0_28, %c0_29] : memref<9x32x8xf32, #tpu.memory_space<vmem>>, vector<1x32x8xf32>
    %39 = vector.shape_cast %38 : vector<1x32x8xf32> to vector<32x8xf32>
    %cst_30 = arith.constant dense<0.000000e+00> : vector<32x256xf32>
    %40 = tpu.matmul %39, %2, %cst_30 {dimension_numbers = #tpu.dot_dimension_numbers<[1], [0], [0], [1], [0, 0, 1, 1], [], []>} : vector<32x8xf32>, vector<8x256xf32>, vector<32x256xf32> -> vector<32x256xf32>
    %41 = arith.addf %37, %40 : vector<32x256xf32>
    %c255_i32 = arith.constant 255 : i32
    %42 = tpu.dynamic_rotate %2 by %c255_i32 dim 1 : vector<8x256xf32>, i32 -> vector<8x256xf32>
    %c5 = arith.constant 5 : index
    %c0_31 = arith.constant 0 : index
    %c0_32 = arith.constant 0 : index
    %43 = vector.load %arg4[%c5, %c0_31, %c0_32] : memref<9x1x256xf32, #tpu.memory_space<vmem>>, vector<1x1x256xf32>
    %44 = vector.shape_cast %43 : vector<1x1x256xf32> to vector<1x256xf32>
    %45 = vector.broadcast %44 : vector<1x256xf32> to vector<8x256xf32>
    %46 = arith.mulf %42, %45 : vector<8x256xf32>
    %c5_33 = arith.constant 5 : index
    %c0_34 = arith.constant 0 : index
    %c0_35 = arith.constant 0 : index
    %47 = vector.load %arg6[%c5_33, %c0_34, %c0_35] : memref<9x32x8xf32, #tpu.memory_space<vmem>>, vector<1x32x8xf32>
    %48 = vector.shape_cast %47 : vector<1x32x8xf32> to vector<32x8xf32>
    %cst_36 = arith.constant dense<0.000000e+00> : vector<32x256xf32>
    %49 = tpu.matmul %48, %46, %cst_36 {dimension_numbers = #tpu.dot_dimension_numbers<[1], [0], [0], [1], [0, 0, 1, 1], [], []>} : vector<32x8xf32>, vector<8x256xf32>, vector<32x256xf32> -> vector<32x256xf32>
    %50 = arith.addf %41, %49 : vector<32x256xf32>
    %c241_i32 = arith.constant 241 : i32
    %51 = tpu.dynamic_rotate %2 by %c241_i32 dim 1 : vector<8x256xf32>, i32 -> vector<8x256xf32>
    %c6 = arith.constant 6 : index
    %c0_37 = arith.constant 0 : index
    %c0_38 = arith.constant 0 : index
    %52 = vector.load %arg4[%c6, %c0_37, %c0_38] : memref<9x1x256xf32, #tpu.memory_space<vmem>>, vector<1x1x256xf32>
    %53 = vector.shape_cast %52 : vector<1x1x256xf32> to vector<1x256xf32>
    %54 = vector.broadcast %53 : vector<1x256xf32> to vector<8x256xf32>
    %55 = arith.mulf %51, %54 : vector<8x256xf32>
    %c6_39 = arith.constant 6 : index
    %c0_40 = arith.constant 0 : index
    %c0_41 = arith.constant 0 : index
    %56 = vector.load %arg6[%c6_39, %c0_40, %c0_41] : memref<9x32x8xf32, #tpu.memory_space<vmem>>, vector<1x32x8xf32>
    %57 = vector.shape_cast %56 : vector<1x32x8xf32> to vector<32x8xf32>
    %cst_42 = arith.constant dense<0.000000e+00> : vector<32x256xf32>
    %58 = tpu.matmul %57, %55, %cst_42 {dimension_numbers = #tpu.dot_dimension_numbers<[1], [0], [0], [1], [0, 0, 1, 1], [], []>} : vector<32x8xf32>, vector<8x256xf32>, vector<32x256xf32> -> vector<32x256xf32>
    %59 = arith.addf %50, %58 : vector<32x256xf32>
    %c240_i32 = arith.constant 240 : i32
    %60 = tpu.dynamic_rotate %2 by %c240_i32 dim 1 : vector<8x256xf32>, i32 -> vector<8x256xf32>
    %c7 = arith.constant 7 : index
    %c0_43 = arith.constant 0 : index
    %c0_44 = arith.constant 0 : index
    %61 = vector.load %arg4[%c7, %c0_43, %c0_44] : memref<9x1x256xf32, #tpu.memory_space<vmem>>, vector<1x1x256xf32>
    %62 = vector.shape_cast %61 : vector<1x1x256xf32> to vector<1x256xf32>
    %63 = vector.broadcast %62 : vector<1x256xf32> to vector<8x256xf32>
    %64 = arith.mulf %60, %63 : vector<8x256xf32>
    %c7_45 = arith.constant 7 : index
    %c0_46 = arith.constant 0 : index
    %c0_47 = arith.constant 0 : index
    %65 = vector.load %arg6[%c7_45, %c0_46, %c0_47] : memref<9x32x8xf32, #tpu.memory_space<vmem>>, vector<1x32x8xf32>
    %66 = vector.shape_cast %65 : vector<1x32x8xf32> to vector<32x8xf32>
    %cst_48 = arith.constant dense<0.000000e+00> : vector<32x256xf32>
    %67 = tpu.matmul %66, %64, %cst_48 {dimension_numbers = #tpu.dot_dimension_numbers<[1], [0], [0], [1], [0, 0, 1, 1], [], []>} : vector<32x8xf32>, vector<8x256xf32>, vector<32x256xf32> -> vector<32x256xf32>
    %68 = arith.addf %59, %67 : vector<32x256xf32>
    %c239_i32 = arith.constant 239 : i32
    %69 = tpu.dynamic_rotate %2 by %c239_i32 dim 1 : vector<8x256xf32>, i32 -> vector<8x256xf32>
    %c8 = arith.constant 8 : index
    %c0_49 = arith.constant 0 : index
    %c0_50 = arith.constant 0 : index
    %70 = vector.load %arg4[%c8, %c0_49, %c0_50] : memref<9x1x256xf32, #tpu.memory_space<vmem>>, vector<1x1x256xf32>
    %71 = vector.shape_cast %70 : vector<1x1x256xf32> to vector<1x256xf32>
    %72 = vector.broadcast %71 : vector<1x256xf32> to vector<8x256xf32>
    %73 = arith.mulf %69, %72 : vector<8x256xf32>
    %c8_51 = arith.constant 8 : index
    %c0_52 = arith.constant 0 : index
    %c0_53 = arith.constant 0 : index
    %74 = vector.load %arg6[%c8_51, %c0_52, %c0_53] : memref<9x32x8xf32, #tpu.memory_space<vmem>>, vector<1x32x8xf32>
    %75 = vector.shape_cast %74 : vector<1x32x8xf32> to vector<32x8xf32>
    %cst_54 = arith.constant dense<0.000000e+00> : vector<32x256xf32>
    %76 = tpu.matmul %75, %73, %cst_54 {dimension_numbers = #tpu.dot_dimension_numbers<[1], [0], [0], [1], [0, 0, 1, 1], [], []>} : vector<32x8xf32>, vector<8x256xf32>, vector<32x256xf32> -> vector<32x256xf32>
    %77 = arith.addf %68, %76 : vector<32x256xf32>
    %c0_55 = arith.constant 0 : index
    %c0_56 = arith.constant 0 : index
    %78 = vector.load %arg7[%c0_55, %c0_56] : memref<32x1xf32, #tpu.memory_space<vmem>>, vector<32x1xf32>
    %79 = vector.broadcast %78 : vector<32x1xf32> to vector<32x256xf32>
    %80 = arith.addf %77, %79 : vector<32x256xf32>
    %cst_57 = arith.constant dense<0.000000e+00> : vector<32xf32>
    %81 = vector.multi_reduction <add>, %80, %cst_57 [1] : vector<32x256xf32> to vector<32xf32>
    %82 = vector.shape_cast %81 : vector<32xf32> to vector<32x1xf32>
    %83 = arith.mulf %80, %80 : vector<32x256xf32>
    %cst_58 = arith.constant dense<0.000000e+00> : vector<32xf32>
    %84 = vector.multi_reduction <add>, %83, %cst_58 [1] : vector<32x256xf32> to vector<32xf32>
    %85 = vector.shape_cast %84 : vector<32xf32> to vector<32x1xf32>
    %cst_59 = arith.constant dense<0.000000e+00> : vector<32x1xf32>
    %86 = tpu.matmul %0, %82, %cst_59 {dimension_numbers = #tpu.dot_dimension_numbers<[1], [0], [0], [1], [0, 0, 1, 1], [], []>} : vector<32x32xf32>, vector<32x1xf32>, vector<32x1xf32> -> vector<32x1xf32>
    %cst_60 = arith.constant 9.765625E-4 : f32
    %87 = vector.broadcast %cst_60 : f32 to vector<32x1xf32>
    %88 = arith.mulf %86, %87 : vector<32x1xf32>
    %cst_61 = arith.constant dense<0.000000e+00> : vector<32x1xf32>
    %89 = tpu.matmul %0, %85, %cst_61 {dimension_numbers = #tpu.dot_dimension_numbers<[1], [0], [0], [1], [0, 0, 1, 1], [], []>} : vector<32x32xf32>, vector<32x1xf32>, vector<32x1xf32> -> vector<32x1xf32>
    %cst_62 = arith.constant 9.765625E-4 : f32
    %90 = vector.broadcast %cst_62 : f32 to vector<32x1xf32>
    %91 = arith.mulf %89, %90 : vector<32x1xf32>
    %92 = arith.mulf %88, %88 : vector<32x1xf32>
    %93 = arith.subf %91, %92 : vector<32x1xf32>
    %94 = vector.broadcast %88 : vector<32x1xf32> to vector<32x256xf32>
    %95 = arith.subf %80, %94 : vector<32x256xf32>
    %cst_63 = arith.constant 9.99999974E-6 : f32
    %96 = vector.broadcast %cst_63 : f32 to vector<32x1xf32>
    %97 = arith.addf %93, %96 : vector<32x1xf32>
    %98 = math.rsqrt %97 : vector<32x1xf32>
    %99 = vector.broadcast %98 : vector<32x1xf32> to vector<32x256xf32>
    %100 = arith.mulf %95, %99 : vector<32x256xf32>
    %c0_64 = arith.constant 0 : index
    %c0_65 = arith.constant 0 : index
    %101 = vector.load %arg8[%c0_64, %c0_65] : memref<32x1xf32, #tpu.memory_space<vmem>>, vector<32x1xf32>
    %102 = vector.broadcast %101 : vector<32x1xf32> to vector<32x256xf32>
    %103 = arith.mulf %100, %102 : vector<32x256xf32>
    %c0_66 = arith.constant 0 : index
    %c0_67 = arith.constant 0 : index
    %104 = vector.load %arg9[%c0_66, %c0_67] : memref<32x1xf32, #tpu.memory_space<vmem>>, vector<32x1xf32>
    %105 = vector.broadcast %104 : vector<32x1xf32> to vector<32x256xf32>
    %106 = arith.addf %103, %105 : vector<32x256xf32>
    %107 = arith.negf %106 : vector<32x256xf32>
    %108 = math.exp %107 : vector<32x256xf32>
    %cst_68 = arith.constant 1.000000e+00 : f32
    %109 = vector.broadcast %cst_68 : f32 to vector<32x256xf32>
    %110 = arith.addf %109, %108 : vector<32x256xf32>
    %111 = arith.divf %109, %110 : vector<32x256xf32>
    %112 = arith.mulf %106, %111 : vector<32x256xf32>
    %c17_i32_69 = arith.constant 17 : i32
    %113 = tpu.dynamic_rotate %112 by %c17_i32_69 dim 1 : vector<32x256xf32>, i32 -> vector<32x256xf32>
    %c0_70 = arith.constant 0 : index
    %c0_71 = arith.constant 0 : index
    %c0_72 = arith.constant 0 : index
    %114 = vector.load %arg4[%c0_70, %c0_71, %c0_72] : memref<9x1x256xf32, #tpu.memory_space<vmem>>, vector<1x1x256xf32>
    %115 = vector.shape_cast %114 : vector<1x1x256xf32> to vector<1x256xf32>
    %116 = vector.broadcast %115 : vector<1x256xf32> to vector<32x256xf32>
    %117 = arith.mulf %113, %116 : vector<32x256xf32>
    %c0_73 = arith.constant 0 : index
    %c0_74 = arith.constant 0 : index
    %c0_75 = arith.constant 0 : index
    %118 = vector.load %arg10[%c0_73, %c0_74, %c0_75] : memref<9x32x32xf32, #tpu.memory_space<vmem>>, vector<1x32x32xf32>
    %119 = vector.shape_cast %118 : vector<1x32x32xf32> to vector<32x32xf32>
    %cst_76 = arith.constant dense<0.000000e+00> : vector<32x256xf32>
    %120 = tpu.matmul %119, %117, %cst_76 {dimension_numbers = #tpu.dot_dimension_numbers<[1], [0], [0], [1], [0, 0, 1, 1], [], []>} : vector<32x32xf32>, vector<32x256xf32>, vector<32x256xf32> -> vector<32x256xf32>
    %c16_i32_77 = arith.constant 16 : i32
    %121 = tpu.dynamic_rotate %112 by %c16_i32_77 dim 1 : vector<32x256xf32>, i32 -> vector<32x256xf32>
    %c1_78 = arith.constant 1 : index
    %c0_79 = arith.constant 0 : index
    %c0_80 = arith.constant 0 : index
    %122 = vector.load %arg4[%c1_78, %c0_79, %c0_80] : memref<9x1x256xf32, #tpu.memory_space<vmem>>, vector<1x1x256xf32>
    %123 = vector.shape_cast %122 : vector<1x1x256xf32> to vector<1x256xf32>
    %124 = vector.broadcast %123 : vector<1x256xf32> to vector<32x256xf32>
    %125 = arith.mulf %121, %124 : vector<32x256xf32>
    %c1_81 = arith.constant 1 : index
    %c0_82 = arith.constant 0 : index
    %c0_83 = arith.constant 0 : index
    %126 = vector.load %arg10[%c1_81, %c0_82, %c0_83] : memref<9x32x32xf32, #tpu.memory_space<vmem>>, vector<1x32x32xf32>
    %127 = vector.shape_cast %126 : vector<1x32x32xf32> to vector<32x32xf32>
    %cst_84 = arith.constant dense<0.000000e+00> : vector<32x256xf32>
    %128 = tpu.matmul %127, %125, %cst_84 {dimension_numbers = #tpu.dot_dimension_numbers<[1], [0], [0], [1], [0, 0, 1, 1], [], []>} : vector<32x32xf32>, vector<32x256xf32>, vector<32x256xf32> -> vector<32x256xf32>
    %129 = arith.addf %120, %128 : vector<32x256xf32>
    %c15_i32_85 = arith.constant 15 : i32
    %130 = tpu.dynamic_rotate %112 by %c15_i32_85 dim 1 : vector<32x256xf32>, i32 -> vector<32x256xf32>
    %c2_86 = arith.constant 2 : index
    %c0_87 = arith.constant 0 : index
    %c0_88 = arith.constant 0 : index
    %131 = vector.load %arg4[%c2_86, %c0_87, %c0_88] : memref<9x1x256xf32, #tpu.memory_space<vmem>>, vector<1x1x256xf32>
    %132 = vector.shape_cast %131 : vector<1x1x256xf32> to vector<1x256xf32>
    %133 = vector.broadcast %132 : vector<1x256xf32> to vector<32x256xf32>
    %134 = arith.mulf %130, %133 : vector<32x256xf32>
    %c2_89 = arith.constant 2 : index
    %c0_90 = arith.constant 0 : index
    %c0_91 = arith.constant 0 : index
    %135 = vector.load %arg10[%c2_89, %c0_90, %c0_91] : memref<9x32x32xf32, #tpu.memory_space<vmem>>, vector<1x32x32xf32>
    %136 = vector.shape_cast %135 : vector<1x32x32xf32> to vector<32x32xf32>
    %cst_92 = arith.constant dense<0.000000e+00> : vector<32x256xf32>
    %137 = tpu.matmul %136, %134, %cst_92 {dimension_numbers = #tpu.dot_dimension_numbers<[1], [0], [0], [1], [0, 0, 1, 1], [], []>} : vector<32x32xf32>, vector<32x256xf32>, vector<32x256xf32> -> vector<32x256xf32>
    %138 = arith.addf %129, %137 : vector<32x256xf32>
    %c1_i32_93 = arith.constant 1 : i32
    %139 = tpu.dynamic_rotate %112 by %c1_i32_93 dim 1 : vector<32x256xf32>, i32 -> vector<32x256xf32>
    %c3_94 = arith.constant 3 : index
    %c0_95 = arith.constant 0 : index
    %c0_96 = arith.constant 0 : index
    %140 = vector.load %arg4[%c3_94, %c0_95, %c0_96] : memref<9x1x256xf32, #tpu.memory_space<vmem>>, vector<1x1x256xf32>
    %141 = vector.shape_cast %140 : vector<1x1x256xf32> to vector<1x256xf32>
    %142 = vector.broadcast %141 : vector<1x256xf32> to vector<32x256xf32>
    %143 = arith.mulf %139, %142 : vector<32x256xf32>
    %c3_97 = arith.constant 3 : index
    %c0_98 = arith.constant 0 : index
    %c0_99 = arith.constant 0 : index
    %144 = vector.load %arg10[%c3_97, %c0_98, %c0_99] : memref<9x32x32xf32, #tpu.memory_space<vmem>>, vector<1x32x32xf32>
    %145 = vector.shape_cast %144 : vector<1x32x32xf32> to vector<32x32xf32>
    %cst_100 = arith.constant dense<0.000000e+00> : vector<32x256xf32>
    %146 = tpu.matmul %145, %143, %cst_100 {dimension_numbers = #tpu.dot_dimension_numbers<[1], [0], [0], [1], [0, 0, 1, 1], [], []>} : vector<32x32xf32>, vector<32x256xf32>, vector<32x256xf32> -> vector<32x256xf32>
    %147 = arith.addf %138, %146 : vector<32x256xf32>
    %c4_101 = arith.constant 4 : index
    %c0_102 = arith.constant 0 : index
    %c0_103 = arith.constant 0 : index
    %148 = vector.load %arg10[%c4_101, %c0_102, %c0_103] : memref<9x32x32xf32, #tpu.memory_space<vmem>>, vector<1x32x32xf32>
    %149 = vector.shape_cast %148 : vector<1x32x32xf32> to vector<32x32xf32>
    %cst_104 = arith.constant dense<0.000000e+00> : vector<32x256xf32>
    %150 = tpu.matmul %149, %112, %cst_104 {dimension_numbers = #tpu.dot_dimension_numbers<[1], [0], [0], [1], [0, 0, 1, 1], [], []>} : vector<32x32xf32>, vector<32x256xf32>, vector<32x256xf32> -> vector<32x256xf32>
    %151 = arith.addf %147, %150 : vector<32x256xf32>
    %c255_i32_105 = arith.constant 255 : i32
    %152 = tpu.dynamic_rotate %112 by %c255_i32_105 dim 1 : vector<32x256xf32>, i32 -> vector<32x256xf32>
    %c5_106 = arith.constant 5 : index
    %c0_107 = arith.constant 0 : index
    %c0_108 = arith.constant 0 : index
    %153 = vector.load %arg4[%c5_106, %c0_107, %c0_108] : memref<9x1x256xf32, #tpu.memory_space<vmem>>, vector<1x1x256xf32>
    %154 = vector.shape_cast %153 : vector<1x1x256xf32> to vector<1x256xf32>
    %155 = vector.broadcast %154 : vector<1x256xf32> to vector<32x256xf32>
    %156 = arith.mulf %152, %155 : vector<32x256xf32>
    %c5_109 = arith.constant 5 : index
    %c0_110 = arith.constant 0 : index
    %c0_111 = arith.constant 0 : index
    %157 = vector.load %arg10[%c5_109, %c0_110, %c0_111] : memref<9x32x32xf32, #tpu.memory_space<vmem>>, vector<1x32x32xf32>
    %158 = vector.shape_cast %157 : vector<1x32x32xf32> to vector<32x32xf32>
    %cst_112 = arith.constant dense<0.000000e+00> : vector<32x256xf32>
    %159 = tpu.matmul %158, %156, %cst_112 {dimension_numbers = #tpu.dot_dimension_numbers<[1], [0], [0], [1], [0, 0, 1, 1], [], []>} : vector<32x32xf32>, vector<32x256xf32>, vector<32x256xf32> -> vector<32x256xf32>
    %160 = arith.addf %151, %159 : vector<32x256xf32>
    %c241_i32_113 = arith.constant 241 : i32
    %161 = tpu.dynamic_rotate %112 by %c241_i32_113 dim 1 : vector<32x256xf32>, i32 -> vector<32x256xf32>
    %c6_114 = arith.constant 6 : index
    %c0_115 = arith.constant 0 : index
    %c0_116 = arith.constant 0 : index
    %162 = vector.load %arg4[%c6_114, %c0_115, %c0_116] : memref<9x1x256xf32, #tpu.memory_space<vmem>>, vector<1x1x256xf32>
    %163 = vector.shape_cast %162 : vector<1x1x256xf32> to vector<1x256xf32>
    %164 = vector.broadcast %163 : vector<1x256xf32> to vector<32x256xf32>
    %165 = arith.mulf %161, %164 : vector<32x256xf32>
    %c6_117 = arith.constant 6 : index
    %c0_118 = arith.constant 0 : index
    %c0_119 = arith.constant 0 : index
    %166 = vector.load %arg10[%c6_117, %c0_118, %c0_119] : memref<9x32x32xf32, #tpu.memory_space<vmem>>, vector<1x32x32xf32>
    %167 = vector.shape_cast %166 : vector<1x32x32xf32> to vector<32x32xf32>
    %cst_120 = arith.constant dense<0.000000e+00> : vector<32x256xf32>
    %168 = tpu.matmul %167, %165, %cst_120 {dimension_numbers = #tpu.dot_dimension_numbers<[1], [0], [0], [1], [0, 0, 1, 1], [], []>} : vector<32x32xf32>, vector<32x256xf32>, vector<32x256xf32> -> vector<32x256xf32>
    %169 = arith.addf %160, %168 : vector<32x256xf32>
    %c240_i32_121 = arith.constant 240 : i32
    %170 = tpu.dynamic_rotate %112 by %c240_i32_121 dim 1 : vector<32x256xf32>, i32 -> vector<32x256xf32>
    %c7_122 = arith.constant 7 : index
    %c0_123 = arith.constant 0 : index
    %c0_124 = arith.constant 0 : index
    %171 = vector.load %arg4[%c7_122, %c0_123, %c0_124] : memref<9x1x256xf32, #tpu.memory_space<vmem>>, vector<1x1x256xf32>
    %172 = vector.shape_cast %171 : vector<1x1x256xf32> to vector<1x256xf32>
    %173 = vector.broadcast %172 : vector<1x256xf32> to vector<32x256xf32>
    %174 = arith.mulf %170, %173 : vector<32x256xf32>
    %c7_125 = arith.constant 7 : index
    %c0_126 = arith.constant 0 : index
    %c0_127 = arith.constant 0 : index
    %175 = vector.load %arg10[%c7_125, %c0_126, %c0_127] : memref<9x32x32xf32, #tpu.memory_space<vmem>>, vector<1x32x32xf32>
    %176 = vector.shape_cast %175 : vector<1x32x32xf32> to vector<32x32xf32>
    %cst_128 = arith.constant dense<0.000000e+00> : vector<32x256xf32>
    %177 = tpu.matmul %176, %174, %cst_128 {dimension_numbers = #tpu.dot_dimension_numbers<[1], [0], [0], [1], [0, 0, 1, 1], [], []>} : vector<32x32xf32>, vector<32x256xf32>, vector<32x256xf32> -> vector<32x256xf32>
    %178 = arith.addf %169, %177 : vector<32x256xf32>
    %c239_i32_129 = arith.constant 239 : i32
    %179 = tpu.dynamic_rotate %112 by %c239_i32_129 dim 1 : vector<32x256xf32>, i32 -> vector<32x256xf32>
    %c8_130 = arith.constant 8 : index
    %c0_131 = arith.constant 0 : index
    %c0_132 = arith.constant 0 : index
    %180 = vector.load %arg4[%c8_130, %c0_131, %c0_132] : memref<9x1x256xf32, #tpu.memory_space<vmem>>, vector<1x1x256xf32>
    %181 = vector.shape_cast %180 : vector<1x1x256xf32> to vector<1x256xf32>
    %182 = vector.broadcast %181 : vector<1x256xf32> to vector<32x256xf32>
    %183 = arith.mulf %179, %182 : vector<32x256xf32>
    %c8_133 = arith.constant 8 : index
    %c0_134 = arith.constant 0 : index
    %c0_135 = arith.constant 0 : index
    %184 = vector.load %arg10[%c8_133, %c0_134, %c0_135] : memref<9x32x32xf32, #tpu.memory_space<vmem>>, vector<1x32x32xf32>
    %185 = vector.shape_cast %184 : vector<1x32x32xf32> to vector<32x32xf32>
    %cst_136 = arith.constant dense<0.000000e+00> : vector<32x256xf32>
    %186 = tpu.matmul %185, %183, %cst_136 {dimension_numbers = #tpu.dot_dimension_numbers<[1], [0], [0], [1], [0, 0, 1, 1], [], []>} : vector<32x32xf32>, vector<32x256xf32>, vector<32x256xf32> -> vector<32x256xf32>
    %187 = arith.addf %178, %186 : vector<32x256xf32>
    %c0_137 = arith.constant 0 : index
    %c0_138 = arith.constant 0 : index
    %188 = vector.load %arg11[%c0_137, %c0_138] : memref<32x1xf32, #tpu.memory_space<vmem>>, vector<32x1xf32>
    %189 = vector.broadcast %188 : vector<32x1xf32> to vector<32x256xf32>
    %190 = arith.addf %187, %189 : vector<32x256xf32>
    %c0_139 = arith.constant 0 : index
    %c0_140 = arith.constant 0 : index
    %c0_141 = arith.constant 0 : index
    %191 = vector.load %arg2[%c0_139, %c0_140, %c0_141] : memref<1x32x1xf32, #tpu.memory_space<vmem>>, vector<1x32x1xf32>
    %192 = vector.shape_cast %191 : vector<1x32x1xf32> to vector<32x1xf32>
    %193 = vector.broadcast %192 : vector<32x1xf32> to vector<32x256xf32>
    %194 = arith.addf %190, %193 : vector<32x256xf32>
    %cst_142 = arith.constant dense<0.000000e+00> : vector<32xf32>
    %195 = vector.multi_reduction <add>, %194, %cst_142 [1] : vector<32x256xf32> to vector<32xf32>
    %196 = vector.shape_cast %195 : vector<32xf32> to vector<32x1xf32>
    %197 = arith.mulf %194, %194 : vector<32x256xf32>
    %cst_143 = arith.constant dense<0.000000e+00> : vector<32xf32>
    %198 = vector.multi_reduction <add>, %197, %cst_143 [1] : vector<32x256xf32> to vector<32xf32>
    %199 = vector.shape_cast %198 : vector<32xf32> to vector<32x1xf32>
    %cst_144 = arith.constant dense<0.000000e+00> : vector<32x1xf32>
    %200 = tpu.matmul %0, %196, %cst_144 {dimension_numbers = #tpu.dot_dimension_numbers<[1], [0], [0], [1], [0, 0, 1, 1], [], []>} : vector<32x32xf32>, vector<32x1xf32>, vector<32x1xf32> -> vector<32x1xf32>
    %cst_145 = arith.constant 9.765625E-4 : f32
    %201 = vector.broadcast %cst_145 : f32 to vector<32x1xf32>
    %202 = arith.mulf %200, %201 : vector<32x1xf32>
    %cst_146 = arith.constant dense<0.000000e+00> : vector<32x1xf32>
    %203 = tpu.matmul %0, %199, %cst_146 {dimension_numbers = #tpu.dot_dimension_numbers<[1], [0], [0], [1], [0, 0, 1, 1], [], []>} : vector<32x32xf32>, vector<32x1xf32>, vector<32x1xf32> -> vector<32x1xf32>
    %cst_147 = arith.constant 9.765625E-4 : f32
    %204 = vector.broadcast %cst_147 : f32 to vector<32x1xf32>
    %205 = arith.mulf %203, %204 : vector<32x1xf32>
    %206 = arith.mulf %202, %202 : vector<32x1xf32>
    %207 = arith.subf %205, %206 : vector<32x1xf32>
    %208 = vector.broadcast %202 : vector<32x1xf32> to vector<32x256xf32>
    %209 = arith.subf %194, %208 : vector<32x256xf32>
    %cst_148 = arith.constant 9.99999974E-6 : f32
    %210 = vector.broadcast %cst_148 : f32 to vector<32x1xf32>
    %211 = arith.addf %207, %210 : vector<32x1xf32>
    %212 = math.rsqrt %211 : vector<32x1xf32>
    %213 = vector.broadcast %212 : vector<32x1xf32> to vector<32x256xf32>
    %214 = arith.mulf %209, %213 : vector<32x256xf32>
    %c0_149 = arith.constant 0 : index
    %c0_150 = arith.constant 0 : index
    %215 = vector.load %arg12[%c0_149, %c0_150] : memref<32x1xf32, #tpu.memory_space<vmem>>, vector<32x1xf32>
    %216 = vector.broadcast %215 : vector<32x1xf32> to vector<32x256xf32>
    %217 = arith.mulf %214, %216 : vector<32x256xf32>
    %c0_151 = arith.constant 0 : index
    %c0_152 = arith.constant 0 : index
    %218 = vector.load %arg13[%c0_151, %c0_152] : memref<32x1xf32, #tpu.memory_space<vmem>>, vector<32x1xf32>
    %219 = vector.broadcast %218 : vector<32x1xf32> to vector<32x256xf32>
    %220 = arith.addf %217, %219 : vector<32x256xf32>
    %221 = arith.negf %220 : vector<32x256xf32>
    %222 = math.exp %221 : vector<32x256xf32>
    %cst_153 = arith.constant 1.000000e+00 : f32
    %223 = vector.broadcast %cst_153 : f32 to vector<32x256xf32>
    %224 = arith.addf %223, %222 : vector<32x256xf32>
    %225 = arith.divf %223, %224 : vector<32x256xf32>
    %226 = arith.mulf %220, %225 : vector<32x256xf32>
    %c17_i32_154 = arith.constant 17 : i32
    %227 = tpu.dynamic_rotate %226 by %c17_i32_154 dim 1 : vector<32x256xf32>, i32 -> vector<32x256xf32>
    %c0_155 = arith.constant 0 : index
    %c0_156 = arith.constant 0 : index
    %c0_157 = arith.constant 0 : index
    %228 = vector.load %arg4[%c0_155, %c0_156, %c0_157] : memref<9x1x256xf32, #tpu.memory_space<vmem>>, vector<1x1x256xf32>
    %229 = vector.shape_cast %228 : vector<1x1x256xf32> to vector<1x256xf32>
    %230 = vector.broadcast %229 : vector<1x256xf32> to vector<32x256xf32>
    %231 = arith.mulf %227, %230 : vector<32x256xf32>
    %c0_158 = arith.constant 0 : index
    %c0_159 = arith.constant 0 : index
    %c0_160 = arith.constant 0 : index
    %232 = vector.load %arg14[%c0_158, %c0_159, %c0_160] : memref<9x32x32xf32, #tpu.memory_space<vmem>>, vector<1x32x32xf32>
    %233 = vector.shape_cast %232 : vector<1x32x32xf32> to vector<32x32xf32>
    %cst_161 = arith.constant dense<0.000000e+00> : vector<32x256xf32>
    %234 = tpu.matmul %233, %231, %cst_161 {dimension_numbers = #tpu.dot_dimension_numbers<[1], [0], [0], [1], [0, 0, 1, 1], [], []>} : vector<32x32xf32>, vector<32x256xf32>, vector<32x256xf32> -> vector<32x256xf32>
    %c16_i32_162 = arith.constant 16 : i32
    %235 = tpu.dynamic_rotate %226 by %c16_i32_162 dim 1 : vector<32x256xf32>, i32 -> vector<32x256xf32>
    %c1_163 = arith.constant 1 : index
    %c0_164 = arith.constant 0 : index
    %c0_165 = arith.constant 0 : index
    %236 = vector.load %arg4[%c1_163, %c0_164, %c0_165] : memref<9x1x256xf32, #tpu.memory_space<vmem>>, vector<1x1x256xf32>
    %237 = vector.shape_cast %236 : vector<1x1x256xf32> to vector<1x256xf32>
    %238 = vector.broadcast %237 : vector<1x256xf32> to vector<32x256xf32>
    %239 = arith.mulf %235, %238 : vector<32x256xf32>
    %c1_166 = arith.constant 1 : index
    %c0_167 = arith.constant 0 : index
    %c0_168 = arith.constant 0 : index
    %240 = vector.load %arg14[%c1_166, %c0_167, %c0_168] : memref<9x32x32xf32, #tpu.memory_space<vmem>>, vector<1x32x32xf32>
    %241 = vector.shape_cast %240 : vector<1x32x32xf32> to vector<32x32xf32>
    %cst_169 = arith.constant dense<0.000000e+00> : vector<32x256xf32>
    %242 = tpu.matmul %241, %239, %cst_169 {dimension_numbers = #tpu.dot_dimension_numbers<[1], [0], [0], [1], [0, 0, 1, 1], [], []>} : vector<32x32xf32>, vector<32x256xf32>, vector<32x256xf32> -> vector<32x256xf32>
    %243 = arith.addf %234, %242 : vector<32x256xf32>
    %c15_i32_170 = arith.constant 15 : i32
    %244 = tpu.dynamic_rotate %226 by %c15_i32_170 dim 1 : vector<32x256xf32>, i32 -> vector<32x256xf32>
    %c2_171 = arith.constant 2 : index
    %c0_172 = arith.constant 0 : index
    %c0_173 = arith.constant 0 : index
    %245 = vector.load %arg4[%c2_171, %c0_172, %c0_173] : memref<9x1x256xf32, #tpu.memory_space<vmem>>, vector<1x1x256xf32>
    %246 = vector.shape_cast %245 : vector<1x1x256xf32> to vector<1x256xf32>
    %247 = vector.broadcast %246 : vector<1x256xf32> to vector<32x256xf32>
    %248 = arith.mulf %244, %247 : vector<32x256xf32>
    %c2_174 = arith.constant 2 : index
    %c0_175 = arith.constant 0 : index
    %c0_176 = arith.constant 0 : index
    %249 = vector.load %arg14[%c2_174, %c0_175, %c0_176] : memref<9x32x32xf32, #tpu.memory_space<vmem>>, vector<1x32x32xf32>
    %250 = vector.shape_cast %249 : vector<1x32x32xf32> to vector<32x32xf32>
    %cst_177 = arith.constant dense<0.000000e+00> : vector<32x256xf32>
    %251 = tpu.matmul %250, %248, %cst_177 {dimension_numbers = #tpu.dot_dimension_numbers<[1], [0], [0], [1], [0, 0, 1, 1], [], []>} : vector<32x32xf32>, vector<32x256xf32>, vector<32x256xf32> -> vector<32x256xf32>
    %252 = arith.addf %243, %251 : vector<32x256xf32>
    %c1_i32_178 = arith.constant 1 : i32
    %253 = tpu.dynamic_rotate %226 by %c1_i32_178 dim 1 : vector<32x256xf32>, i32 -> vector<32x256xf32>
    %c3_179 = arith.constant 3 : index
    %c0_180 = arith.constant 0 : index
    %c0_181 = arith.constant 0 : index
    %254 = vector.load %arg4[%c3_179, %c0_180, %c0_181] : memref<9x1x256xf32, #tpu.memory_space<vmem>>, vector<1x1x256xf32>
    %255 = vector.shape_cast %254 : vector<1x1x256xf32> to vector<1x256xf32>
    %256 = vector.broadcast %255 : vector<1x256xf32> to vector<32x256xf32>
    %257 = arith.mulf %253, %256 : vector<32x256xf32>
    %c3_182 = arith.constant 3 : index
    %c0_183 = arith.constant 0 : index
    %c0_184 = arith.constant 0 : index
    %258 = vector.load %arg14[%c3_182, %c0_183, %c0_184] : memref<9x32x32xf32, #tpu.memory_space<vmem>>, vector<1x32x32xf32>
    %259 = vector.shape_cast %258 : vector<1x32x32xf32> to vector<32x32xf32>
    %cst_185 = arith.constant dense<0.000000e+00> : vector<32x256xf32>
    %260 = tpu.matmul %259, %257, %cst_185 {dimension_numbers = #tpu.dot_dimension_numbers<[1], [0], [0], [1], [0, 0, 1, 1], [], []>} : vector<32x32xf32>, vector<32x256xf32>, vector<32x256xf32> -> vector<32x256xf32>
    %261 = arith.addf %252, %260 : vector<32x256xf32>
    %c4_186 = arith.constant 4 : index
    %c0_187 = arith.constant 0 : index
    %c0_188 = arith.constant 0 : index
    %262 = vector.load %arg14[%c4_186, %c0_187, %c0_188] : memref<9x32x32xf32, #tpu.memory_space<vmem>>, vector<1x32x32xf32>
    %263 = vector.shape_cast %262 : vector<1x32x32xf32> to vector<32x32xf32>
    %cst_189 = arith.constant dense<0.000000e+00> : vector<32x256xf32>
    %264 = tpu.matmul %263, %226, %cst_189 {dimension_numbers = #tpu.dot_dimension_numbers<[1], [0], [0], [1], [0, 0, 1, 1], [], []>} : vector<32x32xf32>, vector<32x256xf32>, vector<32x256xf32> -> vector<32x256xf32>
    %265 = arith.addf %261, %264 : vector<32x256xf32>
    %c255_i32_190 = arith.constant 255 : i32
    %266 = tpu.dynamic_rotate %226 by %c255_i32_190 dim 1 : vector<32x256xf32>, i32 -> vector<32x256xf32>
    %c5_191 = arith.constant 5 : index
    %c0_192 = arith.constant 0 : index
    %c0_193 = arith.constant 0 : index
    %267 = vector.load %arg4[%c5_191, %c0_192, %c0_193] : memref<9x1x256xf32, #tpu.memory_space<vmem>>, vector<1x1x256xf32>
    %268 = vector.shape_cast %267 : vector<1x1x256xf32> to vector<1x256xf32>
    %269 = vector.broadcast %268 : vector<1x256xf32> to vector<32x256xf32>
    %270 = arith.mulf %266, %269 : vector<32x256xf32>
    %c5_194 = arith.constant 5 : index
    %c0_195 = arith.constant 0 : index
    %c0_196 = arith.constant 0 : index
    %271 = vector.load %arg14[%c5_194, %c0_195, %c0_196] : memref<9x32x32xf32, #tpu.memory_space<vmem>>, vector<1x32x32xf32>
    %272 = vector.shape_cast %271 : vector<1x32x32xf32> to vector<32x32xf32>
    %cst_197 = arith.constant dense<0.000000e+00> : vector<32x256xf32>
    %273 = tpu.matmul %272, %270, %cst_197 {dimension_numbers = #tpu.dot_dimension_numbers<[1], [0], [0], [1], [0, 0, 1, 1], [], []>} : vector<32x32xf32>, vector<32x256xf32>, vector<32x256xf32> -> vector<32x256xf32>
    %274 = arith.addf %265, %273 : vector<32x256xf32>
    %c241_i32_198 = arith.constant 241 : i32
    %275 = tpu.dynamic_rotate %226 by %c241_i32_198 dim 1 : vector<32x256xf32>, i32 -> vector<32x256xf32>
    %c6_199 = arith.constant 6 : index
    %c0_200 = arith.constant 0 : index
    %c0_201 = arith.constant 0 : index
    %276 = vector.load %arg4[%c6_199, %c0_200, %c0_201] : memref<9x1x256xf32, #tpu.memory_space<vmem>>, vector<1x1x256xf32>
    %277 = vector.shape_cast %276 : vector<1x1x256xf32> to vector<1x256xf32>
    %278 = vector.broadcast %277 : vector<1x256xf32> to vector<32x256xf32>
    %279 = arith.mulf %275, %278 : vector<32x256xf32>
    %c6_202 = arith.constant 6 : index
    %c0_203 = arith.constant 0 : index
    %c0_204 = arith.constant 0 : index
    %280 = vector.load %arg14[%c6_202, %c0_203, %c0_204] : memref<9x32x32xf32, #tpu.memory_space<vmem>>, vector<1x32x32xf32>
    %281 = vector.shape_cast %280 : vector<1x32x32xf32> to vector<32x32xf32>
    %cst_205 = arith.constant dense<0.000000e+00> : vector<32x256xf32>
    %282 = tpu.matmul %281, %279, %cst_205 {dimension_numbers = #tpu.dot_dimension_numbers<[1], [0], [0], [1], [0, 0, 1, 1], [], []>} : vector<32x32xf32>, vector<32x256xf32>, vector<32x256xf32> -> vector<32x256xf32>
    %283 = arith.addf %274, %282 : vector<32x256xf32>
    %c240_i32_206 = arith.constant 240 : i32
    %284 = tpu.dynamic_rotate %226 by %c240_i32_206 dim 1 : vector<32x256xf32>, i32 -> vector<32x256xf32>
    %c7_207 = arith.constant 7 : index
    %c0_208 = arith.constant 0 : index
    %c0_209 = arith.constant 0 : index
    %285 = vector.load %arg4[%c7_207, %c0_208, %c0_209] : memref<9x1x256xf32, #tpu.memory_space<vmem>>, vector<1x1x256xf32>
    %286 = vector.shape_cast %285 : vector<1x1x256xf32> to vector<1x256xf32>
    %287 = vector.broadcast %286 : vector<1x256xf32> to vector<32x256xf32>
    %288 = arith.mulf %284, %287 : vector<32x256xf32>
    %c7_210 = arith.constant 7 : index
    %c0_211 = arith.constant 0 : index
    %c0_212 = arith.constant 0 : index
    %289 = vector.load %arg14[%c7_210, %c0_211, %c0_212] : memref<9x32x32xf32, #tpu.memory_space<vmem>>, vector<1x32x32xf32>
    %290 = vector.shape_cast %289 : vector<1x32x32xf32> to vector<32x32xf32>
    %cst_213 = arith.constant dense<0.000000e+00> : vector<32x256xf32>
    %291 = tpu.matmul %290, %288, %cst_213 {dimension_numbers = #tpu.dot_dimension_numbers<[1], [0], [0], [1], [0, 0, 1, 1], [], []>} : vector<32x32xf32>, vector<32x256xf32>, vector<32x256xf32> -> vector<32x256xf32>
    %292 = arith.addf %283, %291 : vector<32x256xf32>
    %c239_i32_214 = arith.constant 239 : i32
    %293 = tpu.dynamic_rotate %226 by %c239_i32_214 dim 1 : vector<32x256xf32>, i32 -> vector<32x256xf32>
    %c8_215 = arith.constant 8 : index
    %c0_216 = arith.constant 0 : index
    %c0_217 = arith.constant 0 : index
    %294 = vector.load %arg4[%c8_215, %c0_216, %c0_217] : memref<9x1x256xf32, #tpu.memory_space<vmem>>, vector<1x1x256xf32>
    %295 = vector.shape_cast %294 : vector<1x1x256xf32> to vector<1x256xf32>
    %296 = vector.broadcast %295 : vector<1x256xf32> to vector<32x256xf32>
    %297 = arith.mulf %293, %296 : vector<32x256xf32>
    %c8_218 = arith.constant 8 : index
    %c0_219 = arith.constant 0 : index
    %c0_220 = arith.constant 0 : index
    %298 = vector.load %arg14[%c8_218, %c0_219, %c0_220] : memref<9x32x32xf32, #tpu.memory_space<vmem>>, vector<1x32x32xf32>
    %299 = vector.shape_cast %298 : vector<1x32x32xf32> to vector<32x32xf32>
    %cst_221 = arith.constant dense<0.000000e+00> : vector<32x256xf32>
    %300 = tpu.matmul %299, %297, %cst_221 {dimension_numbers = #tpu.dot_dimension_numbers<[1], [0], [0], [1], [0, 0, 1, 1], [], []>} : vector<32x32xf32>, vector<32x256xf32>, vector<32x256xf32> -> vector<32x256xf32>
    %301 = arith.addf %292, %300 : vector<32x256xf32>
    %c0_222 = arith.constant 0 : index
    %c0_223 = arith.constant 0 : index
    %302 = vector.load %arg15[%c0_222, %c0_223] : memref<32x1xf32, #tpu.memory_space<vmem>>, vector<32x1xf32>
    %303 = vector.broadcast %302 : vector<32x1xf32> to vector<32x256xf32>
    %304 = arith.addf %301, %303 : vector<32x256xf32>
    %305 = arith.addf %304, %80 : vector<32x256xf32>
    %c0_224 = arith.constant 0 : index
    %c0_225 = arith.constant 0 : index
    %306 = vector.load %arg16[%c0_224, %c0_225] : memref<32x32xf32, #tpu.memory_space<vmem>>, vector<32x32xf32>
    %cst_226 = arith.constant dense<0.000000e+00> : vector<32x256xf32>
    %307 = tpu.matmul %306, %305, %cst_226 {dimension_numbers = #tpu.dot_dimension_numbers<[1], [0], [0], [1], [0, 0, 1, 1], [], []>} : vector<32x32xf32>, vector<32x256xf32>, vector<32x256xf32> -> vector<32x256xf32>
    %c0_227 = arith.constant 0 : index
    %c0_228 = arith.constant 0 : index
    %308 = vector.load %arg17[%c0_227, %c0_228] : memref<32x1xf32, #tpu.memory_space<vmem>>, vector<32x1xf32>
    %309 = vector.broadcast %308 : vector<32x1xf32> to vector<32x256xf32>
    %310 = arith.addf %307, %309 : vector<32x256xf32>
    %c0_229 = arith.constant 0 : index
    %c0_230 = arith.constant 0 : index
    %c0_231 = arith.constant 0 : index
    %311 = vector.load %arg3[%c0_229, %c0_230, %c0_231] : memref<1x8x32xf32, #tpu.memory_space<vmem>>, vector<1x8x32xf32>
    %312 = vector.shape_cast %311 : vector<1x8x32xf32> to vector<8x32xf32>
    %c0_232 = arith.constant 0 : index
    %c0_233 = arith.constant 0 : index
    %313 = vector.load %arg18[%c0_232, %c0_233] : memref<32x64xf32, #tpu.memory_space<vmem>>, vector<32x64xf32>
    %cst_234 = arith.constant dense<0.000000e+00> : vector<8x64xf32>
    %314 = tpu.matmul %312, %313, %cst_234 {dimension_numbers = #tpu.dot_dimension_numbers<[1], [0], [0], [1], [0, 0, 1, 1], [], []>} : vector<8x32xf32>, vector<32x64xf32>, vector<8x64xf32> -> vector<8x64xf32>
    %c0_235 = arith.constant 0 : index
    %c0_236 = arith.constant 0 : index
    %315 = vector.load %arg19[%c0_235, %c0_236] : memref<1x64xf32, #tpu.memory_space<vmem>>, vector<1x64xf32>
    %316 = vector.broadcast %315 : vector<1x64xf32> to vector<8x64xf32>
    %317 = arith.addf %314, %316 : vector<8x64xf32>
    %318 = vector.extract_strided_slice %317 {offsets = [0, 0], sizes = [8, 32], strides = [1, 1]} : vector<8x64xf32> to vector<8x32xf32>
    %319 = vector.extract_strided_slice %317 {offsets = [0, 32], sizes = [8, 32], strides = [1, 1]} : vector<8x64xf32> to vector<8x32xf32>
    %cst_237 = arith.constant dense<0.000000e+00> : vector<8x256xf32>
    %320 = tpu.matmul %318, %310, %cst_237 {dimension_numbers = #tpu.dot_dimension_numbers<[1], [0], [0], [1], [0, 0, 1, 1], [], []>} : vector<8x32xf32>, vector<32x256xf32>, vector<8x256xf32> -> vector<8x256xf32>
    %cst_238 = arith.constant 0.176776692 : f32
    %321 = vector.broadcast %cst_238 : f32 to vector<8x256xf32>
    %322 = arith.mulf %320, %321 : vector<8x256xf32>
    %cst_239 = arith.constant dense<0xFF800000> : vector<256xf32>
    %323 = vector.multi_reduction <maximumf>, %322, %cst_239 [0] : vector<8x256xf32> to vector<256xf32>
    %324 = vector.shape_cast %323 : vector<256xf32> to vector<1x256xf32>
    %325 = vector.broadcast %324 : vector<1x256xf32> to vector<8x256xf32>
    %326 = arith.subf %322, %325 : vector<8x256xf32>
    %327 = math.exp %326 : vector<8x256xf32>
    %cst_240 = arith.constant dense<0.000000e+00> : vector<256xf32>
    %328 = vector.multi_reduction <add>, %327, %cst_240 [0] : vector<8x256xf32> to vector<256xf32>
    %329 = vector.shape_cast %328 : vector<256xf32> to vector<1x256xf32>
    %cst_241 = arith.constant dense<0.000000e+00> : vector<32x256xf32>
    %330 = tpu.matmul %319, %327, %cst_241 {dimension_numbers = #tpu.dot_dimension_numbers<[0], [0], [1], [1], [0, 1, 1, 1], [], []>} : vector<8x32xf32>, vector<8x256xf32>, vector<32x256xf32> -> vector<32x256xf32>
    %331 = tpu.reciprocal %329 {approx = true} : vector<1x256xf32> -> vector<1x256xf32>
    %332 = vector.broadcast %331 : vector<1x256xf32> to vector<32x256xf32>
    %333 = arith.mulf %330, %332 : vector<32x256xf32>
    %c0_242 = arith.constant 0 : index
    %c0_243 = arith.constant 0 : index
    %334 = vector.load %arg20[%c0_242, %c0_243] : memref<32x32xf32, #tpu.memory_space<vmem>>, vector<32x32xf32>
    %cst_244 = arith.constant dense<0.000000e+00> : vector<32x256xf32>
    %335 = tpu.matmul %334, %333, %cst_244 {dimension_numbers = #tpu.dot_dimension_numbers<[1], [0], [0], [1], [0, 0, 1, 1], [], []>} : vector<32x32xf32>, vector<32x256xf32>, vector<32x256xf32> -> vector<32x256xf32>
    %c0_245 = arith.constant 0 : index
    %c0_246 = arith.constant 0 : index
    %336 = vector.load %arg21[%c0_245, %c0_246] : memref<32x1xf32, #tpu.memory_space<vmem>>, vector<32x1xf32>
    %337 = vector.broadcast %336 : vector<32x1xf32> to vector<32x256xf32>
    %338 = arith.addf %335, %337 : vector<32x256xf32>
    %339 = arith.addf %305, %338 : vector<32x256xf32>
    %cst_247 = arith.constant dense<0.000000e+00> : vector<32xf32>
    %340 = vector.multi_reduction <add>, %339, %cst_247 [1] : vector<32x256xf32> to vector<32xf32>
    %341 = vector.shape_cast %340 : vector<32xf32> to vector<32x1xf32>
    %342 = arith.mulf %339, %339 : vector<32x256xf32>
    %cst_248 = arith.constant dense<0.000000e+00> : vector<32xf32>
    %343 = vector.multi_reduction <add>, %342, %cst_248 [1] : vector<32x256xf32> to vector<32xf32>
    %344 = vector.shape_cast %343 : vector<32xf32> to vector<32x1xf32>
    %cst_249 = arith.constant dense<0.000000e+00> : vector<32x1xf32>
    %345 = tpu.matmul %0, %341, %cst_249 {dimension_numbers = #tpu.dot_dimension_numbers<[1], [0], [0], [1], [0, 0, 1, 1], [], []>} : vector<32x32xf32>, vector<32x1xf32>, vector<32x1xf32> -> vector<32x1xf32>
    %cst_250 = arith.constant 9.765625E-4 : f32
    %346 = vector.broadcast %cst_250 : f32 to vector<32x1xf32>
    %347 = arith.mulf %345, %346 : vector<32x1xf32>
    %cst_251 = arith.constant dense<0.000000e+00> : vector<32x1xf32>
    %348 = tpu.matmul %0, %344, %cst_251 {dimension_numbers = #tpu.dot_dimension_numbers<[1], [0], [0], [1], [0, 0, 1, 1], [], []>} : vector<32x32xf32>, vector<32x1xf32>, vector<32x1xf32> -> vector<32x1xf32>
    %cst_252 = arith.constant 9.765625E-4 : f32
    %349 = vector.broadcast %cst_252 : f32 to vector<32x1xf32>
    %350 = arith.mulf %348, %349 : vector<32x1xf32>
    %351 = arith.mulf %347, %347 : vector<32x1xf32>
    %352 = arith.subf %350, %351 : vector<32x1xf32>
    %353 = vector.broadcast %347 : vector<32x1xf32> to vector<32x256xf32>
    %354 = arith.subf %339, %353 : vector<32x256xf32>
    %cst_253 = arith.constant 9.99999974E-6 : f32
    %355 = vector.broadcast %cst_253 : f32 to vector<32x1xf32>
    %356 = arith.addf %352, %355 : vector<32x1xf32>
    %357 = math.rsqrt %356 : vector<32x1xf32>
    %358 = vector.broadcast %357 : vector<32x1xf32> to vector<32x256xf32>
    %359 = arith.mulf %354, %358 : vector<32x256xf32>
    %c0_254 = arith.constant 0 : index
    %c0_255 = arith.constant 0 : index
    %360 = vector.load %arg22[%c0_254, %c0_255] : memref<32x1xf32, #tpu.memory_space<vmem>>, vector<32x1xf32>
    %361 = vector.broadcast %360 : vector<32x1xf32> to vector<32x256xf32>
    %362 = arith.mulf %359, %361 : vector<32x256xf32>
    %c0_256 = arith.constant 0 : index
    %c0_257 = arith.constant 0 : index
    %363 = vector.load %arg23[%c0_256, %c0_257] : memref<32x1xf32, #tpu.memory_space<vmem>>, vector<32x1xf32>
    %364 = vector.broadcast %363 : vector<32x1xf32> to vector<32x256xf32>
    %365 = arith.addf %362, %364 : vector<32x256xf32>
    %366 = arith.negf %365 : vector<32x256xf32>
    %367 = math.exp %366 : vector<32x256xf32>
    %cst_258 = arith.constant 1.000000e+00 : f32
    %368 = vector.broadcast %cst_258 : f32 to vector<32x256xf32>
    %369 = arith.addf %368, %367 : vector<32x256xf32>
    %370 = arith.divf %368, %369 : vector<32x256xf32>
    %371 = arith.mulf %365, %370 : vector<32x256xf32>
    %c17_i32_259 = arith.constant 17 : i32
    %372 = tpu.dynamic_rotate %371 by %c17_i32_259 dim 1 : vector<32x256xf32>, i32 -> vector<32x256xf32>
    %c0_260 = arith.constant 0 : index
    %c0_261 = arith.constant 0 : index
    %c0_262 = arith.constant 0 : index
    %373 = vector.load %arg4[%c0_260, %c0_261, %c0_262] : memref<9x1x256xf32, #tpu.memory_space<vmem>>, vector<1x1x256xf32>
    %374 = vector.shape_cast %373 : vector<1x1x256xf32> to vector<1x256xf32>
    %375 = vector.broadcast %374 : vector<1x256xf32> to vector<32x256xf32>
    %376 = arith.mulf %372, %375 : vector<32x256xf32>
    %c0_263 = arith.constant 0 : index
    %c0_264 = arith.constant 0 : index
    %c0_265 = arith.constant 0 : index
    %377 = vector.load %arg24[%c0_263, %c0_264, %c0_265] : memref<9x4x32xf32, #tpu.memory_space<vmem>>, vector<1x4x32xf32>
    %378 = vector.shape_cast %377 : vector<1x4x32xf32> to vector<4x32xf32>
    %cst_266 = arith.constant dense<0.000000e+00> : vector<4x256xf32>
    %379 = tpu.matmul %378, %376, %cst_266 {dimension_numbers = #tpu.dot_dimension_numbers<[1], [0], [0], [1], [0, 0, 1, 1], [], []>} : vector<4x32xf32>, vector<32x256xf32>, vector<4x256xf32> -> vector<4x256xf32>
    %c16_i32_267 = arith.constant 16 : i32
    %380 = tpu.dynamic_rotate %371 by %c16_i32_267 dim 1 : vector<32x256xf32>, i32 -> vector<32x256xf32>
    %c1_268 = arith.constant 1 : index
    %c0_269 = arith.constant 0 : index
    %c0_270 = arith.constant 0 : index
    %381 = vector.load %arg4[%c1_268, %c0_269, %c0_270] : memref<9x1x256xf32, #tpu.memory_space<vmem>>, vector<1x1x256xf32>
    %382 = vector.shape_cast %381 : vector<1x1x256xf32> to vector<1x256xf32>
    %383 = vector.broadcast %382 : vector<1x256xf32> to vector<32x256xf32>
    %384 = arith.mulf %380, %383 : vector<32x256xf32>
    %c1_271 = arith.constant 1 : index
    %c0_272 = arith.constant 0 : index
    %c0_273 = arith.constant 0 : index
    %385 = vector.load %arg24[%c1_271, %c0_272, %c0_273] : memref<9x4x32xf32, #tpu.memory_space<vmem>>, vector<1x4x32xf32>
    %386 = vector.shape_cast %385 : vector<1x4x32xf32> to vector<4x32xf32>
    %cst_274 = arith.constant dense<0.000000e+00> : vector<4x256xf32>
    %387 = tpu.matmul %386, %384, %cst_274 {dimension_numbers = #tpu.dot_dimension_numbers<[1], [0], [0], [1], [0, 0, 1, 1], [], []>} : vector<4x32xf32>, vector<32x256xf32>, vector<4x256xf32> -> vector<4x256xf32>
    %388 = arith.addf %379, %387 : vector<4x256xf32>
    %c15_i32_275 = arith.constant 15 : i32
    %389 = tpu.dynamic_rotate %371 by %c15_i32_275 dim 1 : vector<32x256xf32>, i32 -> vector<32x256xf32>
    %c2_276 = arith.constant 2 : index
    %c0_277 = arith.constant 0 : index
    %c0_278 = arith.constant 0 : index
    %390 = vector.load %arg4[%c2_276, %c0_277, %c0_278] : memref<9x1x256xf32, #tpu.memory_space<vmem>>, vector<1x1x256xf32>
    %391 = vector.shape_cast %390 : vector<1x1x256xf32> to vector<1x256xf32>
    %392 = vector.broadcast %391 : vector<1x256xf32> to vector<32x256xf32>
    %393 = arith.mulf %389, %392 : vector<32x256xf32>
    %c2_279 = arith.constant 2 : index
    %c0_280 = arith.constant 0 : index
    %c0_281 = arith.constant 0 : index
    %394 = vector.load %arg24[%c2_279, %c0_280, %c0_281] : memref<9x4x32xf32, #tpu.memory_space<vmem>>, vector<1x4x32xf32>
    %395 = vector.shape_cast %394 : vector<1x4x32xf32> to vector<4x32xf32>
    %cst_282 = arith.constant dense<0.000000e+00> : vector<4x256xf32>
    %396 = tpu.matmul %395, %393, %cst_282 {dimension_numbers = #tpu.dot_dimension_numbers<[1], [0], [0], [1], [0, 0, 1, 1], [], []>} : vector<4x32xf32>, vector<32x256xf32>, vector<4x256xf32> -> vector<4x256xf32>
    %397 = arith.addf %388, %396 : vector<4x256xf32>
    %c1_i32_283 = arith.constant 1 : i32
    %398 = tpu.dynamic_rotate %371 by %c1_i32_283 dim 1 : vector<32x256xf32>, i32 -> vector<32x256xf32>
    %c3_284 = arith.constant 3 : index
    %c0_285 = arith.constant 0 : index
    %c0_286 = arith.constant 0 : index
    %399 = vector.load %arg4[%c3_284, %c0_285, %c0_286] : memref<9x1x256xf32, #tpu.memory_space<vmem>>, vector<1x1x256xf32>
    %400 = vector.shape_cast %399 : vector<1x1x256xf32> to vector<1x256xf32>
    %401 = vector.broadcast %400 : vector<1x256xf32> to vector<32x256xf32>
    %402 = arith.mulf %398, %401 : vector<32x256xf32>
    %c3_287 = arith.constant 3 : index
    %c0_288 = arith.constant 0 : index
    %c0_289 = arith.constant 0 : index
    %403 = vector.load %arg24[%c3_287, %c0_288, %c0_289] : memref<9x4x32xf32, #tpu.memory_space<vmem>>, vector<1x4x32xf32>
    %404 = vector.shape_cast %403 : vector<1x4x32xf32> to vector<4x32xf32>
    %cst_290 = arith.constant dense<0.000000e+00> : vector<4x256xf32>
    %405 = tpu.matmul %404, %402, %cst_290 {dimension_numbers = #tpu.dot_dimension_numbers<[1], [0], [0], [1], [0, 0, 1, 1], [], []>} : vector<4x32xf32>, vector<32x256xf32>, vector<4x256xf32> -> vector<4x256xf32>
    %406 = arith.addf %397, %405 : vector<4x256xf32>
    %c4_291 = arith.constant 4 : index
    %c0_292 = arith.constant 0 : index
    %c0_293 = arith.constant 0 : index
    %407 = vector.load %arg24[%c4_291, %c0_292, %c0_293] : memref<9x4x32xf32, #tpu.memory_space<vmem>>, vector<1x4x32xf32>
    %408 = vector.shape_cast %407 : vector<1x4x32xf32> to vector<4x32xf32>
    %cst_294 = arith.constant dense<0.000000e+00> : vector<4x256xf32>
    %409 = tpu.matmul %408, %371, %cst_294 {dimension_numbers = #tpu.dot_dimension_numbers<[1], [0], [0], [1], [0, 0, 1, 1], [], []>} : vector<4x32xf32>, vector<32x256xf32>, vector<4x256xf32> -> vector<4x256xf32>
    %410 = arith.addf %406, %409 : vector<4x256xf32>
    %c255_i32_295 = arith.constant 255 : i32
    %411 = tpu.dynamic_rotate %371 by %c255_i32_295 dim 1 : vector<32x256xf32>, i32 -> vector<32x256xf32>
    %c5_296 = arith.constant 5 : index
    %c0_297 = arith.constant 0 : index
    %c0_298 = arith.constant 0 : index
    %412 = vector.load %arg4[%c5_296, %c0_297, %c0_298] : memref<9x1x256xf32, #tpu.memory_space<vmem>>, vector<1x1x256xf32>
    %413 = vector.shape_cast %412 : vector<1x1x256xf32> to vector<1x256xf32>
    %414 = vector.broadcast %413 : vector<1x256xf32> to vector<32x256xf32>
    %415 = arith.mulf %411, %414 : vector<32x256xf32>
    %c5_299 = arith.constant 5 : index
    %c0_300 = arith.constant 0 : index
    %c0_301 = arith.constant 0 : index
    %416 = vector.load %arg24[%c5_299, %c0_300, %c0_301] : memref<9x4x32xf32, #tpu.memory_space<vmem>>, vector<1x4x32xf32>
    %417 = vector.shape_cast %416 : vector<1x4x32xf32> to vector<4x32xf32>
    %cst_302 = arith.constant dense<0.000000e+00> : vector<4x256xf32>
    %418 = tpu.matmul %417, %415, %cst_302 {dimension_numbers = #tpu.dot_dimension_numbers<[1], [0], [0], [1], [0, 0, 1, 1], [], []>} : vector<4x32xf32>, vector<32x256xf32>, vector<4x256xf32> -> vector<4x256xf32>
    %419 = arith.addf %410, %418 : vector<4x256xf32>
    %c241_i32_303 = arith.constant 241 : i32
    %420 = tpu.dynamic_rotate %371 by %c241_i32_303 dim 1 : vector<32x256xf32>, i32 -> vector<32x256xf32>
    %c6_304 = arith.constant 6 : index
    %c0_305 = arith.constant 0 : index
    %c0_306 = arith.constant 0 : index
    %421 = vector.load %arg4[%c6_304, %c0_305, %c0_306] : memref<9x1x256xf32, #tpu.memory_space<vmem>>, vector<1x1x256xf32>
    %422 = vector.shape_cast %421 : vector<1x1x256xf32> to vector<1x256xf32>
    %423 = vector.broadcast %422 : vector<1x256xf32> to vector<32x256xf32>
    %424 = arith.mulf %420, %423 : vector<32x256xf32>
    %c6_307 = arith.constant 6 : index
    %c0_308 = arith.constant 0 : index
    %c0_309 = arith.constant 0 : index
    %425 = vector.load %arg24[%c6_307, %c0_308, %c0_309] : memref<9x4x32xf32, #tpu.memory_space<vmem>>, vector<1x4x32xf32>
    %426 = vector.shape_cast %425 : vector<1x4x32xf32> to vector<4x32xf32>
    %cst_310 = arith.constant dense<0.000000e+00> : vector<4x256xf32>
    %427 = tpu.matmul %426, %424, %cst_310 {dimension_numbers = #tpu.dot_dimension_numbers<[1], [0], [0], [1], [0, 0, 1, 1], [], []>} : vector<4x32xf32>, vector<32x256xf32>, vector<4x256xf32> -> vector<4x256xf32>
    %428 = arith.addf %419, %427 : vector<4x256xf32>
    %c240_i32_311 = arith.constant 240 : i32
    %429 = tpu.dynamic_rotate %371 by %c240_i32_311 dim 1 : vector<32x256xf32>, i32 -> vector<32x256xf32>
    %c7_312 = arith.constant 7 : index
    %c0_313 = arith.constant 0 : index
    %c0_314 = arith.constant 0 : index
    %430 = vector.load %arg4[%c7_312, %c0_313, %c0_314] : memref<9x1x256xf32, #tpu.memory_space<vmem>>, vector<1x1x256xf32>
    %431 = vector.shape_cast %430 : vector<1x1x256xf32> to vector<1x256xf32>
    %432 = vector.broadcast %431 : vector<1x256xf32> to vector<32x256xf32>
    %433 = arith.mulf %429, %432 : vector<32x256xf32>
    %c7_315 = arith.constant 7 : index
    %c0_316 = arith.constant 0 : index
    %c0_317 = arith.constant 0 : index
    %434 = vector.load %arg24[%c7_315, %c0_316, %c0_317] : memref<9x4x32xf32, #tpu.memory_space<vmem>>, vector<1x4x32xf32>
    %435 = vector.shape_cast %434 : vector<1x4x32xf32> to vector<4x32xf32>
    %cst_318 = arith.constant dense<0.000000e+00> : vector<4x256xf32>
    %436 = tpu.matmul %435, %433, %cst_318 {dimension_numbers = #tpu.dot_dimension_numbers<[1], [0], [0], [1], [0, 0, 1, 1], [], []>} : vector<4x32xf32>, vector<32x256xf32>, vector<4x256xf32> -> vector<4x256xf32>
    %437 = arith.addf %428, %436 : vector<4x256xf32>
    %c239_i32_319 = arith.constant 239 : i32
    %438 = tpu.dynamic_rotate %371 by %c239_i32_319 dim 1 : vector<32x256xf32>, i32 -> vector<32x256xf32>
    %c8_320 = arith.constant 8 : index
    %c0_321 = arith.constant 0 : index
    %c0_322 = arith.constant 0 : index
    %439 = vector.load %arg4[%c8_320, %c0_321, %c0_322] : memref<9x1x256xf32, #tpu.memory_space<vmem>>, vector<1x1x256xf32>
    %440 = vector.shape_cast %439 : vector<1x1x256xf32> to vector<1x256xf32>
    %441 = vector.broadcast %440 : vector<1x256xf32> to vector<32x256xf32>
    %442 = arith.mulf %438, %441 : vector<32x256xf32>
    %c8_323 = arith.constant 8 : index
    %c0_324 = arith.constant 0 : index
    %c0_325 = arith.constant 0 : index
    %443 = vector.load %arg24[%c8_323, %c0_324, %c0_325] : memref<9x4x32xf32, #tpu.memory_space<vmem>>, vector<1x4x32xf32>
    %444 = vector.shape_cast %443 : vector<1x4x32xf32> to vector<4x32xf32>
    %cst_326 = arith.constant dense<0.000000e+00> : vector<4x256xf32>
    %445 = tpu.matmul %444, %442, %cst_326 {dimension_numbers = #tpu.dot_dimension_numbers<[1], [0], [0], [1], [0, 0, 1, 1], [], []>} : vector<4x32xf32>, vector<32x256xf32>, vector<4x256xf32> -> vector<4x256xf32>
    %446 = arith.addf %437, %445 : vector<4x256xf32>
    %c0_327 = arith.constant 0 : index
    %c0_328 = arith.constant 0 : index
    %447 = vector.load %arg25[%c0_327, %c0_328] : memref<4x1xf32, #tpu.memory_space<vmem>>, vector<4x1xf32>
    %448 = vector.broadcast %447 : vector<4x1xf32> to vector<4x256xf32>
    %449 = arith.addf %446, %448 : vector<4x256xf32>
    %c0_329 = arith.constant 0 : index
    %c0_330 = arith.constant 0 : index
    %c0_331 = arith.constant 0 : index
    %450 = vector.load %arg26[%c0_329, %c0_330, %c0_331] : memref<1x4x256xf32, #tpu.memory_space<vmem>>, vector<1x4x256xf32>
    %451 = vector.shape_cast %450 : vector<1x4x256xf32> to vector<4x256xf32>
    %452 = vector.shape_cast %449 : vector<4x256xf32> to vector<1x4x256xf32>
    tpu.vector_store %arg26[%c0_329, %c0_330, %c0_331], %452 {strides = array<i32>} : memref<1x4x256xf32, #tpu.memory_space<vmem>>, vector<1x4x256xf32>,
    return
  }
  func.func @transform_0(%arg0: i32) -> (i32, i32, i32) {
    %c0_i32 = arith.constant 0 : i32
    %c0_i32_0 = arith.constant 0 : i32
    %c0_i32_1 = arith.constant 0 : i32
    return %arg0, %c0_i32, %c0_i32_0 : i32, i32, i32
  }
  func.func @transform_1(%arg0: i32) -> (i32, i32, i32) {
    %c0_i32 = arith.constant 0 : i32
    %c0_i32_0 = arith.constant 0 : i32
    %c0_i32_1 = arith.constant 0 : i32
    return %arg0, %c0_i32, %c0_i32_0 : i32, i32, i32
  }
  func.func @transform_2(%arg0: i32) -> (i32, i32, i32) {
    %c0_i32 = arith.constant 0 : i32
    %c0_i32_0 = arith.constant 0 : i32
    %c0_i32_1 = arith.constant 0 : i32
    return %arg0, %c0_i32, %c0_i32_0 : i32, i32, i32
  }
  func.func @transform_3(%arg0: i32) -> (i32, i32, i32) {
    %c0_i32 = arith.constant 0 : i32
    %c0_i32_0 = arith.constant 0 : i32
    %c0_i32_1 = arith.constant 0 : i32
    %c0_i32_2 = arith.constant 0 : i32
    return %c0_i32, %c0_i32_0, %c0_i32_1 : i32, i32, i32
  }
  func.func @transform_4(%arg0: i32) -> (i32, i32) {
    %c0_i32 = arith.constant 0 : i32
    %c0_i32_0 = arith.constant 0 : i32
    %c0_i32_1 = arith.constant 0 : i32
    return %c0_i32, %c0_i32_0 : i32, i32
  }
  func.func @transform_5(%arg0: i32) -> (i32, i32, i32) {
    %c0_i32 = arith.constant 0 : i32
    %c0_i32_0 = arith.constant 0 : i32
    %c0_i32_1 = arith.constant 0 : i32
    %c0_i32_2 = arith.constant 0 : i32
    return %c0_i32, %c0_i32_0, %c0_i32_1 : i32, i32, i32
  }
  func.func @transform_6(%arg0: i32) -> (i32, i32) {
    %c0_i32 = arith.constant 0 : i32
    %c0_i32_0 = arith.constant 0 : i32
    %c0_i32_1 = arith.constant 0 : i32
    return %c0_i32, %c0_i32_0 : i32, i32
  }
  func.func @transform_7(%arg0: i32) -> (i32, i32) {
    %c0_i32 = arith.constant 0 : i32
    %c0_i32_0 = arith.constant 0 : i32
    %c0_i32_1 = arith.constant 0 : i32
    return %c0_i32, %c0_i32_0 : i32, i32
  }
  func.func @transform_8(%arg0: i32) -> (i32, i32) {
    %c0_i32 = arith.constant 0 : i32
    %c0_i32_0 = arith.constant 0 : i32
    %c0_i32_1 = arith.constant 0 : i32
    return %c0_i32, %c0_i32_0 : i32, i32
  }
  func.func @transform_9(%arg0: i32) -> (i32, i32, i32) {
    %c0_i32 = arith.constant 0 : i32
    %c0_i32_0 = arith.constant 0 : i32
    %c0_i32_1 = arith.constant 0 : i32
    %c0_i32_2 = arith.constant 0 : i32
    return %c0_i32, %c0_i32_0, %c0_i32_1 : i32, i32, i32
  }
  func.func @transform_10(%arg0: i32) -> (i32, i32) {
    %c0_i32 = arith.constant 0 : i32
    %c0_i32_0 = arith.constant 0 : i32
    %c0_i32_1 = arith.constant 0 : i32
    return %c0_i32, %c0_i32_0 : i32, i32
  }
  func.func @transform_11(%arg0: i32) -> (i32, i32) {
    %c0_i32 = arith.constant 0 : i32
    %c0_i32_0 = arith.constant 0 : i32
    %c0_i32_1 = arith.constant 0 : i32
    return %c0_i32, %c0_i32_0 : i32, i32
  }
  func.func @transform_12(%arg0: i32) -> (i32, i32) {
    %c0_i32 = arith.constant 0 : i32
    %c0_i32_0 = arith.constant 0 : i32
    %c0_i32_1 = arith.constant 0 : i32
    return %c0_i32, %c0_i32_0 : i32, i32
  }
  func.func @transform_13(%arg0: i32) -> (i32, i32, i32) {
    %c0_i32 = arith.constant 0 : i32
    %c0_i32_0 = arith.constant 0 : i32
    %c0_i32_1 = arith.constant 0 : i32
    %c0_i32_2 = arith.constant 0 : i32
    return %c0_i32, %c0_i32_0, %c0_i32_1 : i32, i32, i32
  }
  func.func @transform_14(%arg0: i32) -> (i32, i32) {
    %c0_i32 = arith.constant 0 : i32
    %c0_i32_0 = arith.constant 0 : i32
    %c0_i32_1 = arith.constant 0 : i32
    return %c0_i32, %c0_i32_0 : i32, i32
  }
  func.func @transform_15(%arg0: i32) -> (i32, i32) {
    %c0_i32 = arith.constant 0 : i32
    %c0_i32_0 = arith.constant 0 : i32
    %c0_i32_1 = arith.constant 0 : i32
    return %c0_i32, %c0_i32_0 : i32, i32
  }
  func.func @transform_16(%arg0: i32) -> (i32, i32) {
    %c0_i32 = arith.constant 0 : i32
    %c0_i32_0 = arith.constant 0 : i32
    %c0_i32_1 = arith.constant 0 : i32
    return %c0_i32, %c0_i32_0 : i32, i32
  }
  func.func @transform_17(%arg0: i32) -> (i32, i32) {
    %c0_i32 = arith.constant 0 : i32
    %c0_i32_0 = arith.constant 0 : i32
    %c0_i32_1 = arith.constant 0 : i32
    return %c0_i32, %c0_i32_0 : i32, i32
  }
  func.func @transform_18(%arg0: i32) -> (i32, i32) {
    %c0_i32 = arith.constant 0 : i32
    %c0_i32_0 = arith.constant 0 : i32
    %c0_i32_1 = arith.constant 0 : i32
    return %c0_i32, %c0_i32_0 : i32, i32
  }
  func.func @transform_19(%arg0: i32) -> (i32, i32) {
    %c0_i32 = arith.constant 0 : i32
    %c0_i32_0 = arith.constant 0 : i32
    %c0_i32_1 = arith.constant 0 : i32
    return %c0_i32, %c0_i32_0 : i32, i32
  }
  func.func @transform_20(%arg0: i32) -> (i32, i32) {
    %c0_i32 = arith.constant 0 : i32
    %c0_i32_0 = arith.constant 0 : i32
    %c0_i32_1 = arith.constant 0 : i32
    return %c0_i32, %c0_i32_0 : i32, i32
  }
  func.func @transform_21(%arg0: i32) -> (i32, i32) {
    %c0_i32 = arith.constant 0 : i32
    %c0_i32_0 = arith.constant 0 : i32
    %c0_i32_1 = arith.constant 0 : i32
    return %c0_i32, %c0_i32_0 : i32, i32
  }
  func.func @transform_22(%arg0: i32) -> (i32, i32) {
    %c0_i32 = arith.constant 0 : i32
    %c0_i32_0 = arith.constant 0 : i32
    %c0_i32_1 = arith.constant 0 : i32
    return %c0_i32, %c0_i32_0 : i32, i32
  }
  func.func @transform_23(%arg0: i32) -> (i32, i32, i32) {
    %c0_i32 = arith.constant 0 : i32
    %c0_i32_0 = arith.constant 0 : i32
    %c0_i32_1 = arith.constant 0 : i32
    %c0_i32_2 = arith.constant 0 : i32
    return %c0_i32, %c0_i32_0, %c0_i32_1 : i32, i32, i32
  }
  func.func @transform_24(%arg0: i32) -> (i32, i32) {
    %c0_i32 = arith.constant 0 : i32
    %c0_i32_0 = arith.constant 0 : i32
    %c0_i32_1 = arith.constant 0 : i32
    return %c0_i32, %c0_i32_0 : i32, i32
  }
  func.func @transform_25(%arg0: i32) -> (i32, i32, i32) {
    %c0_i32 = arith.constant 0 : i32
    %c0_i32_0 = arith.constant 0 : i32
    %c0_i32_1 = arith.constant 0 : i32
    return %arg0, %c0_i32, %c0_i32_0 : i32, i32, i32
  }
}

</mosaic_0001>

<bundles_post_ra>
// kernel: unet_wrap_forward.1
= control target key start
LH: loop header
LB: loop body
LE: loop exit
PB: predicated region body
PF: predicated region fallthrough
CT: control target
= control target key end

     0   :  { %s8798_s29 = smov 0   ;;  %s11258_s0 = inlined_call_operand.vmem [shape: f32[2,8,256], index: 0, kind: input, shape index: {}]   ;;  %s11259_s1 = inlined_call_operand.vmem [shape: f32[2,32,1], index: 1, kind: input, shape index: {}]   ;;  %s11260_s2 = inlined_call_operand.vmem [shape: f32[2,8,32], index: 2, kind: input, shape index: {}]   ;;  %s11261_s3 = inlined_call_operand.vmem [shape: f32[9,1,256], index: 3, kind: input, shape index: {}]   ;;  %s11262_s4 = inlined_call_operand.vmem [shape: f32[32,32], index: 4, kind: input, shape index: {}]   ;;  %s11263_s5 = inlined_call_operand.vmem [shape: f32[9,32,8], index: 5, kind: input, shape index: {}]   ;;  %s11264_s6 = inlined_call_operand.vmem [shape: f32[32,1], index: 6, kind: input, shape index: {}]   ;;  %s11265_s7 = inlined_call_operand.vmem [shape: f32[32,1], index: 7, kind: input, shape index: {}]   ;;  %s11266_s8 = inlined_call_operand.vmem [shape: f32[32,1], index: 8, kind: input, shape index: {}]   ;;  %s11267_s9 = inlined_call_operand.vmem [shape: f32[9,32,32], index: 9, kind: input, shape index: {}]   ;;  %s11268_s10 = inlined_call_operand.vmem [shape: f32[32,1], index: 10, kind: input, shape index: {}]   ;;  %s11269_s11 = inlined_call_operand.vmem [shape: f32[32,1], index: 11, kind: input, shape index: {}]   ;;  %s11270_s12 = inlined_call_operand.vmem [shape: f32[32,1], index: 12, kind: input, shape index: {}]   ;;  %s11271_s13 = inlined_call_operand.vmem [shape: f32[9,32,32], index: 13, kind: input, shape index: {}]   ;;  %s11272_s14 = inlined_call_operand.vmem [shape: f32[32,1], index: 14, kind: input, shape index: {}]   ;;  %s11273_s15 = inlined_call_operand.vmem [shape: f32[32,32], index: 15, kind: input, shape index: {}]   ;;  %s11274_s16 = inlined_call_operand.vmem [shape: f32[32,1], index: 16, kind: input, shape index: {}]   ;;  %s11275_s17 = inlined_call_operand.vmem [shape: f32[32,64], index: 17, kind: input, shape index: {}]   ;;  %s11276_s18 = inlined_call_operand.vmem [shape: f32[1,64], index: 18, kind: input, shape index: {}]   ;;  %s11277_s19 = inlined_call_operand.vmem [shape: f32[32,32], index: 19, kind: input, shape index: {}]   ;;  %s11278_s20 = inlined_call_operand.vmem [shape: f32[32,1], index: 20, kind: input, shape index: {}]   ;;  %s11279_s21 = inlined_call_operand.vmem [shape: f32[32,1], index: 21, kind: input, shape index: {}]   ;;  %s11280_s22 = inlined_call_operand.vmem [shape: f32[32,1], index: 22, kind: input, shape index: {}]   ;;  %s11281_s23 = inlined_call_operand.vmem [shape: f32[9,4,32], index: 23, kind: input, shape index: {}]   ;;  %s11282_s24 = inlined_call_operand.vmem [shape: f32[4,1], index: 24, kind: input, shape index: {}]   ;;  %s11283_s25 = inlined_call_operand.vmem [shape: f32[2,4,256], index: 25, kind: output, shape index: {}]  }
   0x1   :  { %11333 = sst [smem:[#allocation12_spill]] %s11258_s0 }
   0x2   :  { %11334 = sst [smem:[#allocation13_spill]] %s11259_s1 }
   0x3   :  { %11335 = sst [smem:[#allocation14_spill]] %s11260_s2 }
   0x4   :  { %11336 = sst [smem:[#allocation15_spill]] %s11261_s3 }
   0x5   :  { %11337 = sst [smem:[#allocation16_spill]] %s11262_s4 }
   0x6   :  { %11338 = sst [smem:[#allocation17_spill]] %s11263_s5 }
   0x7   :  { %11339 = sst [smem:[#allocation18_spill]] %s11264_s6 }
   0x8   :  { %11340 = sst [smem:[#allocation19_spill]] %s11265_s7 }
   0x9   :  { %11341 = sst [smem:[#allocation20_spill]] %s11266_s8 }
   0xa   :  { %11342 = sst [smem:[#allocation21_spill]] %s11267_s9 }
   0xb   :  { %11343 = sst [smem:[#allocation22_spill]] %s11268_s10 }
   0xc   :  { %11344 = sst [smem:[#allocation23_spill]] %s11280_s22 }
   0xd   :  { %11345 = sst [smem:[#allocation24_spill]] %s11281_s23 }
   0xe   :  { %11346 = sst [smem:[#allocation25_spill]] %s11282_s24 }
   0xf   :  { %11347 = sst [smem:[#allocation26_spill]] %s11283_s25 }
  0x10 LB: > { %11348 = sst [smem:[#allocation2_spill]] %s8653_s29  ;;  %s7528_s2 = sadd.s32 4294967295, %s8653_s29   ;;  %s8653_s29 = sphi %s8798_s29, %s35_s29  }
  0x11   : > { %p7532_p0 = scmp.ge.s32.totalorder %s8653_s29, 1  ;;  %p706_p1 = scmp.lt.s32.totalorder %s8653_s29, 3 }
  0x13   : > { %p707_p2 = pnand %p7532_p0, %p706_p1 }
  0x15   : > { %710 = sbr.rel (%p707_p2) target bundleno = 4567 (0x11d7), region = 120 }
  0x1c   : > { %p783_p3 = scmp.lt.s32.totalorder %s7528_s2, 1  ;;  %v11317_v0 = vmov 0.0   ;;  %s11349_s3 = sld [smem:[#allocation12_spill]]  ;;  %v812_v3 = vlaneseq  ;;  %vm862_vm3 = vcmask 64512   ;;  %v8664_v39 = vmov 0  }
  0x1d   : > { %939 = vmatprep.mubr.f32.mxu0 %v11317_v0  ;;  %1974 = vmatprep.mubr.f32.mxu1 %v11317_v0  ;;  %s11305_s1 = smov 16   ;;  %s11303_s8 = smov 17   ;;  %vm2059_vm9 = vcmask 261120   ;;  %vm8666_vm10 = vmmov 0  }
  0x1e   : > { %s11397_s2 = smov (!%p783_p3, %s7528_s2), 1  ;;  %s11301_s27 = smov 15   ;;  %v820_v4 = vshrl.u32 %v812_v3, 7  ;;  %v8850_v5 = vand.u32 127, %v812_v3  ;;  %8510 = vset.pattern.permute.xlu1 %v8664_v39  ;;  %8509 = vset.pattern.permute.xlu0 %v8664_v39 }
  0x1f   : > { %s7833_s6 = sshll.u32 %s11397_s2, 4  ;;  %s11299_s4 = smov 1  }
  0x20   : > { %s11297_s28 = smov 127   ;;  %s11295_s9 = smov 113   ;;  %v8852_v6 = vsub.s32 0, %v820_v4  ;;  %v8854_v7 = vsub.s32 1, %v820_v4  ;;  %vm814_vm0 = vcmp.lt.s32.totalorder %v8850_v5, 17  ;;  %vm839_vm1 = vcmp.lt.s32.totalorder %v8850_v5, 16 }
  0x21   : > { %s11293_s5 = smov 112   ;;  %s11291_s0 = smov 111   ;;  %vm1069_vm2 = vcmp.lt.s32.totalorder %v8850_v5, 15  ;;  %vm1205_vm4 = vcmp.lt.s32.totalorder %v8850_v5, 1  ;;  %vm1863_vm5 = vcmp.lt.s32.totalorder %v8850_v5, 111  ;;  %vm1455_vm6 = vcmp.lt.s32.totalorder %v8850_v5, 127 }
  0x22   : > { %s787_s26 = scalar_lea.vmem %s11349_s3, %s7833_s6  ;;  %s11350_s7 = sld [smem:[#allocation15_spill]]  ;;  %vm1591_vm7 = vcmp.lt.s32.totalorder %v8850_v5, 113  ;;  %vm1727_vm8 = vcmp.lt.s32.totalorder %v8850_v5, 112 }
  0x23   : > { %v8814_v1 = vld [vmem:[%s787_s26] sm:$0xff]  ;;  %v8820_v2 = vld [vmem:[%s787_s26 + $0x8] sm:$0xff]  ;;  %s11351_s6 = sld [smem:[#allocation17_spill]]  ;;  %s11358_s3 = sld [smem:[#allocation19_spill]] }
  0x24   : > { %835 = vrot.lane.b32.xlu0 %v8814_v1, %s11305_s1  ;;  %808 = vrot.lane.b32.xlu1 %v8814_v1, %s11303_s8  ;;  %s11365_s26 = smov 127   ;;  %s11368_s30 = smov 111  }
  0x25   : > { %s11369_s10 = sld [smem:[#allocation22_spill]]  ;;  %s11370_s25 = sld [smem:[#allocation13_spill]] }
  0x26   : > { %s11372_s22 = sld [smem:[#allocation14_spill]] }
  0x28   : > { %837 = vrot.lane.b32.xlu0 %v8820_v2, %s11305_s1  ;;  %810 = vrot.lane.b32.xlu1 %v8820_v2, %s11303_s8  ;;  %v817_v8 = vld [vmem:[%s11350_s7] sm:$0x3]  ;;  %v7540_v9 = vld [vmem:[%s11350_s7 + $0x2] sm:$0x3]  ;;  %s11360_s8 = sld [smem:[#allocation20_spill]]  ;;  %s11361_s1 = smov 16  }
  0x29   : > { %v8865_v12 = vrot.slane %v7540_v9, %v8854_v7  ;;  %v8868_v13 = vrot.slane %v7540_v9, %v8852_v6  ;;  %v8871_v14 = vrot.slane %v817_v8, %v8854_v7  ;;  %v8874_v15 = vrot.slane %v817_v8, %v8852_v6  ;;  %v7553_v16 = vld [vmem:[%s11350_s7 + $0x4] sm:$0x3]  ;;  %v7542_v33 = vld [vmem:[%s11351_s6 + $0x28] sm:$0xff]  ;;  %v7543_v38 = vld [vmem:[%s11351_s6 + $0x30] sm:$0xff] }
  0x2a   : > { %v8892_v26 = vrot.slane %v7553_v16, %v8854_v7  ;;  %v7541_v28 = vld [vmem:[%s11351_s6 + $0x20] sm:$0xff]  ;;  %v7544_v45 = vld [vmem:[%s11351_s6 + $0x38] sm:$0xff]  ;;  %v8941_v46 = vrot.slane %v7553_v16, %v8852_v6  ;;  %v7606_v54 = vld [vmem:[%s11350_s7 + $0x10] sm:$0x3] }
  0x2b   : > { %v7562_v42 = vld [vmem:[%s11350_s7 + $0x6] sm:$0x3]  ;;  %v8973_v58 = vrot.slane %v7606_v54, %v8852_v6  ;;  %v8976_v59 = vrot.slane %v7606_v54, %v8854_v7  ;;  %v832_v60 = vld [vmem:[%s11351_s6 + $0x8] sm:$0xff]  ;;  %v833_v9 = vld [vmem:[%s11351_s6 + $0x10] sm:$0xff] }
  0x2c   : > { %1067 = vrot.lane.b32.xlu1 %v8820_v2, %s11301_s27  ;;  %1065 = vrot.lane.b32.xlu0 %v8814_v1, %s11301_s27  ;;  %v8946_v48 = vrot.slane %v7562_v42, %v8854_v7  ;;  %v831_v53 = vld [vmem:[%s11351_s6] sm:$0xff]  ;;  %v9009_v16 = vrot.slane %v7562_v42, %v8852_v6  ;;  %v7572_v39 = vld [vmem:[%s11351_s6 + $0x88] sm:$0xff]  ;;  %s11367_s27 = smov 112  }
  0x2d   : > { %11353 = vst [vmem:[#allocation3_spill] sm:$0xff] %v8973_v58  ;;  %11354 = vst [vmem:[#allocation4_spill] sm:$0xff] %v8976_v59  ;;  %v7574_v42 = vld [vmem:[%s11351_s6 + $0x98] sm:$0xff] }
  0x30   : > { %1203 = vrot.lane.b32.xlu1 %v8820_v2, %s11299_s4  ;;  %1201 = vrot.lane.b32.xlu0 %v8814_v1, %s11299_s4  ;;  %s11359_s4 = sld [smem:[#allocation16_spill]] }
  0x34   : > { %1453 = vrot.lane.b32.xlu1 %v8820_v2, %s11297_s28  ;;  %1451 = vrot.lane.b32.xlu0 %v8814_v1, %s11297_s28  ;;  %s7834_s28 = sshll.u32 %s11397_s2, 5 }
  0x35   : > { %s9481_s23 = scalar_lea.vmem %s11370_s25, %s7834_s28  ;;  %s11371_s25 = sld [smem:[#allocation21_spill]] }
  0x38   : > { %1589 = vrot.lane.b32.xlu1 %v8820_v2, %s11295_s9  ;;  %1587 = vrot.lane.b32.xlu0 %v8814_v1, %s11295_s9 }
  0x3c   : > { %1725 = vrot.lane.b32.xlu1 %v8820_v2, %s11293_s5  ;;  %1723 = vrot.lane.b32.xlu0 %v8814_v1, %s11293_s5  ;;  %s11352_s5 = sld [smem:[#allocation18_spill]] }
  0x40   : > { %1861 = vrot.lane.b32.xlu1 %v8820_v2, %s11291_s0  ;;  %1859 = vrot.lane.b32.xlu0 %v8814_v1, %s11291_s0  ;;  %s11366_s0 = smov 113  }
  0x42   : > { %v1996_v36 = vld [vmem:[%s11352_s5 + $0x8] sm:$0xff]  ;;  %v1995_v37 = vld [vmem:[%s11352_s5] sm:$0xff]  ;;  %v1997_v43 = vld [vmem:[%s11352_s5 + $0x10] sm:$0xff] }
  0x43   : > { %v1998_v44 = vld [vmem:[%s11352_s5 + $0x18] sm:$0xff]  ;;  %s11362_s5 = smov 17  }
  0x44   : > { %2006 = vperm.xlu1 %8510, %v1996_v36   ;;  %2001 = vperm.xlu0 %8509, %v1995_v37   ;;  %v7571_v37 = vld [vmem:[%s11351_s6 + $0x80] sm:$0xff] }
  0x48   : > { %2011 = vperm.xlu1 %8510, %v1997_v43   ;;  %2016 = vperm.xlu0 %8509, %v1998_v44  }
  0x96   : > { %v836_v10 = vpop.permute.xlu0 %835  ;;  %v809_v11 = vpop.permute.xlu1 %808 }
  0x9a   : > { %v838_v17 = vpop.permute.xlu0 %837  ;;  %v811_v18 = vpop.permute.xlu1 %810 }
  0x9b   : > { %v815_v19 = vsel %vm814_vm0, %v809_v11, %v811_v18  ;;  %v816_v20 = vsel %vm814_vm0, %v811_v18, %v809_v11  ;;  %v840_v21 = vsel %vm839_vm1, %v836_v10, %v838_v17  ;;  %v841_v22 = vsel %vm839_vm1, %v838_v17, %v836_v10  ;;  %v7609_v10 = vld [vmem:[%s11351_s6 + $0x110] sm:$0xff]  ;;  %v834_v11 = vld [vmem:[%s11351_s6 + $0x18] sm:$0xff] }
  0x9c   : > { %v856_v23 = vmul.f32 %v8865_v12, %v840_v21  ;;  %v855_v24 = vmul.f32 %v8868_v13, %v841_v22  ;;  %v830_v25 = vmul.f32 %v8871_v14, %v815_v19  ;;  %v829_v27 = vmul.f32 %v8874_v15, %v816_v20  ;;  %v7610_v17 = vld [vmem:[%s11351_s6 + $0x118] sm:$0xff]  ;;  %v7554_v20 = vld [vmem:[%s11351_s6 + $0x40] sm:$0xff]  ;;  %v7555_v21 = vld [vmem:[%s11351_s6 + $0x48] sm:$0xff] }
  0x9d   : > { %v7556_v22 = vld [vmem:[%s11351_s6 + $0x50] sm:$0xff] }
  0x9e   : > { %875 = vmatprep.subr.mxu0 %v856_v23  ;;  %v1068_v29 = vpop.permute.xlu1 %1067  ;;  %v1066_v30 = vpop.permute.xlu0 %1065  ;;  %v7579_v23 = vld [vmem:[%s11350_s7 + $0xa] sm:$0x3] }
  0x9f   : > { %876 = vmatpush1.msra.mxu0 %v855_v24  ;;  %v1070_v31 = vsel %vm1069_vm2, %v1066_v30, %v1068_v29  ;;  %v1071_v47 = vsel %vm1069_vm2, %v1068_v29, %v1066_v30  ;;  %v9047_v24 = vrot.slane %v7579_v23, %v8854_v7  ;;  %v7564_v29 = vld [vmem:[%s11351_s6 + $0x68] sm:$0xff]  ;;  %v7565_v30 = vld [vmem:[%s11351_s6 + $0x70] sm:$0xff] }
  0xa0   : > { %7545 = vmatmul.mubr.msk.f32.vlgmr.msra.gmra.mrb[0].mxu0 %vm862_vm3, %v7541_v28  ;;  %976 = vmatprep.subr.mxu0 %v830_v25  ;;  %v1086_v32 = vmul.f32 %v8892_v26, %v1070_v31  ;;  %v1085_v52 = vmul.f32 %v8941_v46, %v1071_v47  ;;  %v7588_v31 = vld [vmem:[%s11350_s7 + $0xc] sm:$0x3] }
  0xa1   : > { %977 = vmatpush1.msra.mxu0 %v829_v27  ;;  %945 = vmatprep.mubr.f32.mxu0 %v11317_v0  ;;  %v7563_v27 = vld [vmem:[%s11351_s6 + $0x60] sm:$0xff]  ;;  %v9120_v43 = vrot.slane %v7588_v31, %v8852_v6 }
  0xa2   : > { %1104 = vmatprep.subr.mxu0 %v1086_v32  ;;  %v8906_v34 = vpop.permute.xlu1 %1203  ;;  %v8908_v35 = vpop.permute.xlu0 %1201  ;;  %v9080_v32 = vrot.slane %v7579_v23, %v8852_v6 }
  0xa3   : > { %v1206_v51 = vsel %vm1205_vm4, %v8908_v35, %v8906_v34  ;;  %v1207_v18 = vsel %vm1205_vm4, %v8906_v34, %v8908_v35  ;;  %v9087_v34 = vrot.slane %v7588_v31, %v8854_v7  ;;  %11355 = vst [vmem:[#allocation5_spill] sm:$0xff] %v9120_v43 }
  0xa4   : > { %7546 = vmatmul.mubr.msk.f32.gmra.mrb[2].mxu0 %vm862_vm3, %v7542_v33  ;;  %v1222_v55 = vmul.f32 %v8946_v48, %v1206_v51  ;;  %v1221_v19 = vmul.f32 %v9009_v16, %v1207_v18 }
  0xa5   : > { %951 = vmatprep.mubr.f32.mxu0 %v11317_v0 }
  0xa6   : > { %v8921_v40 = vpop.permute.xlu1 %1453  ;;  %v8923_v41 = vpop.permute.xlu0 %1451 }
  0xa7   : > { %v1457_v25 = vsel %vm1455_vm6, %v8921_v40, %v8923_v41  ;;  %v1456_v33 = vsel %vm1455_vm6, %v8923_v41, %v8921_v40  ;;  %v7573_v40 = vld [vmem:[%s11351_s6 + $0x90] sm:$0xff]  ;;  %v7597_v41 = vld [vmem:[%s11350_s7 + $0xe] sm:$0x3]  ;;  %s11363_s7 = smov 15  }
  0xa8   : > { %7547 = vmatmul.mubr.msk.f32.gmra.mrb[4].mxu0 %vm862_vm3, %v7543_v38  ;;  %v1472_v28 = vmul.f32 %v9047_v24, %v1457_v25  ;;  %v1471_v36 = vmul.f32 %v9080_v32, %v1456_v33  ;;  %v9156_v54 = vrot.slane %v7597_v41, %v8852_v6  ;;  %v7590_v6 = vld [vmem:[%s11351_s6 + $0xc8] sm:$0xff] }
  0xa9   : > { %957 = vmatprep.mubr.f32.mxu0 %v11317_v0 }
  0xaa   : > { %v8948_v49 = vpop.permute.xlu1 %1589  ;;  %v8950_v50 = vpop.permute.xlu0 %1587  ;;  %11357 = vst [vmem:[#allocation7_spill] sm:$0xff] %v9156_v54 }
  0xab   : > { %v1593_v35 = vsel %vm1591_vm7, %v8948_v49, %v8950_v50  ;;  %v1592_v44 = vsel %vm1591_vm7, %v8950_v50, %v8948_v49  ;;  %v7582_v50 = vld [vmem:[%s11351_s6 + $0xb0] sm:$0xff] }
  0xac   : > { %7548 = vmatmul.mubr.msk.f32.gmra.mrb[6].mxu0 %vm862_vm3, %v7544_v45  ;;  %v1608_v38 = vmul.f32 %v9087_v34, %v1593_v35  ;;  %v9127_v45 = vrot.slane %v7597_v41, %v8854_v7  ;;  %v1607_v51 = vmul.f32 %v9120_v43, %v1592_v44  ;;  %v7581_v7 = vld [vmem:[%s11351_s6 + $0xa8] sm:$0xff] }
  0xad   : > { %1040 = vmatprep.mubr.f32.mxu0 %v11317_v0 }
  0xae   : > { %v8966_v56 = vpop.permute.xlu1 %1725  ;;  %v8968_v57 = vpop.permute.xlu0 %1723  ;;  %11356 = vst [vmem:[#allocation6_spill] sm:$0xff] %v9127_v45 }
  0xaf   : > { %v1729_v47 = vsel %vm1727_vm8, %v8966_v56, %v8968_v57 }
  0xb0   : > { %7549 = vmatmul.mubr.msk.f32.vlgmr.msra.gmra.mrb[0].mxu0 %vm862_vm3, %v831_v53  ;;  %v1744_v49 = vmul.f32 %v9127_v45, %v1729_v47  ;;  %v7583_v53 = vld [vmem:[%s11351_s6 + $0xb8] sm:$0xff] }
  0xb1   : > { %1046 = vmatprep.mubr.f32.mxu0 %v11317_v0  ;;  %1105 = vmatpush1.msra.mxu0 %v1085_v52  ;;  %v7580_v52 = vld [vmem:[%s11351_s6 + $0xa0] sm:$0xff] }
  0xb2   : > { %1240 = vmatprep.subr.mxu0 %v1222_v55  ;;  %v1862_v61 = vpop.permute.xlu1 %1861  ;;  %v1860_v62 = vpop.permute.xlu0 %1859  ;;  %v1728_v55 = vsel %vm1727_vm8, %v8968_v57, %v8966_v56  ;;  %v7591_v56 = vld [vmem:[%s11351_s6 + $0xd0] sm:$0xff]  ;;  %v7592_v57 = vld [vmem:[%s11351_s6 + $0xd8] sm:$0xff] }
  0xb3   : > { %v1864_v63 = vsel %vm1863_vm5, %v1860_v62, %v1862_v61  ;;  %v1865_v3 = vsel %vm1863_vm5, %v1862_v61, %v1860_v62  ;;  %v7589_v61 = vld [vmem:[%s11351_s6 + $0xc0] sm:$0xff] }
  0xb4   : > { %7550 = vmatmul.mubr.msk.f32.gmra.mrb[2].mxu0 %vm862_vm3, %v832_v60  ;;  %v8988_v4 = vmul.f32 %v8973_v58, %v1864_v63  ;;  %v8991_v8 = vmul.f32 %v8976_v59, %v1865_v3  ;;  %v1743_v60 = vmul.f32 %v9156_v54, %v1728_v55  ;;  %v7598_v62 = vld [vmem:[%s11351_s6 + $0xe0] sm:$0xff]  ;;  %v7599_v63 = vld [vmem:[%s11351_s6 + $0xe8] sm:$0xff]  ;;  %v7600_v3 = vld [vmem:[%s11351_s6 + $0xf0] sm:$0xff] }
  0xb5   : > { %1052 = vmatprep.mubr.f32.mxu0 %v11317_v0 }
  0xb6   : > { %8278 = vmatprep.subr.mxu1 %v8991_v8 }
  0xb7   : > { %8279 = vmatpush1.msra.mxu1 %v8988_v4 }
  0xb8   : > { %7551 = vmatmul.mubr.msk.f32.gmra.mrb[4].mxu0 %vm862_vm3, %v833_v9  ;;  %7613 = vmatmul.mubr.msk.f32.vlgmr.msra.gmra.mrb[0].mxu1 %vm862_vm3, %v7609_v10  ;;  %v7608_v9 = vld [vmem:[%s11351_s6 + $0x108] sm:$0xff] }
  0xb9   : > { %1058 = vmatprep.mubr.f32.mxu0 %v11317_v0  ;;  %1980 = vmatprep.mubr.f32.mxu1 %v11317_v0 }
  0xbc   : > { %7552 = vmatmul.mubr.msk.f32.gmra.mrb[6].mxu0 %vm862_vm3, %v834_v11  ;;  %7614 = vmatmul.mubr.msk.f32.gmra.mrb[2].mxu1 %vm862_vm3, %v7610_v17 }
  0xbd   : > { %1168 = vmatprep.mubr.f32.mxu0 %v11317_v0 }
  0xc0   : > { %7558 = vmatmul.mubr.msk.f32.vlgmr.msra.gmra.mrb[0].mxu0 %vm862_vm3, %v7554_v20 }
  0xc1   : > { %1174 = vmatprep.mubr.f32.mxu0 %v11317_v0  ;;  %1241 = vmatpush1.msra.mxu0 %v1221_v19 }
  0xc2   : > { %1354 = vmatprep.subr.mxu0 %v8820_v2  ;;  %v7557_v2 = vld [vmem:[%s11351_s6 + $0x58] sm:$0xff] }
  0xc3   : > { %v2002_v23 = vpop.permute.xlu0 %2001 }
  0xc4   : > { %7559 = vmatmul.mubr.msk.f32.gmra.mrb[2].mxu0 %vm862_vm3, %v7555_v21 }
  0xc5   : > { %1180 = vmatprep.mubr.f32.mxu0 %v11317_v0 }
  0xc7   : > { %v2017_v31 = vpop.permute.xlu0 %2016 }
  0xc8   : > { %7560 = vmatmul.mubr.msk.f32.gmra.mrb[4].mxu0 %vm862_vm3, %v7556_v22 }
  0xc9   : > { %1186 = vmatprep.mubr.f32.mxu0 %v11317_v0 }
  0xcc   : > { %7561 = vmatmul.mubr.msk.f32.gmra.mrb[6].mxu0 %vm862_vm3, %v7557_v2 }
  0xcd   : > { %1304 = vmatprep.mubr.f32.mxu0 %v11317_v0 }
  0xd0   : > { %7567 = vmatmul.mubr.msk.f32.vlgmr.msra.gmra.mrb[0].mxu0 %vm862_vm3, %v7563_v27 }
  0xd1   : > { %1310 = vmatprep.mubr.f32.mxu0 %v11317_v0  ;;  %1355 = vmatpush1.msra.mxu0 %v8814_v1  ;;  %v7566_v1 = vld [vmem:[%s11351_s6 + $0x78] sm:$0xff] }
  0xd2   : > { %1490 = vmatprep.subr.mxu0 %v1472_v28  ;;  %v2007_v28 = vpop.permute.xlu1 %2006 }
  0xd4   : > { %7568 = vmatmul.mubr.msk.f32.gmra.mrb[2].mxu0 %vm862_vm3, %v7564_v29 }
  0xd5   : > { %1316 = vmatprep.mubr.f32.mxu0 %v11317_v0 }
  0xd8   : > { %7569 = vmatmul.mubr.msk.f32.gmra.mrb[4].mxu0 %vm862_vm3, %v7565_v30 }
  0xd9   : > { %1322 = vmatprep.mubr.f32.mxu0 %v11317_v0 }
  0xdc   : > { %7570 = vmatmul.mubr.msk.f32.gmra.mrb[6].mxu0 %vm862_vm3, %v7566_v1 }
  0xdd   : > { %1418 = vmatprep.mubr.f32.mxu0 %v11317_v0 }
  0xe0   : > { %7575 = vmatmul.mubr.msk.f32.vlgmr.msra.gmra.mrb[0].mxu0 %vm862_vm3, %v7571_v37 }
  0xe1   : > { %1424 = vmatprep.mubr.f32.mxu0 %v11317_v0  ;;  %1491 = vmatpush1.msra.mxu0 %v1471_v36  ;;  %v2012_v36 = vpop.permute.xlu1 %2011 }
  0xe2   : > { %1626 = vmatprep.subr.mxu0 %v1608_v38 }
  0xe4   : > { %7576 = vmatmul.mubr.msk.f32.gmra.mrb[2].mxu0 %vm862_vm3, %v7572_v39 }
  0xe5   : > { %1430 = vmatprep.mubr.f32.mxu0 %v11317_v0 }
  0xe8   : > { %7577 = vmatmul.mubr.msk.f32.gmra.mrb[4].mxu0 %vm862_vm3, %v7573_v40 }
  0xe9   : > { %1436 = vmatprep.mubr.f32.mxu0 %v11317_v0 }
  0xec   : > { %7578 = vmatmul.mubr.msk.f32.gmra.mrb[6].mxu0 %vm862_vm3, %v7574_v42 }
  0xed   : > { %1554 = vmatprep.mubr.f32.mxu0 %v11317_v0 }
  0xf0   : > { %7584 = vmatmul.mubr.msk.f32.vlgmr.msra.gmra.mrb[0].mxu0 %vm862_vm3, %v7580_v52 }
  0xf1   : > { %1560 = vmatprep.mubr.f32.mxu0 %v11317_v0  ;;  %1627 = vmatpush1.msra.mxu0 %v1607_v51 }
  0xf2   : > { %1762 = vmatprep.subr.mxu0 %v1744_v49 }
  0xf4   : > { %7585 = vmatmul.mubr.msk.f32.gmra.mrb[2].mxu0 %vm862_vm3, %v7581_v7 }
  0xf5   : > { %1566 = vmatprep.mubr.f32.mxu0 %v11317_v0 }
  0xf8   : > { %7586 = vmatmul.mubr.msk.f32.gmra.mrb[4].mxu0 %vm862_vm3, %v7582_v50 }
  0xf9   : > { %1572 = vmatprep.mubr.f32.mxu0 %v11317_v0 }
  0xfc   : > { %7587 = vmatmul.mubr.msk.f32.gmra.mrb[6].mxu0 %vm862_vm3, %v7583_v53 }
  0xfd   : > { %1690 = vmatprep.mubr.f32.mxu0 %v11317_v0 }
 0x100   : > { %7593 = vmatmul.mubr.msk.f32.vlgmr.msra.gmra.mrb[0].mxu0 %vm862_vm3, %v7589_v61 }
 0x101   : > { %1696 = vmatprep.mubr.f32.mxu0 %v11317_v0  ;;  %1763 = vmatpush1.msra.mxu0 %v1743_v60 }
 0x102   : > { %1898 = vmatprep.subr.mxu0 %v8991_v8  ;;  %v7601_v8 = vld [vmem:[%s11351_s6 + $0xf8] sm:$0xff] }
 0x104   : > { %7594 = vmatmul.mubr.msk.f32.gmra.mrb[2].mxu0 %vm862_vm3, %v7590_v6 }
 0x105   : > { %1702 = vmatprep.mubr.f32.mxu0 %v11317_v0 }
 0x108   : > { %7595 = vmatmul.mubr.msk.f32.gmra.mrb[4].mxu0 %vm862_vm3, %v7591_v56 }
 0x109   : > { %1708 = vmatprep.mubr.f32.mxu0 %v11317_v0 }
 0x10c   : > { %7596 = vmatmul.mubr.msk.f32.gmra.mrb[6].mxu0 %vm862_vm3, %v7592_v57 }
 0x10d   : > { %1826 = vmatprep.mubr.f32.mxu0 %v11317_v0 }
 0x110   : > { %7602 = vmatmul.mubr.msk.f32.vlgmr.msra.gmra.mrb[0].mxu0 %vm862_vm3, %v7598_v62 }
 0x111   : > { %1832 = vmatprep.mubr.f32.mxu0 %v11317_v0  ;;  %1899 = vmatpush1.msra.mxu0 %v8988_v4  ;;  %v7607_v4 = vld [vmem:[%s11351_s6 + $0x100] sm:$0xff]  ;;  %s11364_s6 = smov 1  }
 0x114   : > { %7603 = vmatmul.mubr.msk.f32.gmra.mrb[2].mxu0 %vm862_vm3, %v7599_v63 }
 0x115   : > { %1838 = vmatprep.mubr.f32.mxu0 %v11317_v0 }
 0x118   : > { %7604 = vmatmul.mubr.msk.f32.gmra.mrb[4].mxu0 %vm862_vm3, %v7600_v3 }
 0x119   : > { %1844 = vmatprep.mubr.f32.mxu0 %v11317_v0 }
 0x11c   : > { %7605 = vmatmul.mubr.msk.f32.gmra.mrb[6].mxu0 %vm862_vm3, %v7601_v8 }
 0x11d   : > { %1962 = vmatprep.mubr.f32.mxu0 %v11317_v0 }
 0x120   : > { %7611 = vmatmul.mubr.msk.f32.vlgmr.msra.gmra.mrb[0].mxu0 %vm862_vm3, %v7607_v4  ;;  %v2322_v4 = vld [vmem:[%s11358_s3] sm:$0xff] }
 0x121   : > { %1968 = vmatprep.mubr.f32.mxu0 %v11317_v0 }
 0x124   : > { %7612 = vmatmul.mubr.msk.f32.gmra.mrb[2].mxu0 %vm862_vm3, %v7608_v9  ;;  %v802_v9 = vld [vmem:[%s11359_s4] sm:$0xff] }
 0x125   : > { %7897 = vmatprep.mubr.msk.f32.mxu1 %vm2059_vm9, %v802_v9  ;;  %7925 = vmatprep.mubr.msk.f32.mxu0 %vm2059_vm9, %v802_v9 }
 0x18b   : > { %v1976_v10 = vpop.f32.mrb[0].mxu1 }
 0x18c   : > { %v1978_v11 = vpop.f32.mrb[1].mxu1 }
 0x18f   : > { %v1982_v17 = vpop.f32.mrb[2].mxu1 }
 0x190   : > { %v1984_v18 = vpop.f32.mrb[3].mxu1 }
 0x1eb   : > { %v1840_v19 = vpop.f32.mrb[4].mxu0 }
 0x1ec   : > { %v8280_v20 = vadd.f32 %v1976_v10, %v1840_v19  ;;  %v1842_v21 = vpop.f32.mrb[5].mxu0  ;;  %v2354_v10 = vld [vmem:[%s11360_s8] sm:$0xff]  ;;  %v2325_v19 = vld [vmem:[%s11358_s3 + $0x18] sm:$0xff] }
 0x1ed   : > { %v8281_v22 = vadd.f32 %v1978_v11, %v1842_v21  ;;  %v2324_v11 = vld [vmem:[%s11358_s3 + $0x10] sm:$0xff] }
 0x1ee   : > { %v9230_v47 = vadd.f32 %v8280_v20, %v2012_v36 }
 0x1ef   : > { %v1846_v2 = vpop.f32.mrb[6].mxu0  ;;  %v9232_v51 = vadd.f32 %v8281_v22, %v2012_v36 }
 0x1f0   : > { %v8282_v25 = vadd.f32 %v1982_v17, %v1846_v2  ;;  %v1848_v27 = vpop.f32.mrb[7].mxu0  ;;  %v2043_v63 = vmul.f32 %v9230_v47, %v9230_v47  ;;  %v2323_v17 = vld [vmem:[%s11358_s3 + $0x8] sm:$0xff] }
 0x1f1   : > { %v8283_v29 = vadd.f32 %v1984_v18, %v1848_v27  ;;  %v2033_v53 = vadd.f32 %v9232_v51, %v9230_v47  ;;  %v2044_v3 = vmul.f32 %v9232_v51, %v9232_v51  ;;  %v2355_v18 = vld [vmem:[%s11360_s8 + $0x8] sm:$0xff] }
 0x1f2   : > { %v9220_v37 = vadd.f32 %v8282_v25, %v2017_v31 }
 0x1f3   : > { %v1964_v30 = vpop.f32.mrb[0].mxu0  ;;  %v9222_v38 = vadd.f32 %v8283_v29, %v2017_v31  ;;  %v2053_v8 = vadd.f32 %v2044_v3, %v2043_v63  ;;  %v803_v29 = vld [vmem:[%s11359_s4 + $0x8] sm:$0xff]  ;;  %v804_v31 = vld [vmem:[%s11359_s4 + $0x10] sm:$0xff] }
 0x1f4   : > { %v9216_v1 = vadd.f32 %v2002_v23, %v1964_v30  ;;  %v1966_v33 = vpop.f32.mrb[1].mxu0  ;;  %v2045_v55 = vmul.f32 %v9220_v37, %v9220_v37 }
 0x1f5   : > { %v9218_v35 = vadd.f32 %v2002_v23, %v1966_v33  ;;  %v2036_v49 = vadd.f32 %v9222_v38, %v9220_v37  ;;  %v2046_v56 = vmul.f32 %v9222_v38, %v9222_v38 }
 0x1f6   : > { %v2039_v61 = vmul.f32 %v9216_v1, %v9216_v1 }
 0x1f7   : > { %v1970_v39 = vpop.f32.mrb[2].mxu0  ;;  %v2027_v40 = vadd.f32 %v9218_v35, %v9216_v1  ;;  %v2040_v6 = vmul.f32 %v9218_v35, %v9218_v35  ;;  %v2056_v62 = vadd.f32 %v2046_v56, %v2045_v55 }
 0x1f8   : > { %v9226_v41 = vadd.f32 %v2007_v28, %v1970_v39  ;;  %v1972_v42 = vpop.f32.mrb[3].mxu0  ;;  %v805_v39 = vld [vmem:[%s11359_s4 + $0x18] sm:$0xff] }
 0x1f9   : > { %v9228_v44 = vadd.f32 %v2007_v28, %v1972_v42  ;;  %2028 = vadd.xlane.f32.xlu1 %v2027_v40  ;;  %v2047_v57 = vadd.f32 %v2040_v6, %v2039_v61 }
 0x1fa   : > { %v2041_v7 = vmul.f32 %v9226_v41, %v9226_v41 }
 0x1fb   : > { %v2030_v52 = vadd.f32 %v9228_v44, %v9226_v41  ;;  %v2042_v50 = vmul.f32 %v9228_v44, %v9228_v44 }
 0x1fd   : > { %2031 = vadd.xlane.f32.xlu0 %v2030_v52  ;;  %2037 = vadd.xlane.f32.xlu1 %v2036_v49  ;;  %v2050_v60 = vadd.f32 %v2042_v50, %v2041_v7 }
 0x201   : > { %2034 = vadd.xlane.f32.xlu0 %v2033_v53  ;;  %2051 = vadd.xlane.f32.xlu1 %v2050_v60 }
 0x205   : > { %2048 = vadd.xlane.f32.xlu0 %v2047_v57  ;;  %2057 = vadd.xlane.f32.xlu1 %v2056_v62 }
 0x209   : > { %2054 = vadd.xlane.f32.xlu0 %v2053_v8 }
 0x216   : > { %2328 = vperm.xlu1 %8510, %v2322_v4  }
 0x21a   : > { %2360 = vperm.xlu1 %8510, %v2354_v10  }
 0x21e   : > { %2338 = vperm.xlu1 %8510, %v2324_v11  }
 0x21f   : > { %2333 = vperm.xlu0 %8509, %v2323_v17  }
 0x223   : > { %2365 = vperm.xlu0 %8509, %v2355_v18  }
 0x227   : > { %2343 = vperm.xlu0 %8509, %v2325_v19  }
 0x286   : > { %v2029_v20 = vpop.xlane.xlu1 %2028 }
 0x28a   : > { %v2038_v21 = vpop.xlane.xlu1 %2037  ;;  %v2032_v22 = vpop.xlane.xlu0 %2031 }
 0x28b   : > { %v7984_v23 = vpack.c.bf16 %v2032_v22, %v2029_v20 }
 0x28d   : > { %7985 = vmatprep.subr.bf16.mxu1 %v7984_v23 }
 0x28e   : > { %7987 = vmatpush3.bf16.msra.mxu1 %v7984_v23  ;;  %v2035_v2 = vpop.xlane.xlu0 %2034  ;;  %v2052_v27 = vpop.xlane.xlu1 %2051 }
 0x28f   : > { %v7988_v25 = vpack.c.bf16 %v2038_v21, %v2035_v2 }
 0x291   : > { %7989 = vmatprep.subr.bf16.mxu1 %v7988_v25 }
 0x292   : > { %7991 = vmatpush3.bf16.msra.mxu1 %v7988_v25  ;;  %v2049_v28 = vpop.xlane.xlu0 %2048  ;;  %v2058_v33 = vpop.xlane.xlu1 %2057 }
 0x293   : > { %v7992_v30 = vpack.c.bf16 %v2052_v27, %v2049_v28 }
 0x295   : > { %7898 = vmatmul.mubr.msk.f32.vlgmr.msra.gmra.mrb[4].mxu1 %vm2059_vm9, %v803_v29  ;;  %7993 = vmatprep.subr.bf16.mxu1 %v7992_v30 }
 0x296   : > { %7995 = vmatpush3.bf16.msra.mxu1 %v7992_v30  ;;  %v2055_v36 = vpop.xlane.xlu0 %2054  ;;  %7900 = vmatprep.mubr.msk.f32.mxu1 %vm2059_vm9, %v804_v31  ;;  %v2357_v30 = vld [vmem:[%s11360_s8 + $0x18] sm:$0xff] }
 0x297   : > { %v7996_v40 = vpack.c.bf16 %v2058_v33, %v2055_v36  ;;  %v2329_v36 = vpop.permute.xlu1 %2328 }
 0x299   : > { %7901 = vmatmul.mubr.msk.f32.gmra.mrb[6].mxu1 %vm2059_vm9, %v805_v39  ;;  %7997 = vmatprep.subr.bf16.mxu1 %v7996_v40 }
 0x29a   : > { %7999 = vmatpush3.bf16.msra.mxu1 %v7996_v40  ;;  %7911 = vmatprep.mubr.msk.f32.mxu1 %vm2059_vm9, %v802_v9 }
 0x29b   : > { %v2361_v40 = vpop.permute.xlu1 %2360 }
 0x29d   : > { %7912 = vmatmul.mubr.msk.f32.vlgmr.msra.gmra.mrb[8].mxu1 %vm2059_vm9, %v803_v29 }
 0x29e   : > { %7914 = vmatprep.mubr.msk.f32.mxu1 %vm2059_vm9, %v804_v31  ;;  %v2356_v31 = vld [vmem:[%s11360_s8 + $0x10] sm:$0xff]  ;;  %v2334_v33 = vpop.permute.xlu0 %2333  ;;  %s8667_s8 = smov 96  }
 0x2a1   : > { %7915 = vmatmul.mubr.msk.f32.gmra.mrb[10].mxu1 %vm2059_vm9, %v805_v39 }
 0x2a2   : > { %2591 = vmatprep.mubr.f32.mxu1 %v11317_v0  ;;  %v2366_v39 = vpop.permute.xlu0 %2365 }
 0x368   : > { %v7899_v42 = vpop.f32.mrb[4].mxu1 }
 0x369   : > { %v2158_v52 = vmul.f32 0.0009765625, %v7899_v42  ;;  %v2138_v49 = vpop.f32.mrb[5].mxu1  ;;  %v2344_v42 = vpop.permute.xlu0 %2343 }
 0x36a   : > { %v2157_v7 = vmul.f32 0.0009765625, %v2138_v49 }
 0x36b   : > { %2265 = vperm.xlu1 %8510, %v2158_v52   ;;  %v2251_v6 = vmul.f32 %v2158_v52, %v2158_v52  ;;  %v2339_v52 = vpop.permute.xlu1 %2338 }
 0x36c   : > { %2260 = vperm.xlu0 %8509, %v2157_v7   ;;  %v7902_v50 = vpop.f32.mrb[6].mxu1  ;;  %v2250_v62 = vmul.f32 %v2157_v7, %v2157_v7 }
 0x36d   : > { %v2160_v53 = vmul.f32 0.0009765625, %v7902_v50  ;;  %v2148_v55 = vpop.f32.mrb[7].mxu1 }
 0x36e   : > { %v2159_v60 = vmul.f32 0.0009765625, %v2148_v55 }
 0x36f   : > { %v2253_v9 = vmul.f32 %v2160_v53, %v2160_v53 }
 0x370   : > { %2275 = vperm.xlu0 %8509, %v2160_v53   ;;  %2270 = vperm.xlu1 %8510, %v2159_v60   ;;  %v7913_v61 = vpop.f32.mrb[8].mxu1  ;;  %v2252_v18 = vmul.f32 %v2159_v60, %v2159_v60 }
 0x371   : > { %v2247_v56 = vmul.f32 0.0009765625, %v7913_v61  ;;  %v2227_v57 = vpop.f32.mrb[9].mxu1 }
 0x372   : > { %v2246_v63 = vmul.f32 0.0009765625, %v2227_v57 }
 0x373   : > { %v2255_v3 = vsub.f32 %v2247_v56, %v2251_v6 }
 0x374   : > { %v2254_v8 = vsub.f32 %v2246_v63, %v2250_v62  ;;  %v7916_v4 = vpop.f32.mrb[10].mxu1 }
 0x375   : > { %v2287_v10 = vadd.f32 1e-05, %v2255_v3  ;;  %v2249_v11 = vmul.f32 0.0009765625, %v7916_v4  ;;  %v2237_v17 = vpop.f32.mrb[11].mxu1 }
 0x376   : > { %v2286_v19 = vadd.f32 1e-05, %v2254_v8  ;;  %v2248_v20 = vmul.f32 0.0009765625, %v2237_v17 }
 0x377   : > { %8511 = vrsqrt.f32 %v2287_v10  ;;  %v2257_v21 = vsub.f32 %v2249_v11, %v2253_v9 }
 0x378   : > { %8513 = vrsqrt.f32 %v2286_v19  ;;  %v2256_v22 = vsub.f32 %v2248_v20, %v2252_v18 }
 0x379   : > { %v2289_v23 = vadd.f32 1e-05, %v2257_v21 }
 0x37a   : > { %v2288_v2 = vadd.f32 1e-05, %v2256_v22 }
 0x37b   : > { %8515 = vrsqrt.f32 %v2289_v23 }
 0x37c   : > { %8517 = vrsqrt.f32 %v2288_v2 }
 0x381   : > { %v8512_v25 = vpop.eup %8511 }
 0x382   : > { %v8514_v27 = vpop.eup %8513  ;;  %2301 = vperm.xlu0 %8509, %v8512_v25  }
 0x383   : > { %2296 = vperm.xlu1 %8510, %v8514_v27  }
 0x385   : > { %v8516_v28 = vpop.eup %8515 }
 0x386   : > { %v8518_v29 = vpop.eup %8517  ;;  %2311 = vperm.xlu0 %8509, %v8516_v28  }
 0x387   : > { %2306 = vperm.xlu1 %8510, %v8518_v29  }
 0x38a   : > { %2375 = vperm.xlu0 %8509, %v2357_v30  }
 0x38b   : > { %2370 = vperm.xlu1 %8510, %v2356_v31  }
 0x3ea   : > { %v2266_v7 = vpop.permute.xlu1 %2265 }
 0x3eb   : > { %v2261_v49 = vpop.permute.xlu0 %2260  ;;  %v2280_v55 = vsub.f32 %v9226_v41, %v2266_v7  ;;  %v2281_v60 = vsub.f32 %v9228_v44, %v2266_v7 }
 0x3ec   : > { %v2278_v61 = vsub.f32 %v9216_v1, %v2261_v49  ;;  %v2279_v6 = vsub.f32 %v9218_v35, %v2261_v49 }
 0x3ef   : > { %v2276_v50 = vpop.permute.xlu0 %2275  ;;  %v2271_v53 = vpop.permute.xlu1 %2270 }
 0x3f0   : > { %v2284_v4 = vsub.f32 %v9220_v37, %v2276_v50  ;;  %v2285_v9 = vsub.f32 %v9222_v38, %v2276_v50  ;;  %v2282_v17 = vsub.f32 %v9230_v47, %v2271_v53  ;;  %v2283_v18 = vsub.f32 %v9232_v51, %v2271_v53 }
 0x401   : > { %v2302_v56 = vpop.permute.xlu0 %2301 }
 0x402   : > { %v2316_v57 = vmul.f32 %v2302_v56, %v2280_v55  ;;  %v2317_v62 = vmul.f32 %v2302_v56, %v2281_v60  ;;  %v2297_v63 = vpop.permute.xlu1 %2296 }
 0x403   : > { %v2314_v3 = vmul.f32 %v2297_v63, %v2278_v61  ;;  %v2315_v8 = vmul.f32 %v2297_v63, %v2279_v6 }
 0x404   : > { %v2348_v10 = vmul.f32 %v2334_v33, %v2316_v57  ;;  %v2349_v11 = vmul.f32 %v2334_v33, %v2317_v62 }
 0x405   : > { %v2346_v19 = vmul.f32 %v2329_v36, %v2314_v3  ;;  %v2347_v20 = vmul.f32 %v2329_v36, %v2315_v8  ;;  %v2312_v21 = vpop.permute.xlu0 %2311 }
 0x406   : > { %v2380_v22 = vadd.f32 %v2366_v39, %v2348_v10  ;;  %v9310_v23 = vadd.f32 %v2366_v39, %v2349_v11  ;;  %v2320_v2 = vmul.f32 %v2312_v21, %v2284_v4  ;;  %v2321_v25 = vmul.f32 %v2312_v21, %v2285_v9  ;;  %v2307_v27 = vpop.permute.xlu1 %2306 }
 0x407   : > { %v2378_v28 = vadd.f32 %v2361_v40, %v2346_v19  ;;  %v9312_v29 = vadd.f32 %v2361_v40, %v2347_v20  ;;  %v2318_v30 = vmul.f32 %v2307_v27, %v2282_v17  ;;  %v2319_v31 = vmul.f32 %v2307_v27, %v2283_v18 }
 0x408   : > { %v7625_v49 = vmul.f32 -1.442695, %v2380_v22  ;;  %v7626_v33 = vmul.f32 -1.442695, %v9310_v23  ;;  %v2352_v7 = vmul.f32 %v2344_v42, %v2320_v2  ;;  %v2353_v50 = vmul.f32 %v2344_v42, %v2321_v25 }
 0x409   : > { %v7623_v53 = vmul.f32 -1.442695, %v2378_v28  ;;  %v7624_v36 = vmul.f32 -1.442695, %v9312_v29  ;;  %v2376_v55 = vpop.permute.xlu0 %2375  ;;  %v2350_v60 = vmul.f32 %v2339_v52, %v2318_v30  ;;  %v2351_v39 = vmul.f32 %v2339_v52, %v2319_v31 }
 0x40a   : > { %8519 = vpow2.f32 %v7625_v49  ;;  %v2384_v61 = vadd.f32 %v2376_v55, %v2352_v7  ;;  %v2385_v6 = vadd.f32 %v2376_v55, %v2353_v50  ;;  %v2371_v56 = vpop.permute.xlu1 %2370 }
 0x40b   : > { %8521 = vpow2.f32 %v7626_v33  ;;  %v2382_v40 = vadd.f32 %v2371_v56, %v2350_v60  ;;  %v2383_v57 = vadd.f32 %v2371_v56, %v2351_v39 }
 0x40c   : > { %8523 = vpow2.f32 %v7623_v53  ;;  %v7629_v62 = vmul.f32 -1.442695, %v2384_v61  ;;  %v7630_v63 = vmul.f32 -1.442695, %v2385_v6 }
 0x40d   : > { %8525 = vpow2.f32 %v7624_v36  ;;  %v7627_v3 = vmul.f32 -1.442695, %v2382_v40  ;;  %v7628_v42 = vmul.f32 -1.442695, %v2383_v57 }
 0x40e   : > { %8527 = vpow2.f32 %v7629_v62 }
 0x40f   : > { %8529 = vpow2.f32 %v7630_v63 }
 0x410   : > { %8531 = vpow2.f32 %v7627_v3 }
 0x411   : > { %8533 = vpow2.f32 %v7628_v42 }
 0x414   : > { %v8520_v8 = vpop.eup %8519 }
 0x415   : > { %v8522_v4 = vpop.eup %8521  ;;  %v2412_v52 = vadd.f32 1.0, %v8520_v8 }
 0x416   : > { %v8524_v9 = vpop.eup %8523  ;;  %v2413_v10 = vadd.f32 1.0, %v8522_v4 }
 0x417   : > { %v8526_v11 = vpop.eup %8525  ;;  %8535 = vrcp.f32 %v2412_v52  ;;  %v2410_v17 = vadd.f32 1.0, %v8524_v9 }
 0x418   : > { %v8528_v18 = vpop.eup %8527  ;;  %8537 = vrcp.f32 %v2413_v10  ;;  %v2411_v19 = vadd.f32 1.0, %v8526_v11 }
 0x419   : > { %v8530_v20 = vpop.eup %8529  ;;  %8539 = vrcp.f32 %v2410_v17  ;;  %v2416_v21 = vadd.f32 1.0, %v8528_v18 }
 0x41a   : > { %v8532_v2 = vpop.eup %8531  ;;  %8541 = vrcp.f32 %v2411_v19  ;;  %v2417_v30 = vadd.f32 1.0, %v8530_v20 }
 0x41b   : > { %v2414_v25 = vadd.f32 1.0, %v8532_v2  ;;  %v8534_v27 = vpop.eup %8533  ;;  %8543 = vrcp.f32 %v2416_v21  ;;  %v3708_v21 = vld [vmem:[%s11369_s10 + $0x8] sm:$0xff] }
 0x41c   : > { %v2415_v31 = vadd.f32 1.0, %v8534_v27 }
 0x41d   : > { %8545 = vrcp.f32 %v2414_v25 }
 0x41e   : > { %8547 = vrcp.f32 %v2417_v30  ;;  %v3707_v30 = vld [vmem:[%s11369_s10] sm:$0xff] }
 0x41f   : > { %8549 = vrcp.f32 %v2415_v31 }
 0x421   : > { %v8536_v49 = vpop.eup %8535 }
 0x422   : > { %v8538_v33 = vpop.eup %8537  ;;  %v9316_v7 = vmul.f32 %v8536_v49, %v2380_v22 }
 0x423   : > { %v8540_v50 = vpop.eup %8539  ;;  %v9323_v55 = vmul.f32 %v8538_v33, %v9310_v23 }
 0x424   : > { %v9318_v53 = vmul.f32 %v8540_v50, %v2378_v28  ;;  %2480 = vrot.lane.b32.xlu0 %v9316_v7, %s11361_s1  ;;  %v8542_v36 = vpop.eup %8541 }
 0x425   : > { %v8544_v60 = vpop.eup %8543  ;;  %v9328_v39 = vmul.f32 %v8542_v36, %v9312_v29 }
 0x426   : > { %2478 = vrot.lane.b32.xlu1 %v9318_v53, %s11361_s1  ;;  %v9332_v28 = vmul.f32 %v8544_v60, %v2384_v61  ;;  %v3740_v60 = vld [vmem:[%s9481_s23 + $0x8] sm:$0xff] }
 0x427   : > { %v8546_v22 = vpop.eup %8545 }
 0x428   : > { %2488 = vrot.lane.b32.xlu0 %v9323_v55, %s11361_s1  ;;  %v8548_v56 = vpop.eup %8547  ;;  %v9336_v62 = vmul.f32 %v8546_v22, %v2382_v40 }
 0x429   : > { %v8550_v23 = vpop.eup %8549  ;;  %v9340_v63 = vmul.f32 %v8548_v56, %v2385_v6 }
 0x42a   : > { %2486 = vrot.lane.b32.xlu1 %v9328_v39, %s11361_s1  ;;  %v9344_v29 = vmul.f32 %v8550_v23, %v2383_v57 }
 0x42c   : > { %2484 = vrot.lane.b32.xlu0 %v9332_v28, %s11361_s1 }
 0x42e   : > { %2482 = vrot.lane.b32.xlu1 %v9336_v62, %s11361_s1 }
 0x430   : > { %2492 = vrot.lane.b32.xlu0 %v9340_v63, %s11361_s1 }
 0x432   : > { %2490 = vrot.lane.b32.xlu1 %v9344_v29, %s11361_s1 }
 0x434   : > { %2444 = vrot.lane.b32.xlu0 %v9316_v7, %s11362_s5 }
 0x436   : > { %2442 = vrot.lane.b32.xlu1 %v9318_v53, %s11362_s5 }
 0x438   : > { %2452 = vrot.lane.b32.xlu0 %v9323_v55, %s11362_s5 }
 0x43a   : > { %2450 = vrot.lane.b32.xlu1 %v9328_v39, %s11362_s5 }
 0x43c   : > { %2448 = vrot.lane.b32.xlu0 %v9332_v28, %s11362_s5 }
 0x43e   : > { %2446 = vrot.lane.b32.xlu1 %v9336_v62, %s11362_s5 }
 0x440   : > { %2456 = vrot.lane.b32.xlu0 %v9340_v63, %s11362_s5 }
 0x442   : > { %2454 = vrot.lane.b32.xlu1 %v9344_v29, %s11362_s5 }
 0x444   : > { %2719 = vrot.lane.b32.xlu0 %v9316_v7, %s11363_s7 }
 0x446   : > { %2717 = vrot.lane.b32.xlu1 %v9318_v53, %s11363_s7 }
 0x448   : > { %2727 = vrot.lane.b32.xlu0 %v9323_v55, %s11363_s7 }
 0x44a   : > { %2725 = vrot.lane.b32.xlu1 %v9328_v39, %s11363_s7 }
 0x44c   : > { %2723 = vrot.lane.b32.xlu0 %v9332_v28, %s11363_s7 }
 0x44e   : > { %2721 = vrot.lane.b32.xlu1 %v9336_v62, %s11363_s7 }
 0x450   : > { %2731 = vrot.lane.b32.xlu0 %v9340_v63, %s11363_s7 }
 0x452   : > { %2729 = vrot.lane.b32.xlu1 %v9344_v29, %s11363_s7 }
 0x454   : > { %2865 = vrot.lane.b32.xlu0 %v9316_v7, %s11364_s6 }
 0x456   : > { %2863 = vrot.lane.b32.xlu1 %v9318_v53, %s11364_s6 }
 0x458   : > { %2873 = vrot.lane.b32.xlu0 %v9323_v55, %s11364_s6 }
 0x45a   : > { %2871 = vrot.lane.b32.xlu1 %v9328_v39, %s11364_s6 }
 0x45c   : > { %2869 = vrot.lane.b32.xlu0 %v9332_v28, %s11364_s6 }
 0x45e   : > { %2867 = vrot.lane.b32.xlu1 %v9336_v62, %s11364_s6 }
 0x460   : > { %2877 = vrot.lane.b32.xlu0 %v9340_v63, %s11364_s6 }
 0x462   : > { %2875 = vrot.lane.b32.xlu1 %v9344_v29, %s11364_s6 }
 0x464   : > { %3125 = vrot.lane.b32.xlu0 %v9316_v7, %s11365_s26 }
 0x466   : > { %3123 = vrot.lane.b32.xlu1 %v9318_v53, %s11365_s26 }
 0x468   : > { %3133 = vrot.lane.b32.xlu0 %v9323_v55, %s11365_s26 }
 0x46a   : > { %3131 = vrot.lane.b32.xlu1 %v9328_v39, %s11365_s26 }
 0x46c   : > { %3129 = vrot.lane.b32.xlu0 %v9332_v28, %s11365_s26 }
 0x46e   : > { %3127 = vrot.lane.b32.xlu1 %v9336_v62, %s11365_s26 }
 0x470   : > { %3137 = vrot.lane.b32.xlu0 %v9340_v63, %s11365_s26 }
 0x472   : > { %3135 = vrot.lane.b32.xlu1 %v9344_v29, %s11365_s26 }
 0x474   : > { %3271 = vrot.lane.b32.xlu0 %v9316_v7, %s11366_s0 }
 0x476   : > { %3269 = vrot.lane.b32.xlu1 %v9318_v53, %s11366_s0 }
 0x478   : > { %3279 = vrot.lane.b32.xlu0 %v9323_v55, %s11366_s0 }
 0x47a   : > { %3277 = vrot.lane.b32.xlu1 %v9328_v39, %s11366_s0 }
 0x47c   : > { %3275 = vrot.lane.b32.xlu0 %v9332_v28, %s11366_s0 }
 0x47e   : > { %3273 = vrot.lane.b32.xlu1 %v9336_v62, %s11366_s0 }
 0x480   : > { %3283 = vrot.lane.b32.xlu0 %v9340_v63, %s11366_s0 }
 0x482   : > { %3281 = vrot.lane.b32.xlu1 %v9344_v29, %s11366_s0 }
 0x484   : > { %3417 = vrot.lane.b32.xlu0 %v9316_v7, %s11367_s27 }
 0x486   : > { %3415 = vrot.lane.b32.xlu1 %v9318_v53, %s11367_s27 }
 0x488   : > { %3425 = vrot.lane.b32.xlu0 %v9323_v55, %s11367_s27 }
 0x48a   : > { %3423 = vrot.lane.b32.xlu1 %v9328_v39, %s11367_s27 }
 0x48c   : > { %3421 = vrot.lane.b32.xlu0 %v9332_v28, %s11367_s27 }
 0x48e   : > { %3419 = vrot.lane.b32.xlu1 %v9336_v62, %s11367_s27 }
 0x490   : > { %3429 = vrot.lane.b32.xlu0 %v9340_v63, %s11367_s27 }
 0x492   : > { %3427 = vrot.lane.b32.xlu1 %v9344_v29, %s11367_s27 }
 0x494   : > { %3563 = vrot.lane.b32.xlu0 %v9316_v7, %s11368_s30 }
 0x496   : > { %3561 = vrot.lane.b32.xlu1 %v9318_v53, %s11368_s30  ;;  %v2481_v61 = vpop.permute.xlu0 %2480 }
 0x498   : > { %v2479_v6 = vpop.permute.xlu1 %2478  ;;  %3571 = vrot.lane.b32.xlu0 %v9323_v55, %s11368_s30 }
 0x49a   : > { %3569 = vrot.lane.b32.xlu1 %v9328_v39, %s11368_s30  ;;  %v2489_v40 = vpop.permute.xlu0 %2488 }
 0x49b   : > { %v2495_v57 = vsel %vm839_vm1, %v2481_v61, %v2489_v40  ;;  %v2499_v3 = vsel %vm839_vm1, %v2489_v40, %v2481_v61  ;;  %v3739_v61 = vld [vmem:[%s9481_s23] sm:$0xff] }
 0x49c   : > { %v2504_v42 = vmul.f32 %v2499_v3, %v8868_v13  ;;  %v2505_v8 = vmul.f32 %v2495_v57, %v8865_v12  ;;  %v2487_v4 = vpop.permute.xlu1 %2486  ;;  %3567 = vrot.lane.b32.xlu0 %v9332_v28, %s11368_s30  ;;  %v3710_v3 = vld [vmem:[%s11369_s10 + $0x18] sm:$0xff] }
 0x49d   : > { %v2494_v52 = vsel %vm839_vm1, %v2479_v6, %v2487_v4  ;;  %v2498_v9 = vsel %vm839_vm1, %v2487_v4, %v2479_v6 }
 0x49e   : > { %v2502_v10 = vmul.f32 %v2498_v9, %v8868_v13  ;;  %v2503_v11 = vmul.f32 %v2494_v52, %v8865_v12  ;;  %3565 = vrot.lane.b32.xlu1 %v9336_v62, %s11368_s30  ;;  %v2485_v17 = vpop.permute.xlu0 %2484  ;;  %v3709_v52 = vld [vmem:[%s11369_s10 + $0x10] sm:$0xff]  ;;  %v7631_v9 = vld [vmem:[%s11371_s25 + $0x20] sm:$0xff]  ;;  %s11373_s10 = sld [smem:[#allocation23_spill]] }
 0x4a0   : > { %v8002_v18 = vpack.c.bf16 %v2504_v42, %v2502_v10  ;;  %v2483_v19 = vpop.permute.xlu1 %2482  ;;  %3575 = vrot.lane.b32.xlu0 %v9340_v63, %s11368_s30  ;;  %v8000_v20 = vpack.c.bf16 %v2505_v8, %v2503_v11 }
 0x4a2   : > { %3573 = vrot.lane.b32.xlu1 %v9344_v29, %s11368_s30  ;;  %8001 = vmatprep.subr.bf16.mxu1 %v8000_v20  ;;  %v2493_v2 = vpop.permute.xlu0 %2492  ;;  %v3742_v20 = vld [vmem:[%s9481_s23 + $0x18] sm:$0xff] }
 0x4a3   : > { %8003 = vmatpush1.bf16.msra.mxu1 %v8002_v18  ;;  %v2497_v25 = vsel %vm839_vm1, %v2485_v17, %v2493_v2  ;;  %v2501_v27 = vsel %vm839_vm1, %v2493_v2, %v2485_v17 }
 0x4a4   : > { %v2508_v31 = vmul.f32 %v2501_v27, %v8868_v13  ;;  %v2509_v49 = vmul.f32 %v2497_v25, %v8865_v12  ;;  %v2491_v33 = vpop.permute.xlu1 %2490  ;;  %3718 = vperm.xlu0 %8509, %v3708_v21   ;;  %v3741_v27 = vld [vmem:[%s9481_s23 + $0x10] sm:$0xff]  ;;  %s11316_s23 = sshll.u32 %s11397_s2, 3 }
 0x4a5   : > { %v2496_v50 = vsel %vm839_vm1, %v2483_v19, %v2491_v33  ;;  %v2500_v36 = vsel %vm839_vm1, %v2491_v33, %v2483_v19  ;;  %s796_s24 = scalar_lea.vmem %s11372_s22, %s11316_s23  ;;  %s11394_s22 = sld [smem:[#allocation26_spill]] }
 0x4a6   : > { %v2506_v22 = vmul.f32 %v2500_v36, %v8868_v13  ;;  %v2507_v56 = vmul.f32 %v2496_v50, %v8865_v12  ;;  %3713 = vperm.xlu1 %8510, %v3707_v30   ;;  %v2445_v23 = vpop.permute.xlu0 %2444  ;;  %v7632_v30 = vld [vmem:[%s11371_s25 + $0x28] sm:$0xff] }
 0x4a8   : > { %v8006_v6 = vpack.c.bf16 %v2508_v31, %v2506_v22  ;;  %v2443_v40 = vpop.permute.xlu1 %2442  ;;  %3750 = vperm.xlu0 %8509, %v3740_v60   ;;  %v8004_v57 = vpack.c.bf16 %v2509_v49, %v2507_v56  ;;  %v7633_v22 = vld [vmem:[%s11371_s25 + $0x30] sm:$0xff] }
 0x4aa   : > { %3745 = vperm.xlu1 %8510, %v3739_v61   ;;  %8005 = vmatprep.subr.bf16.mxu1 %v8004_v57  ;;  %v2453_v42 = vpop.permute.xlu0 %2452 }
 0x4ab   : > { %8007 = vmatpush1.bf16.msra.mxu1 %v8006_v6  ;;  %v2459_v8 = vsel %vm814_vm0, %v2445_v23, %v2453_v42  ;;  %v2463_v4 = vsel %vm814_vm0, %v2453_v42, %v2445_v23 }
 0x4ac   : > { %v2468_v10 = vmul.f32 %v2463_v4, %v8874_v15  ;;  %v2469_v11 = vmul.f32 %v2459_v8, %v8871_v14  ;;  %v2451_v17 = vpop.permute.xlu1 %2450  ;;  %3728 = vperm.xlu0 %8509, %v3710_v3   ;;  %v7634_v8 = vld [vmem:[%s11371_s25 + $0x38] sm:$0xff] }
 0x4ad   : > { %v2458_v18 = vsel %vm814_vm0, %v2443_v40, %v2451_v17  ;;  %v2462_v19 = vsel %vm814_vm0, %v2451_v17, %v2443_v40 }
 0x4ae   : > { %v2466_v21 = vmul.f32 %v2462_v19, %v8874_v15  ;;  %v2467_v2 = vmul.f32 %v2458_v18, %v8871_v14  ;;  %3723 = vperm.xlu1 %8510, %v3709_v52   ;;  %7635 = vmatmul.mubr.msk.f32.vlgmr.msra.gmra.mrb[12].mxu1 %vm2059_vm9, %v7631_v9  ;;  %v2449_v25 = vpop.permute.xlu0 %2448  ;;  %v2474_v18 = vld [vmem:[%s11371_s25] sm:$0xff] }
 0x4af   : > { %2597 = vmatprep.mubr.f32.mxu1 %v11317_v0 }
 0x4b0   : > { %v8010_v31 = vpack.c.bf16 %v2468_v10, %v2466_v21  ;;  %v2447_v49 = vpop.permute.xlu1 %2446  ;;  %3760 = vperm.xlu0 %8509, %v3742_v20   ;;  %v8008_v33 = vpack.c.bf16 %v2469_v11, %v2467_v2 }
 0x4b2   : > { %3755 = vperm.xlu1 %8510, %v3741_v27   ;;  %7636 = vmatmul.mubr.msk.f32.gmra.mrb[14].mxu1 %vm2059_vm9, %v7632_v30  ;;  %v2457_v50 = vpop.permute.xlu0 %2456 }
 0x4b3   : > { %8009 = vmatprep.subr.bf16.mxu1 %v8008_v33  ;;  %v2461_v36 = vsel %vm814_vm0, %v2449_v25, %v2457_v50  ;;  %v2465_v60 = vsel %vm814_vm0, %v2457_v50, %v2449_v25  ;;  %2603 = vmatprep.mubr.f32.mxu1 %v11317_v0 }
 0x4b4   : > { %8011 = vmatpush1.bf16.msra.mxu1 %v8010_v31  ;;  %v2472_v56 = vmul.f32 %v2465_v60, %v8874_v15  ;;  %v2473_v23 = vmul.f32 %v2461_v36, %v8871_v14  ;;  %v2455_v61 = vpop.permute.xlu1 %2454 }
 0x4b5   : > { %v2460_v6 = vsel %vm814_vm0, %v2447_v49, %v2455_v61  ;;  %v2464_v40 = vsel %vm814_vm0, %v2455_v61, %v2447_v49  ;;  %v2475_v49 = vld [vmem:[%s11371_s25 + $0x8] sm:$0xff] }
 0x4b6   : > { %v2470_v57 = vmul.f32 %v2464_v40, %v8874_v15  ;;  %v2471_v3 = vmul.f32 %v2460_v6, %v8871_v14  ;;  %7637 = vmatmul.mubr.msk.f32.gmra.mrb[16].mxu1 %vm2059_vm9, %v7633_v22  ;;  %v2720_v42 = vpop.permute.xlu0 %2719 }
 0x4b7   : > { %2609 = vmatprep.mubr.f32.mxu1 %v11317_v0 }
 0x4b8   : > { %v8014_v4 = vpack.c.bf16 %v2472_v56, %v2470_v57  ;;  %v2718_v52 = vpop.permute.xlu1 %2717  ;;  %v8012_v9 = vpack.c.bf16 %v2473_v23, %v2471_v3  ;;  %v2476_v23 = vld [vmem:[%s11371_s25 + $0x10] sm:$0xff] }
 0x4ba   : > { %7638 = vmatmul.mubr.msk.f32.gmra.mrb[18].mxu1 %vm2059_vm9, %v7634_v8  ;;  %8013 = vmatprep.subr.bf16.mxu1 %v8012_v9  ;;  %v2728_v10 = vpop.permute.xlu0 %2727 }
 0x4bb   : > { %8015 = vmatpush1.bf16.msra.mxu1 %v8014_v4  ;;  %v2734_v11 = vsel %vm1069_vm2, %v2720_v42, %v2728_v10  ;;  %v2738_v17 = vsel %vm1069_vm2, %v2728_v10, %v2720_v42  ;;  %2692 = vmatprep.mubr.f32.mxu1 %v11317_v0 }
 0x4bc   : > { %v2743_v19 = vmul.f32 %v2738_v17, %v8941_v46  ;;  %v2744_v20 = vmul.f32 %v2734_v11, %v8892_v26  ;;  %v2726_v21 = vpop.permute.xlu1 %2725 }
 0x4bd   : > { %v2733_v2 = vsel %vm1069_vm2, %v2718_v52, %v2726_v21  ;;  %v2737_v25 = vsel %vm1069_vm2, %v2726_v21, %v2718_v52  ;;  %v2477_v52 = vld [vmem:[%s11371_s25 + $0x18] sm:$0xff] }
 0x4be   : > { %v2741_v27 = vmul.f32 %v2737_v25, %v8941_v46  ;;  %v2742_v30 = vmul.f32 %v2733_v2, %v8892_v26  ;;  %7639 = vmatmul.mubr.msk.f32.vlgmr.msra.gmra.mrb[12].mxu1 %vm2059_vm9, %v2474_v18  ;;  %v2724_v31 = vpop.permute.xlu0 %2723 }
 0x4bf   : > { %2698 = vmatprep.mubr.f32.mxu1 %v11317_v0 }
 0x4c0   : > { %v8018_v33 = vpack.c.bf16 %v2743_v19, %v2741_v27  ;;  %v2722_v50 = vpop.permute.xlu1 %2721  ;;  %v8016_v36 = vpack.c.bf16 %v2744_v20, %v2742_v30  ;;  %v7643_v20 = vld [vmem:[%s11371_s25 + $0x40] sm:$0xff] }
 0x4c2   : > { %7640 = vmatmul.mubr.msk.f32.gmra.mrb[14].mxu1 %vm2059_vm9, %v2475_v49  ;;  %8017 = vmatprep.subr.bf16.mxu1 %v8016_v36  ;;  %v2732_v60 = vpop.permute.xlu0 %2731 }
 0x4c3   : > { %8019 = vmatpush1.bf16.msra.mxu1 %v8018_v33  ;;  %v2736_v22 = vsel %vm1069_vm2, %v2724_v31, %v2732_v60  ;;  %v2740_v56 = vsel %vm1069_vm2, %v2732_v60, %v2724_v31  ;;  %2704 = vmatprep.mubr.f32.mxu1 %v11317_v0 }
 0x4c4   : > { %v2747_v61 = vmul.f32 %v2740_v56, %v8941_v46  ;;  %v2748_v6 = vmul.f32 %v2736_v22, %v8892_v26  ;;  %v2730_v40 = vpop.permute.xlu1 %2729 }
 0x4c5   : > { %v2735_v57 = vsel %vm1069_vm2, %v2722_v50, %v2730_v40  ;;  %v2739_v3 = vsel %vm1069_vm2, %v2730_v40, %v2722_v50  ;;  %v7644_v50 = vld [vmem:[%s11371_s25 + $0x48] sm:$0xff] }
 0x4c6   : > { %v2745_v42 = vmul.f32 %v2739_v3, %v8941_v46  ;;  %v2746_v8 = vmul.f32 %v2735_v57, %v8892_v26  ;;  %7641 = vmatmul.mubr.msk.f32.gmra.mrb[16].mxu1 %vm2059_vm9, %v2476_v23  ;;  %v2866_v4 = vpop.permute.xlu0 %2865 }
 0x4c7   : > { %2710 = vmatprep.mubr.f32.mxu1 %v11317_v0 }
 0x4c8   : > { %v8022_v9 = vpack.c.bf16 %v2747_v61, %v2745_v42  ;;  %v2864_v10 = vpop.permute.xlu1 %2863  ;;  %v8020_v11 = vpack.c.bf16 %v2748_v6, %v2746_v8  ;;  %v7645_v6 = vld [vmem:[%s11371_s25 + $0x50] sm:$0xff] }
 0x4ca   : > { %7642 = vmatmul.mubr.msk.f32.gmra.mrb[18].mxu1 %vm2059_vm9, %v2477_v52  ;;  %8021 = vmatprep.subr.bf16.mxu1 %v8020_v11  ;;  %v2874_v17 = vpop.permute.xlu0 %2873 }
 0x4cb   : > { %8023 = vmatpush1.bf16.msra.mxu1 %v8022_v9  ;;  %v2880_v18 = vsel %vm1205_vm4, %v2866_v4, %v2874_v17  ;;  %v2884_v19 = vsel %vm1205_vm4, %v2874_v17, %v2866_v4  ;;  %2830 = vmatprep.mubr.f32.mxu1 %v11317_v0 }
 0x4cc   : > { %v2889_v21 = vmul.f32 %v2884_v19, %v9009_v16  ;;  %v2890_v2 = vmul.f32 %v2880_v18, %v8946_v48  ;;  %v2872_v25 = vpop.permute.xlu1 %2871 }
 0x4cd   : > { %v2879_v27 = vsel %vm1205_vm4, %v2864_v10, %v2872_v25  ;;  %v2883_v30 = vsel %vm1205_vm4, %v2872_v25, %v2864_v10  ;;  %v7646_v10 = vld [vmem:[%s11371_s25 + $0x58] sm:$0xff] }
 0x4ce   : > { %v2887_v31 = vmul.f32 %v2883_v30, %v9009_v16  ;;  %v2888_v49 = vmul.f32 %v2879_v27, %v8946_v48  ;;  %7647 = vmatmul.mubr.msk.f32.vlgmr.msra.gmra.mrb[12].mxu1 %vm2059_vm9, %v7643_v20  ;;  %v2870_v33 = vpop.permute.xlu0 %2869  ;;  %v8032_v20 = vpack.c.bf16 %v9323_v55, %v9328_v39  ;;  %v8034_v30 = vpack.c.bf16 %v9316_v7, %v9318_v53 }
 0x4cf   : > { %2836 = vmatprep.mubr.f32.mxu1 %v11317_v0  ;;  %v8038_v7 = vpack.c.bf16 %v9332_v28, %v9336_v62 }
 0x4d0   : > { %v8026_v36 = vpack.c.bf16 %v2889_v21, %v2887_v31  ;;  %v2868_v60 = vpop.permute.xlu1 %2867  ;;  %v8024_v22 = vpack.c.bf16 %v2890_v2, %v2888_v49  ;;  %v7651_v2 = vld [vmem:[%s11371_s25 + $0x60] sm:$0xff]  ;;  %v8036_v49 = vpack.c.bf16 %v9340_v63, %v9344_v29  ;;  %v7653_v63 = vld [vmem:[%s11371_s25 + $0x70] sm:$0xff] }
 0x4d2   : > { %7648 = vmatmul.mubr.msk.f32.gmra.mrb[14].mxu1 %vm2059_vm9, %v7644_v50  ;;  %8025 = vmatprep.subr.bf16.mxu1 %v8024_v22  ;;  %v2878_v56 = vpop.permute.xlu0 %2877 }
 0x4d3   : > { %8027 = vmatpush1.bf16.msra.mxu1 %v8026_v36  ;;  %v2882_v23 = vsel %vm1205_vm4, %v2870_v33, %v2878_v56  ;;  %v2886_v61 = vsel %vm1205_vm4, %v2878_v56, %v2870_v33  ;;  %2842 = vmatprep.mubr.f32.mxu1 %v11317_v0  ;;  %v7652_v33 = vld [vmem:[%s11371_s25 + $0x68] sm:$0xff] }
 0x4d4   : > { %v2893_v40 = vmul.f32 %v2886_v61, %v9009_v16  ;;  %v2894_v57 = vmul.f32 %v2882_v23, %v8946_v48  ;;  %v2876_v3 = vpop.permute.xlu1 %2875  ;;  %v7654_v23 = vld [vmem:[%s11371_s25 + $0x78] sm:$0xff] }
 0x4d5   : > { %v2881_v42 = vsel %vm1205_vm4, %v2868_v60, %v2876_v3  ;;  %v2885_v8 = vsel %vm1205_vm4, %v2876_v3, %v2868_v60 }
 0x4d6   : > { %v2891_v4 = vmul.f32 %v2885_v8, %v9009_v16  ;;  %v2892_v52 = vmul.f32 %v2881_v42, %v8946_v48  ;;  %7649 = vmatmul.mubr.msk.f32.gmra.mrb[16].mxu1 %vm2059_vm9, %v7645_v6  ;;  %v3126_v9 = vpop.permute.xlu0 %3125 }
 0x4d7   : > { %2848 = vmatprep.mubr.f32.mxu1 %v11317_v0 }
 0x4d8   : > { %v8030_v11 = vpack.c.bf16 %v2893_v40, %v2891_v4  ;;  %v3124_v17 = vpop.permute.xlu1 %3123  ;;  %v8028_v18 = vpack.c.bf16 %v2894_v57, %v2892_v52 }
 0x4da   : > { %7650 = vmatmul.mubr.msk.f32.gmra.mrb[18].mxu1 %vm2059_vm9, %v7646_v10  ;;  %8029 = vmatprep.subr.bf16.mxu1 %v8028_v18  ;;  %v3134_v19 = vpop.permute.xlu0 %3133 }
 0x4db   : > { %8031 = vmatpush1.bf16.msra.mxu1 %v8030_v11  ;;  %v3144_v21 = vsel %vm1455_vm6, %v3134_v19, %v3126_v9  ;;  %2976 = vmatprep.mubr.f32.mxu1 %v11317_v0  ;;  %v3140_v60 = vsel %vm1455_vm6, %v3126_v9, %v3134_v19  ;;  %v7659_v9 = vld [vmem:[%s11371_s25 + $0x80] sm:$0xff] }
 0x4dc   : > { %v3132_v25 = vpop.permute.xlu1 %3131  ;;  %8033 = vmatprep.subr.bf16.mxu1 %v8032_v20  ;;  %v3150_v55 = vmul.f32 %v3144_v21, %v9047_v24  ;;  %v3149_v6 = vmul.f32 %v3140_v60, %v9080_v32 }
 0x4dd   : > { %v3143_v27 = vsel %vm1455_vm6, %v3132_v25, %v3124_v17  ;;  %v3139_v22 = vsel %vm1455_vm6, %v3124_v17, %v3132_v25 }
 0x4de   : > { %v3148_v39 = vmul.f32 %v3143_v27, %v9047_v24  ;;  %7655 = vmatmul.mubr.msk.f32.vlgmr.msra.gmra.mrb[12].mxu1 %vm2059_vm9, %v7651_v2  ;;  %v3130_v31 = vpop.permute.xlu0 %3129  ;;  %v3147_v40 = vmul.f32 %v3139_v22, %v9080_v32  ;;  %v7660_v27 = vld [vmem:[%s11371_s25 + $0x88] sm:$0xff] }
 0x4df   : > { %8035 = vmatpush1.bf16.msra.mxu1 %v8034_v30  ;;  %2982 = vmatprep.mubr.f32.mxu1 %v11317_v0 }
 0x4e0   : > { %v3128_v50 = vpop.permute.xlu1 %3127  ;;  %8037 = vmatprep.subr.bf16.mxu1 %v8036_v49  ;;  %v8040_v36 = vpack.c.bf16 %v3150_v55, %v3148_v39  ;;  %v8042_v17 = vpack.c.bf16 %v3149_v6, %v3147_v40  ;;  %v7661_v49 = vld [vmem:[%s11371_s25 + $0x90] sm:$0xff] }
 0x4e2   : > { %7656 = vmatmul.mubr.msk.f32.gmra.mrb[14].mxu1 %vm2059_vm9, %v7652_v33  ;;  %v3138_v53 = vpop.permute.xlu0 %3137 }
 0x4e3   : > { %8039 = vmatpush1.bf16.msra.mxu1 %v8038_v7  ;;  %2988 = vmatprep.mubr.f32.mxu1 %v11317_v0  ;;  %v3146_v62 = vsel %vm1455_vm6, %v3138_v53, %v3130_v31  ;;  %v3142_v57 = vsel %vm1455_vm6, %v3130_v31, %v3138_v53 }
 0x4e4   : > { %v3136_v29 = vpop.permute.xlu1 %3135  ;;  %8041 = vmatprep.subr.bf16.mxu1 %v8040_v36  ;;  %v3154_v3 = vmul.f32 %v3146_v62, %v9047_v24  ;;  %v3153_v18 = vmul.f32 %v3142_v57, %v9080_v32  ;;  %v7667_v57 = vld [vmem:[%s11371_s25 + $0xa0] sm:$0xff] }
 0x4e5   : > { %v3145_v56 = vsel %vm1455_vm6, %v3136_v29, %v3128_v50  ;;  %v3141_v42 = vsel %vm1455_vm6, %v3128_v50, %v3136_v29  ;;  %v7662_v29 = vld [vmem:[%s11371_s25 + $0x98] sm:$0xff] }
 0x4e6   : > { %7657 = vmatmul.mubr.msk.f32.gmra.mrb[16].mxu1 %vm2059_vm9, %v7653_v63  ;;  %v3272_v28 = vpop.permute.xlu0 %3271  ;;  %v3152_v8 = vmul.f32 %v3145_v56, %v9047_v24  ;;  %v3151_v19 = vmul.f32 %v3141_v42, %v9080_v32 }
 0x4e7   : > { %2994 = vmatprep.mubr.f32.mxu1 %v11317_v0 }
 0x4e8   : > { %v3270_v61 = vpop.permute.xlu1 %3269  ;;  %v8044_v2 = vpack.c.bf16 %v3154_v3, %v3152_v8  ;;  %v8046_v39 = vpack.c.bf16 %v3153_v18, %v3151_v19  ;;  %v7668_v18 = vld [vmem:[%s11371_s25 + $0xa8] sm:$0xff] }
 0x4ea   : > { %7658 = vmatmul.mubr.msk.f32.gmra.mrb[18].mxu1 %vm2059_vm9, %v7654_v23  ;;  %v3280_v4 = vpop.permute.xlu0 %3279 }
 0x4eb   : > { %v3290_v52 = vsel %vm1591_vm7, %v3280_v4, %v3272_v28  ;;  %3090 = vmatprep.mubr.f32.mxu1 %v11317_v0  ;;  %v3286_v50 = vsel %vm1591_vm7, %v3272_v28, %v3280_v4 }
 0x4ec   : > { %v3296_v10 = vmul.f32 %v3290_v52, %v9087_v34  ;;  %v3278_v11 = vpop.permute.xlu1 %3277  ;;  %v3295_v22 = vmul.f32 %v3286_v50, %v9120_v43 }
 0x4ed   : > { %v3289_v20 = vsel %vm1591_vm7, %v3278_v11, %v3270_v61  ;;  %v3285_v7 = vsel %vm1591_vm7, %v3270_v61, %v3278_v11 }
 0x4ee   : > { %v3294_v21 = vmul.f32 %v3289_v20, %v9087_v34  ;;  %7663 = vmatmul.mubr.msk.f32.vlgmr.msra.gmra.mrb[12].mxu1 %vm2059_vm9, %v7659_v9  ;;  %v3276_v25 = vpop.permute.xlu0 %3275  ;;  %v3293_v28 = vmul.f32 %v3285_v7, %v9120_v43 }
 0x4ef   : > { %8043 = vmatpush1.bf16.msra.mxu1 %v8042_v17  ;;  %3096 = vmatprep.mubr.f32.mxu1 %v11317_v0 }
 0x4f0   : > { %8045 = vmatprep.subr.bf16.mxu1 %v8044_v2  ;;  %v3274_v30 = vpop.permute.xlu1 %3273  ;;  %v8048_v55 = vpack.c.bf16 %v3296_v10, %v3294_v21  ;;  %v8050_v8 = vpack.c.bf16 %v3295_v22, %v3293_v28 }
 0x4f2   : > { %7664 = vmatmul.mubr.msk.f32.gmra.mrb[14].mxu1 %vm2059_vm9, %v7660_v27  ;;  %v3284_v31 = vpop.permute.xlu0 %3283 }
 0x4f3   : > { %8047 = vmatpush1.bf16.msra.mxu1 %v8046_v39  ;;  %3102 = vmatprep.mubr.f32.mxu1 %v11317_v0  ;;  %v3292_v36 = vsel %vm1591_vm7, %v3284_v31, %v3276_v25  ;;  %v3288_v62 = vsel %vm1591_vm7, %v3276_v25, %v3284_v31  ;;  %v7669_v25 = vld [vmem:[%s11371_s25 + $0xb0] sm:$0xff] }
 0x4f4   : > { %8049 = vmatprep.subr.bf16.mxu1 %v8048_v55  ;;  %v3282_v33 = vpop.permute.xlu1 %3281  ;;  %v3300_v56 = vmul.f32 %v3292_v36, %v9087_v34  ;;  %v3299_v4 = vmul.f32 %v3288_v62, %v9120_v43  ;;  %v7675_v62 = vld [vmem:[%s11371_s25 + $0xc0] sm:$0xff] }
 0x4f5   : > { %v3291_v63 = vsel %vm1591_vm7, %v3282_v33, %v3274_v30  ;;  %v3287_v23 = vsel %vm1591_vm7, %v3274_v30, %v3282_v33  ;;  %v7670_v33 = vld [vmem:[%s11371_s25 + $0xb8] sm:$0xff] }
 0x4f6   : > { %7665 = vmatmul.mubr.msk.f32.gmra.mrb[16].mxu1 %vm2059_vm9, %v7661_v49  ;;  %v3418_v53 = vpop.permute.xlu0 %3417  ;;  %v3298_v61 = vmul.f32 %v3291_v63, %v9087_v34  ;;  %v3297_v52 = vmul.f32 %v3287_v23, %v9120_v43 }
 0x4f7   : > { %3108 = vmatprep.mubr.f32.mxu1 %v11317_v0 }
 0x4f8   : > { %v3416_v60 = vpop.permute.xlu1 %3415  ;;  %v8052_v11 = vpack.c.bf16 %v3300_v56, %v3298_v61  ;;  %v8054_v21 = vpack.c.bf16 %v3299_v4, %v3297_v52  ;;  %v7676_v4 = vld [vmem:[%s11371_s25 + $0xc8] sm:$0xff] }
 0x4fa   : > { %7666 = vmatmul.mubr.msk.f32.gmra.mrb[18].mxu1 %vm2059_vm9, %v7662_v29  ;;  %v3426_v6 = vpop.permute.xlu0 %3425 }
 0x4fb   : > { %v3436_v40 = vsel %vm1727_vm8, %v3426_v6, %v3418_v53  ;;  %3236 = vmatprep.mubr.f32.mxu1 %v11317_v0  ;;  %v3432_v30 = vsel %vm1727_vm8, %v3418_v53, %v3426_v6 }
 0x4fc   : > { %v3442_v3 = vmul.f32 %v3436_v40, %v9127_v45  ;;  %v3424_v42 = vpop.permute.xlu1 %3423  ;;  %v3441_v7 = vmul.f32 %v3432_v30, %v9156_v54 }
 0x4fd   : > { %v3435_v9 = vsel %vm1727_vm8, %v3424_v42, %v3416_v60  ;;  %v3431_v55 = vsel %vm1727_vm8, %v3416_v60, %v3424_v42 }
 0x4fe   : > { %v3440_v10 = vmul.f32 %v3435_v9, %v9127_v45  ;;  %7671 = vmatmul.mubr.msk.f32.vlgmr.msra.gmra.mrb[12].mxu1 %vm2059_vm9, %v7667_v57  ;;  %v3422_v17 = vpop.permute.xlu0 %3421  ;;  %v3439_v53 = vmul.f32 %v3431_v55, %v9156_v54 }
 0x4ff   : > { %8051 = vmatpush1.bf16.msra.mxu1 %v8050_v8  ;;  %3242 = vmatprep.mubr.f32.mxu1 %v11317_v0 }
 0x500   : > { %8053 = vmatprep.subr.bf16.mxu1 %v8052_v11  ;;  %v3420_v19 = vpop.permute.xlu1 %3419  ;;  %v8056_v20 = vpack.c.bf16 %v3442_v3, %v3440_v10  ;;  %v8058_v61 = vpack.c.bf16 %v3441_v7, %v3439_v53  ;;  %v7677_v11 = vld [vmem:[%s11371_s25 + $0xd0] sm:$0xff] }
 0x502   : > { %7672 = vmatmul.mubr.msk.f32.gmra.mrb[14].mxu1 %vm2059_vm9, %v7668_v18  ;;  %v3430_v2 = vpop.permute.xlu0 %3429 }
 0x503   : > { %8055 = vmatpush1.bf16.msra.mxu1 %v8054_v21  ;;  %3248 = vmatprep.mubr.f32.mxu1 %v11317_v0  ;;  %v3438_v31 = vsel %vm1727_vm8, %v3430_v2, %v3422_v17  ;;  %v3434_v36 = vsel %vm1727_vm8, %v3422_v17, %v3430_v2 }
 0x504   : > { %8057 = vmatprep.subr.bf16.mxu1 %v8056_v20  ;;  %v3428_v27 = vpop.permute.xlu1 %3427  ;;  %v3446_v63 = vmul.f32 %v3438_v31, %v9127_v45  ;;  %v3445_v6 = vmul.f32 %v3434_v36, %v9156_v54 }
 0x505   : > { %v3437_v49 = vsel %vm1727_vm8, %v3428_v27, %v3420_v19  ;;  %v3433_v29 = vsel %vm1727_vm8, %v3420_v19, %v3428_v27 }
 0x506   : > { %7673 = vmatmul.mubr.msk.f32.gmra.mrb[16].mxu1 %vm2059_vm9, %v7669_v25  ;;  %v3564_v39 = vpop.permute.xlu0 %3563  ;;  %v3444_v60 = vmul.f32 %v3437_v49, %v9127_v45  ;;  %v3443_v40 = vmul.f32 %v3433_v29, %v9156_v54  ;;  %v7678_v25 = vld [vmem:[%s11371_s25 + $0xd8] sm:$0xff] }
 0x507   : > { %3254 = vmatprep.mubr.f32.mxu1 %v11317_v0 }
 0x508   : > { %v3562_v50 = vpop.permute.xlu1 %3561  ;;  %v8060_v42 = vpack.c.bf16 %v3446_v63, %v3444_v60  ;;  %v8062_v10 = vpack.c.bf16 %v3445_v6, %v3443_v40  ;;  %v7684_v63 = vld [vmem:[%s11371_s25 + $0xe8] sm:$0xff]  ;;  %v7685_v60 = vld [vmem:[%s11371_s25 + $0xf0] sm:$0xff] }
 0x50a   : > { %7674 = vmatmul.mubr.msk.f32.gmra.mrb[18].mxu1 %vm2059_vm9, %v7670_v33  ;;  %v3572_v22 = vpop.permute.xlu0 %3571  ;;  %v7683_v33 = vld [vmem:[%s11371_s25 + $0xe0] sm:$0xff] }
 0x50b   : > { %v3582_v28 = vsel %vm1863_vm5, %v3572_v22, %v3564_v39  ;;  %3382 = vmatprep.mubr.f32.mxu1 %v11317_v0  ;;  %v3578_v19 = vsel %vm1863_vm5, %v3564_v39, %v3572_v22  ;;  %v7686_v22 = vld [vmem:[%s11371_s25 + $0xf8] sm:$0xff] }
 0x50c   : > { %v3588_v56 = vmul.f32 %v3582_v28, %v8976_v59  ;;  %v3570_v23 = vpop.permute.xlu1 %3569  ;;  %v3587_v27 = vmul.f32 %v3578_v19, %v8973_v58  ;;  %v7691_v28 = vld [vmem:[%s11371_s25 + $0x100] sm:$0xff] }
 0x50d   : > { %v3581_v57 = vsel %vm1863_vm5, %v3570_v23, %v3562_v50  ;;  %v3577_v20 = vsel %vm1863_vm5, %v3562_v50, %v3570_v23  ;;  %v7694_v23 = vld [vmem:[%s11371_s25 + $0x118] sm:$0xff] }
 0x50e   : > { %v3586_v3 = vmul.f32 %v3581_v57, %v8976_v59  ;;  %7679 = vmatmul.mubr.msk.f32.vlgmr.msra.gmra.mrb[12].mxu1 %vm2059_vm9, %v7675_v62  ;;  %v3568_v8 = vpop.permute.xlu0 %3567  ;;  %v3585_v30 = vmul.f32 %v3577_v20, %v8973_v58  ;;  %v7692_v62 = vld [vmem:[%s11371_s25 + $0x108] sm:$0xff] }
 0x50f   : > { %8059 = vmatpush1.bf16.msra.mxu1 %v8058_v61  ;;  %3388 = vmatprep.mubr.f32.mxu1 %v11317_v0 }
 0x510   : > { %8061 = vmatprep.subr.bf16.mxu1 %v8060_v42  ;;  %v3566_v52 = vpop.permute.xlu1 %3565  ;;  %v8064_v9 = vpack.c.bf16 %v3588_v56, %v3586_v3  ;;  %v8066_v50 = vpack.c.bf16 %v3587_v27, %v3585_v30  ;;  %v7693_v56 = vld [vmem:[%s11371_s25 + $0x110] sm:$0xff] }
 0x512   : > { %7680 = vmatmul.mubr.msk.f32.gmra.mrb[14].mxu1 %vm2059_vm9, %v7676_v4  ;;  %v3576_v17 = vpop.permute.xlu0 %3575 }
 0x513   : > { %8063 = vmatpush1.bf16.msra.mxu1 %v8062_v10  ;;  %3394 = vmatprep.mubr.f32.mxu1 %v11317_v0  ;;  %v3584_v21 = vsel %vm1863_vm5, %v3576_v17, %v3568_v8  ;;  %v3580_v55 = vsel %vm1863_vm5, %v3568_v8, %v3576_v17 }
 0x514   : > { %8065 = vmatprep.subr.bf16.mxu1 %v8064_v9  ;;  %v3574_v18 = vpop.permute.xlu1 %3573  ;;  %v3592_v39 = vmul.f32 %v3584_v21, %v8976_v59  ;;  %v3591_v7 = vmul.f32 %v3580_v55, %v8973_v58 }
 0x515   : > { %v3583_v2 = vsel %vm1863_vm5, %v3574_v18, %v3566_v52  ;;  %v3579_v31 = vsel %vm1863_vm5, %v3566_v52, %v3574_v18 }
 0x516   : > { %7681 = vmatmul.mubr.msk.f32.gmra.mrb[16].mxu1 %vm2059_vm9, %v7677_v11  ;;  %v3590_v49 = vmul.f32 %v3583_v2, %v8976_v59  ;;  %v3589_v53 = vmul.f32 %v3579_v31, %v8973_v58 }
 0x517   : > { %3400 = vmatprep.mubr.f32.mxu1 %v11317_v0 }
 0x518   : > { %v8068_v36 = vpack.c.bf16 %v3592_v39, %v3590_v49  ;;  %v8070_v29 = vpack.c.bf16 %v3591_v7, %v3589_v53 }
 0x51a   : > { %7682 = vmatmul.mubr.msk.f32.gmra.mrb[18].mxu1 %vm2059_vm9, %v7678_v25 }
 0x51b   : > { %3528 = vmatprep.mubr.f32.mxu1 %v11317_v0 }
 0x51e   : > { %7687 = vmatmul.mubr.msk.f32.vlgmr.msra.gmra.mrb[12].mxu1 %vm2059_vm9, %v7683_v33 }
 0x51f   : > { %8067 = vmatpush1.bf16.msra.mxu1 %v8066_v50  ;;  %3534 = vmatprep.mubr.f32.mxu1 %v11317_v0 }
 0x520   : > { %8069 = vmatprep.subr.bf16.mxu1 %v8068_v36 }
 0x522   : > { %7688 = vmatmul.mubr.msk.f32.gmra.mrb[14].mxu1 %vm2059_vm9, %v7684_v63 }
 0x523   : > { %8071 = vmatpush1.bf16.msra.mxu1 %v8070_v29  ;;  %3540 = vmatprep.mubr.f32.mxu1 %v11317_v0  ;;  %v3719_v6 = vpop.permute.xlu0 %3718 }
 0x525   : > { %v3714_v61 = vpop.permute.xlu1 %3713 }
 0x526   : > { %7689 = vmatmul.mubr.msk.f32.gmra.mrb[16].mxu1 %vm2059_vm9, %v7685_v60 }
 0x527   : > { %3546 = vmatprep.mubr.f32.mxu1 %v11317_v0  ;;  %v3751_v8 = vpop.permute.xlu0 %3750 }
 0x529   : > { %v3746_v40 = vpop.permute.xlu1 %3745 }
 0x52a   : > { %7690 = vmatmul.mubr.msk.f32.gmra.mrb[18].mxu1 %vm2059_vm9, %v7686_v22 }
 0x52b   : > { %3674 = vmatprep.mubr.f32.mxu1 %v11317_v0  ;;  %v3729_v2 = vpop.permute.xlu0 %3728 }
 0x52d   : > { %v3724_v9 = vpop.permute.xlu1 %3723 }
 0x52e   : > { %7695 = vmatmul.mubr.msk.f32.vlgmr.msra.gmra.mrb[12].mxu1 %vm2059_vm9, %v7691_v28 }
 0x52f   : > { %3680 = vmatprep.mubr.f32.mxu1 %v11317_v0  ;;  %v3761_v60 = vpop.permute.xlu0 %3760 }
 0x531   : > { %v3756_v39 = vpop.permute.xlu1 %3755 }
 0x532   : > { %7696 = vmatmul.mubr.msk.f32.gmra.mrb[14].mxu1 %vm2059_vm9, %v7692_v62 }
 0x533   : > { %3686 = vmatprep.mubr.f32.mxu1 %v11317_v0 }
 0x536   : > { %7697 = vmatmul.mubr.msk.f32.gmra.mrb[16].mxu1 %vm2059_vm9, %v7693_v56 }
 0x537   : > { %3692 = vmatprep.mubr.f32.mxu1 %v11317_v0 }
 0x53a   : > { %7698 = vmatmul.mubr.msk.f32.gmra.mrb[18].mxu1 %vm2059_vm9, %v7694_v23 }
 0x53b   : > { %5582 = vmatprep.mubr.f32.mxu1 %v11317_v0 }
 0x601   : > { %v3676_v57 = vpop.f32.mrb[12].mxu1 }
 0x602   : > { %v3731_v3 = vadd.f32 %v3714_v61, %v3676_v57  ;;  %v3678_v42 = vpop.f32.mrb[13].mxu1 }
 0x603   : > { %v3732_v4 = vadd.f32 %v3714_v61, %v3678_v42 }
 0x604   : > { %v9864_v52 = vadd.f32 %v3746_v40, %v3731_v3 }
 0x605   : > { %v9866_v10 = vadd.f32 %v3746_v40, %v3732_v4  ;;  %v3682_v11 = vpop.f32.mrb[14].mxu1 }
 0x606   : > { %v3733_v17 = vadd.f32 %v3719_v6, %v3682_v11  ;;  %v3684_v18 = vpop.f32.mrb[15].mxu1  ;;  %v3783_v63 = vmul.f32 %v9864_v52, %v9864_v52 }
 0x607   : > { %v3734_v19 = vadd.f32 %v3719_v6, %v3684_v18  ;;  %v3771_v20 = vadd.f32 %v9866_v10, %v9864_v52  ;;  %v3784_v29 = vmul.f32 %v9866_v10, %v9866_v10  ;;  %v4054_v18 = vld [vmem:[%s11269_s11 + $0x8] sm:$0xff] }
 0x608   : > { %v9870_v21 = vadd.f32 %v3751_v8, %v3733_v17  ;;  %v4053_v17 = vld [vmem:[%s11269_s11] sm:$0xff] }
 0x609   : > { %v9872_v25 = vadd.f32 %v3751_v8, %v3734_v19  ;;  %3772 = vadd.xlane.f32.xlu1 %v3771_v20  ;;  %v3688_v27 = vpop.f32.mrb[16].mxu1  ;;  %v3791_v23 = vadd.f32 %v3784_v29, %v3783_v63  ;;  %v4085_v19 = vld [vmem:[%s11270_s12] sm:$0xff]  ;;  %v4086_v20 = vld [vmem:[%s11270_s12 + $0x8] sm:$0xff] }
 0x60a   : > { %v3735_v30 = vadd.f32 %v3724_v9, %v3688_v27  ;;  %v3690_v55 = vpop.f32.mrb[17].mxu1  ;;  %v3785_v61 = vmul.f32 %v9870_v21, %v9870_v21  ;;  %v4056_v27 = vld [vmem:[%s11269_s11 + $0x18] sm:$0xff]  ;;  %v8639_v29 = vld [vmem:[%s11359_s4 + $0x8] sm:$0xff] }
 0x60b   : > { %v3736_v31 = vadd.f32 %v3724_v9, %v3690_v55  ;;  %v3774_v49 = vadd.f32 %v9872_v25, %v9870_v21  ;;  %v3786_v3 = vmul.f32 %v9872_v25, %v9872_v25 }
 0x60c   : > { %v9876_v33 = vadd.f32 %v3756_v39, %v3735_v30 }
 0x60d   : > { %v9878_v50 = vadd.f32 %v3756_v39, %v3736_v31  ;;  %v3694_v7 = vpop.f32.mrb[18].mxu1  ;;  %3775 = vadd.xlane.f32.xlu0 %v3774_v49  ;;  %v3794_v8 = vadd.f32 %v3786_v3, %v3785_v61  ;;  %v8641_v61 = vld [vmem:[%s11359_s4 + $0x18] sm:$0xff] }
 0x60e   : > { %v3737_v53 = vadd.f32 %v3729_v2, %v3694_v7  ;;  %v3696_v36 = vpop.f32.mrb[19].mxu1  ;;  %v3787_v40 = vmul.f32 %v9876_v33, %v9876_v33 }
 0x60f   : > { %v3738_v22 = vadd.f32 %v3729_v2, %v3696_v36  ;;  %v3777_v28 = vadd.f32 %v9878_v50, %v9876_v33  ;;  %v3788_v57 = vmul.f32 %v9878_v50, %v9878_v50  ;;  %v4055_v2 = vld [vmem:[%s11269_s11 + $0x10] sm:$0xff] }
 0x610   : > { %v9886_v62 = vadd.f32 %v3761_v60, %v3737_v53 }
 0x611   : > { %v9888_v56 = vadd.f32 %v3761_v60, %v3738_v22  ;;  %3778 = vadd.xlane.f32.xlu0 %v3777_v28  ;;  %v3797_v42 = vadd.f32 %v3788_v57, %v3787_v40  ;;  %v8640_v28 = vld [vmem:[%s11359_s4 + $0x10] sm:$0xff] }
 0x612   : > { %v3789_v4 = vmul.f32 %v9886_v62, %v9886_v62 }
 0x613   : > { %v3780_v6 = vadd.f32 %v9888_v56, %v9886_v62  ;;  %v3790_v9 = vmul.f32 %v9888_v56, %v9888_v56 }
 0x615   : > { %3792 = vadd.xlane.f32.xlu0 %v3791_v23  ;;  %3781 = vadd.xlane.f32.xlu1 %v3780_v6  ;;  %v3800_v11 = vadd.f32 %v3790_v9, %v3789_v4  ;;  %v8642_v6 = vld [vmem:[%s11359_s4] sm:$0xff] }
 0x619   : > { %3798 = vadd.xlane.f32.xlu0 %v3797_v42  ;;  %3795 = vadd.xlane.f32.xlu1 %v3794_v8 }
 0x61d   : > { %3801 = vadd.xlane.f32.xlu1 %v3800_v11 }
 0x62e   : > { %4059 = vperm.xlu1 %8510, %v4053_v17  }
 0x62f   : > { %4064 = vperm.xlu0 %8509, %v4054_v18  }
 0x632   : > { %4091 = vperm.xlu1 %8510, %v4085_v19  }
 0x633   : > { %4096 = vperm.xlu0 %8509, %v4086_v20  }
 0x636   : > { %4069 = vperm.xlu1 %8510, %v4055_v2  }
 0x637   : > { %4074 = vperm.xlu0 %8509, %v4056_v27  }
 0x696   : > { %v3773_v30 = vpop.xlane.xlu1 %3772 }
 0x69a   : > { %v3776_v55 = vpop.xlane.xlu0 %3775 }
 0x69b   : > { %v8072_v39 = vpack.c.bf16 %v3776_v55, %v3773_v30 }
 0x69d   : > { %8073 = vmatprep.subr.bf16.mxu0 %v8072_v39 }
 0x69e   : > { %8075 = vmatpush3.bf16.msra.mxu0 %v8072_v39  ;;  %v3779_v31 = vpop.xlane.xlu0 %3778 }
 0x6a2   : > { %v3782_v49 = vpop.xlane.xlu1 %3781  ;;  %v3793_v53 = vpop.xlane.xlu0 %3792 }
 0x6a3   : > { %v8076_v7 = vpack.c.bf16 %v3782_v49, %v3779_v31 }
 0x6a5   : > { %8077 = vmatprep.subr.bf16.mxu0 %v8076_v7 }
 0x6a6   : > { %v3796_v36 = vpop.xlane.xlu1 %3795  ;;  %8079 = vmatpush3.bf16.msra.mxu0 %v8076_v7  ;;  %v3799_v60 = vpop.xlane.xlu0 %3798 }
 0x6a7   : > { %v8080_v63 = vpack.c.bf16 %v3796_v36, %v3793_v53 }
 0x6a9   : > { %7926 = vmatmul.mubr.msk.f32.vlgmr.msra.gmra.mrb[8].mxu0 %vm2059_vm9, %v8639_v29  ;;  %8081 = vmatprep.subr.bf16.mxu0 %v8080_v63 }
 0x6aa   : > { %v3802_v22 = vpop.xlane.xlu1 %3801  ;;  %8083 = vmatpush3.bf16.msra.mxu0 %v8080_v63  ;;  %7928 = vmatprep.mubr.msk.f32.mxu0 %vm2059_vm9, %v8640_v28 }
 0x6ab   : > { %v8084_v23 = vpack.c.bf16 %v3802_v22, %v3799_v60 }
 0x6ad   : > { %7929 = vmatmul.mubr.msk.f32.gmra.mrb[10].mxu0 %vm2059_vm9, %v8641_v61  ;;  %8085 = vmatprep.subr.bf16.mxu0 %v8084_v23 }
 0x6ae   : > { %8087 = vmatpush3.bf16.msra.mxu0 %v8084_v23  ;;  %7939 = vmatprep.mubr.msk.f32.mxu0 %vm2059_vm9, %v8642_v6 }
 0x6b1   : > { %7940 = vmatmul.mubr.msk.f32.vlgmr.msra.gmra.mrb[12].mxu0 %vm2059_vm9, %v8639_v29 }
 0x6b2   : > { %7942 = vmatprep.mubr.msk.f32.mxu0 %vm2059_vm9, %v8640_v28 }
 0x6b5   : > { %7943 = vmatmul.mubr.msk.f32.gmra.mrb[14].mxu0 %vm2059_vm9, %v8641_v61 }
 0x6b6   : > { %4322 = vmatprep.mubr.f32.mxu0 %v11317_v0 }
 0x77c   : > { %v7927_v40 = vpop.f32.mrb[8].mxu0 }
 0x77d   : > { %v3889_v57 = vmul.f32 0.0009765625, %v7927_v40  ;;  %v3869_v3 = vpop.f32.mrb[9].mxu0 }
 0x77e   : > { %v3888_v42 = vmul.f32 0.0009765625, %v3869_v3  ;;  %v4088_v3 = vld [vmem:[%s11270_s12 + $0x18] sm:$0xff] }
 0x77f   : > { %3996 = vperm.xlu1 %8510, %v3889_v57   ;;  %v3982_v18 = vmul.f32 %v3889_v57, %v3889_v57 }
 0x780   : > { %3991 = vperm.xlu0 %8509, %v3888_v42   ;;  %v7930_v8 = vpop.f32.mrb[10].mxu0  ;;  %v3981_v2 = vmul.f32 %v3888_v42, %v3888_v42  ;;  %v4087_v42 = vld [vmem:[%s11270_s12 + $0x10] sm:$0xff] }
 0x781   : > { %v3891_v4 = vmul.f32 0.0009765625, %v7930_v8  ;;  %v3879_v9 = vpop.f32.mrb[11].mxu0  ;;  %v4065_v8 = vpop.permute.xlu0 %4064 }
 0x782   : > { %v3890_v11 = vmul.f32 0.0009765625, %v3879_v9 }
 0x783   : > { %v3984_v31 = vmul.f32 %v3891_v4, %v3891_v4 }
 0x784   : > { %4006 = vperm.xlu0 %8509, %v3891_v4   ;;  %4001 = vperm.xlu1 %8510, %v3890_v11   ;;  %v7941_v17 = vpop.f32.mrb[12].mxu0  ;;  %v3983_v36 = vmul.f32 %v3890_v11, %v3890_v11  ;;  %v4060_v4 = vpop.permute.xlu1 %4059 }
 0x785   : > { %v3978_v19 = vmul.f32 0.0009765625, %v7941_v17  ;;  %v3958_v20 = vpop.f32.mrb[13].mxu0  ;;  %v4097_v9 = vpop.permute.xlu0 %4096 }
 0x786   : > { %v3977_v27 = vmul.f32 0.0009765625, %v3958_v20 }
 0x787   : > { %v3986_v30 = vsub.f32 %v3978_v19, %v3982_v18 }
 0x788   : > { %v3985_v55 = vsub.f32 %v3977_v27, %v3981_v2  ;;  %v7944_v39 = vpop.f32.mrb[14].mxu0  ;;  %v4092_v11 = vpop.permute.xlu1 %4091 }
 0x789   : > { %v4018_v49 = vadd.f32 1e-05, %v3986_v30  ;;  %v3980_v7 = vmul.f32 0.0009765625, %v7944_v39  ;;  %v3968_v53 = vpop.f32.mrb[15].mxu0  ;;  %v4075_v17 = vpop.permute.xlu0 %4074 }
 0x78a   : > { %v4017_v63 = vadd.f32 1e-05, %v3985_v55  ;;  %v3979_v29 = vmul.f32 0.0009765625, %v3968_v53 }
 0x78b   : > { %8551 = vrsqrt.f32 %v4018_v49  ;;  %v3988_v60 = vsub.f32 %v3980_v7, %v3984_v31 }
 0x78c   : > { %8553 = vrsqrt.f32 %v4017_v63  ;;  %v3987_v22 = vsub.f32 %v3979_v29, %v3983_v36  ;;  %v4070_v18 = vpop.permute.xlu1 %4069 }
 0x78d   : > { %v4020_v28 = vadd.f32 1e-05, %v3988_v60 }
 0x78e   : > { %v4019_v23 = vadd.f32 1e-05, %v3987_v22 }
 0x78f   : > { %8555 = vrsqrt.f32 %v4020_v28 }
 0x790   : > { %8557 = vrsqrt.f32 %v4019_v23 }
 0x795   : > { %v8552_v61 = vpop.eup %8551 }
 0x796   : > { %v8554_v6 = vpop.eup %8553  ;;  %4032 = vperm.xlu0 %8509, %v8552_v61  }
 0x797   : > { %4027 = vperm.xlu1 %8510, %v8554_v6  }
 0x799   : > { %v8556_v40 = vpop.eup %8555 }
 0x79a   : > { %v8558_v57 = vpop.eup %8557  ;;  %4042 = vperm.xlu0 %8509, %v8556_v40  }
 0x79b   : > { %4037 = vperm.xlu1 %8510, %v8558_v57  }
 0x79e   : > { %4106 = vperm.xlu0 %8509, %v4088_v3  }
 0x79f   : > { %4101 = vperm.xlu1 %8510, %v4087_v42  }
 0x7fe   : > { %v3997_v20 = vpop.permute.xlu1 %3996 }
 0x7ff   : > { %v3992_v19 = vpop.permute.xlu0 %3991  ;;  %v4011_v30 = vsub.f32 %v9870_v21, %v3997_v20  ;;  %v4012_v55 = vsub.f32 %v9872_v25, %v3997_v20 }
 0x800   : > { %v4009_v39 = vsub.f32 %v9864_v52, %v3992_v19  ;;  %v4010_v31 = vsub.f32 %v9866_v10, %v3992_v19 }
 0x803   : > { %v4007_v2 = vpop.permute.xlu0 %4006  ;;  %v4002_v27 = vpop.permute.xlu1 %4001 }
 0x804   : > { %v4015_v60 = vsub.f32 %v9886_v62, %v4007_v2  ;;  %v4016_v22 = vsub.f32 %v9888_v56, %v4007_v2  ;;  %v4013_v21 = vsub.f32 %v9876_v33, %v4002_v27  ;;  %v4014_v25 = vsub.f32 %v9878_v50, %v4002_v27 }
 0x815   : > { %v4033_v49 = vpop.permute.xlu0 %4032 }
 0x816   : > { %v4047_v7 = vmul.f32 %v4033_v49, %v4011_v30  ;;  %v4048_v53 = vmul.f32 %v4033_v49, %v4012_v55  ;;  %v4028_v36 = vpop.permute.xlu1 %4027 }
 0x817   : > { %v4045_v63 = vmul.f32 %v4028_v36, %v4009_v39  ;;  %v4046_v29 = vmul.f32 %v4028_v36, %v4010_v31 }
 0x818   : > { %v4079_v28 = vmul.f32 %v4065_v8, %v4047_v7  ;;  %v4080_v23 = vmul.f32 %v4065_v8, %v4048_v53 }
 0x819   : > { %v4077_v61 = vmul.f32 %v4060_v4, %v4045_v63  ;;  %v4078_v52 = vmul.f32 %v4060_v4, %v4046_v29  ;;  %v4043_v6 = vpop.permute.xlu0 %4042 }
 0x81a   : > { %v4111_v10 = vadd.f32 %v4097_v9, %v4079_v28  ;;  %v9956_v40 = vadd.f32 %v4097_v9, %v4080_v23  ;;  %v4051_v57 = vmul.f32 %v4043_v6, %v4015_v60  ;;  %v4052_v3 = vmul.f32 %v4043_v6, %v4016_v22  ;;  %v4038_v42 = vpop.permute.xlu1 %4037 }
 0x81b   : > { %v4109_v19 = vadd.f32 %v4092_v11, %v4077_v61  ;;  %v9958_v20 = vadd.f32 %v4092_v11, %v4078_v52  ;;  %v4049_v62 = vmul.f32 %v4038_v42, %v4013_v21  ;;  %v4050_v56 = vmul.f32 %v4038_v42, %v4014_v25 }
 0x81c   : > { %v7709_v2 = vmul.f32 -1.442695, %v4111_v10  ;;  %v7710_v8 = vmul.f32 -1.442695, %v9956_v40  ;;  %v4083_v33 = vmul.f32 %v4075_v17, %v4051_v57  ;;  %v4084_v30 = vmul.f32 %v4075_v17, %v4052_v3 }
 0x81d   : > { %v7707_v50 = vmul.f32 -1.442695, %v4109_v19  ;;  %v7708_v4 = vmul.f32 -1.442695, %v9958_v20  ;;  %v4107_v27 = vpop.permute.xlu0 %4106  ;;  %v4081_v55 = vmul.f32 %v4070_v18, %v4049_v62  ;;  %v4082_v9 = vmul.f32 %v4070_v18, %v4050_v56 }
 0x81e   : > { %8559 = vpow2.f32 %v7709_v2  ;;  %v4115_v39 = vadd.f32 %v4107_v27, %v4083_v33  ;;  %v4116_v31 = vadd.f32 %v4107_v27, %v4084_v30  ;;  %v4102_v49 = vpop.permute.xlu1 %4101 }
 0x81f   : > { %8561 = vpow2.f32 %v7710_v8  ;;  %v4113_v11 = vadd.f32 %v4102_v49, %v4081_v55  ;;  %v4114_v7 = vadd.f32 %v4102_v49, %v4082_v9 }
 0x820   : > { %8563 = vpow2.f32 %v7707_v50  ;;  %v7713_v53 = vmul.f32 -1.442695, %v4115_v39  ;;  %v7714_v36 = vmul.f32 -1.442695, %v4116_v31 }
 0x821   : > { %8565 = vpow2.f32 %v7708_v4  ;;  %v7711_v63 = vmul.f32 -1.442695, %v4113_v11  ;;  %v7712_v17 = vmul.f32 -1.442695, %v4114_v7 }
 0x822   : > { %8567 = vpow2.f32 %v7713_v53 }
 0x823   : > { %8569 = vpow2.f32 %v7714_v36 }
 0x824   : > { %8571 = vpow2.f32 %v7711_v63 }
 0x825   : > { %8573 = vpow2.f32 %v7712_v17 }
 0x828   : > { %v8560_v29 = vpop.eup %8559 }
 0x829   : > { %v8562_v60 = vpop.eup %8561  ;;  %v4143_v18 = vadd.f32 1.0, %v8560_v29 }
 0x82a   : > { %v8564_v22 = vpop.eup %8563  ;;  %v4144_v28 = vadd.f32 1.0, %v8562_v60 }
 0x82b   : > { %v8566_v23 = vpop.eup %8565  ;;  %8575 = vrcp.f32 %v4143_v18  ;;  %v4141_v21 = vadd.f32 1.0, %v8564_v22 }
 0x82c   : > { %v8568_v25 = vpop.eup %8567  ;;  %8577 = vrcp.f32 %v4144_v28  ;;  %v4142_v61 = vadd.f32 1.0, %v8566_v23 }
 0x82d   : > { %v8570_v52 = vpop.eup %8569  ;;  %8579 = vrcp.f32 %v4141_v21  ;;  %v4147_v6 = vadd.f32 1.0, %v8568_v25 }
 0x82e   : > { %v8572_v57 = vpop.eup %8571  ;;  %8581 = vrcp.f32 %v4142_v61  ;;  %v4148_v62 = vadd.f32 1.0, %v8570_v52 }
 0x82f   : > { %v4145_v3 = vadd.f32 1.0, %v8572_v57  ;;  %v8574_v42 = vpop.eup %8573  ;;  %8583 = vrcp.f32 %v4147_v6  ;;  %v5439_v6 = vld [vmem:[%s11272_s14 + $0x8] sm:$0xff] }
 0x830   : > { %v4146_v56 = vadd.f32 1.0, %v8574_v42 }
 0x831   : > { %8585 = vrcp.f32 %v4145_v3 }
 0x832   : > { %8587 = vrcp.f32 %v4148_v62  ;;  %v5438_v62 = vld [vmem:[%s11272_s14] sm:$0xff] }
 0x833   : > { %8589 = vrcp.f32 %v4146_v56 }
 0x835   : > { %v8576_v2 = vpop.eup %8575 }
 0x836   : > { %v8578_v8 = vpop.eup %8577  ;;  %v9962_v33 = vmul.f32 %v8576_v2, %v4111_v10 }
 0x837   : > { %v8580_v30 = vpop.eup %8579  ;;  %v9969_v27 = vmul.f32 %v8578_v8, %v9956_v40 }
 0x838   : > { %v9964_v50 = vmul.f32 %v8580_v30, %v4109_v19  ;;  %4211 = vrot.lane.b32.xlu0 %v9962_v33, %s11361_s1  ;;  %v8582_v4 = vpop.eup %8581 }
 0x839   : > { %v8584_v55 = vpop.eup %8583  ;;  %v9974_v9 = vmul.f32 %v8582_v4, %v9958_v20 }
 0x83a   : > { %4209 = vrot.lane.b32.xlu1 %v9964_v50, %s11361_s1  ;;  %v9978_v19 = vmul.f32 %v8584_v55, %v4115_v39  ;;  %v5441_v55 = vld [vmem:[%s11272_s14 + $0x18] sm:$0xff] }
 0x83b   : > { %v8586_v10 = vpop.eup %8585 }
 0x83c   : > { %4219 = vrot.lane.b32.xlu0 %v9969_v27, %s11361_s1  ;;  %v8588_v49 = vpop.eup %8587  ;;  %v9982_v53 = vmul.f32 %v8586_v10, %v4113_v11 }
 0x83d   : > { %v8590_v40 = vpop.eup %8589  ;;  %v9986_v36 = vmul.f32 %v8588_v49, %v4116_v31 }
 0x83e   : > { %4217 = vrot.lane.b32.xlu1 %v9974_v9, %s11361_s1  ;;  %v9990_v20 = vmul.f32 %v8590_v40, %v4114_v7 }
 0x840   : > { %4215 = vrot.lane.b32.xlu0 %v9978_v19, %s11361_s1 }
 0x842   : > { %4213 = vrot.lane.b32.xlu1 %v9982_v53, %s11361_s1 }
 0x844   : > { %4223 = vrot.lane.b32.xlu0 %v9986_v36, %s11361_s1 }
 0x846   : > { %4221 = vrot.lane.b32.xlu1 %v9990_v20, %s11361_s1 }
 0x848   : > { %4175 = vrot.lane.b32.xlu0 %v9962_v33, %s11362_s5 }
 0x84a   : > { %4173 = vrot.lane.b32.xlu1 %v9964_v50, %s11362_s5 }
 0x84c   : > { %4183 = vrot.lane.b32.xlu0 %v9969_v27, %s11362_s5 }
 0x84e   : > { %4181 = vrot.lane.b32.xlu1 %v9974_v9, %s11362_s5 }
 0x850   : > { %4179 = vrot.lane.b32.xlu0 %v9978_v19, %s11362_s5 }
 0x852   : > { %4177 = vrot.lane.b32.xlu1 %v9982_v53, %s11362_s5 }
 0x854   : > { %4187 = vrot.lane.b32.xlu0 %v9986_v36, %s11362_s5 }
 0x856   : > { %4185 = vrot.lane.b32.xlu1 %v9990_v20, %s11362_s5 }
 0x858   : > { %4450 = vrot.lane.b32.xlu0 %v9962_v33, %s11363_s7 }
 0x85a   : > { %4448 = vrot.lane.b32.xlu1 %v9964_v50, %s11363_s7 }
 0x85c   : > { %4458 = vrot.lane.b32.xlu0 %v9969_v27, %s11363_s7 }
 0x85e   : > { %4456 = vrot.lane.b32.xlu1 %v9974_v9, %s11363_s7 }
 0x860   : > { %4454 = vrot.lane.b32.xlu0 %v9978_v19, %s11363_s7 }
 0x862   : > { %4452 = vrot.lane.b32.xlu1 %v9982_v53, %s11363_s7 }
 0x864   : > { %4462 = vrot.lane.b32.xlu0 %v9986_v36, %s11363_s7 }
 0x866   : > { %4460 = vrot.lane.b32.xlu1 %v9990_v20, %s11363_s7 }
 0x868   : > { %4596 = vrot.lane.b32.xlu0 %v9962_v33, %s11364_s6 }
 0x86a   : > { %4594 = vrot.lane.b32.xlu1 %v9964_v50, %s11364_s6 }
 0x86c   : > { %4604 = vrot.lane.b32.xlu0 %v9969_v27, %s11364_s6 }
 0x86e   : > { %4602 = vrot.lane.b32.xlu1 %v9974_v9, %s11364_s6 }
 0x870   : > { %4600 = vrot.lane.b32.xlu0 %v9978_v19, %s11364_s6 }
 0x872   : > { %4598 = vrot.lane.b32.xlu1 %v9982_v53, %s11364_s6 }
 0x874   : > { %4608 = vrot.lane.b32.xlu0 %v9986_v36, %s11364_s6 }
 0x876   : > { %4606 = vrot.lane.b32.xlu1 %v9990_v20, %s11364_s6 }
 0x878   : > { %4856 = vrot.lane.b32.xlu0 %v9962_v33, %s11365_s26 }
 0x87a   : > { %4854 = vrot.lane.b32.xlu1 %v9964_v50, %s11365_s26 }
 0x87c   : > { %4864 = vrot.lane.b32.xlu0 %v9969_v27, %s11365_s26 }
 0x87e   : > { %4862 = vrot.lane.b32.xlu1 %v9974_v9, %s11365_s26 }
 0x880   : > { %4860 = vrot.lane.b32.xlu0 %v9978_v19, %s11365_s26 }
 0x882   : > { %4858 = vrot.lane.b32.xlu1 %v9982_v53, %s11365_s26 }
 0x884   : > { %4868 = vrot.lane.b32.xlu0 %v9986_v36, %s11365_s26 }
 0x886   : > { %4866 = vrot.lane.b32.xlu1 %v9990_v20, %s11365_s26 }
 0x888   : > { %5002 = vrot.lane.b32.xlu0 %v9962_v33, %s11366_s0 }
 0x88a   : > { %5000 = vrot.lane.b32.xlu1 %v9964_v50, %s11366_s0 }
 0x88c   : > { %5010 = vrot.lane.b32.xlu0 %v9969_v27, %s11366_s0 }
 0x88e   : > { %5008 = vrot.lane.b32.xlu1 %v9974_v9, %s11366_s0 }
 0x890   : > { %5006 = vrot.lane.b32.xlu0 %v9978_v19, %s11366_s0 }
 0x892   : > { %5004 = vrot.lane.b32.xlu1 %v9982_v53, %s11366_s0 }
 0x894   : > { %5014 = vrot.lane.b32.xlu0 %v9986_v36, %s11366_s0 }
 0x896   : > { %5012 = vrot.lane.b32.xlu1 %v9990_v20, %s11366_s0 }
 0x898   : > { %5148 = vrot.lane.b32.xlu0 %v9962_v33, %s11367_s27 }
 0x89a   : > { %5146 = vrot.lane.b32.xlu1 %v9964_v50, %s11367_s27 }
 0x89c   : > { %5156 = vrot.lane.b32.xlu0 %v9969_v27, %s11367_s27 }
 0x89e   : > { %5154 = vrot.lane.b32.xlu1 %v9974_v9, %s11367_s27 }
 0x8a0   : > { %5152 = vrot.lane.b32.xlu0 %v9978_v19, %s11367_s27 }
 0x8a2   : > { %5150 = vrot.lane.b32.xlu1 %v9982_v53, %s11367_s27 }
 0x8a4   : > { %5160 = vrot.lane.b32.xlu0 %v9986_v36, %s11367_s27 }
 0x8a6   : > { %5158 = vrot.lane.b32.xlu1 %v9990_v20, %s11367_s27 }
 0x8a8   : > { %5294 = vrot.lane.b32.xlu0 %v9962_v33, %s11368_s30 }
 0x8aa   : > { %5292 = vrot.lane.b32.xlu1 %v9964_v50, %s11368_s30  ;;  %v4212_v39 = vpop.permute.xlu0 %4211 }
 0x8ac   : > { %v4210_v31 = vpop.permute.xlu1 %4209  ;;  %5302 = vrot.lane.b32.xlu0 %v9969_v27, %s11368_s30 }
 0x8ae   : > { %5300 = vrot.lane.b32.xlu1 %v9974_v9, %s11368_s30  ;;  %v4220_v11 = vpop.permute.xlu0 %4219 }
 0x8af   : > { %v4226_v7 = vsel %vm839_vm1, %v4212_v39, %v4220_v11  ;;  %v4230_v63 = vsel %vm839_vm1, %v4220_v11, %v4212_v39  ;;  %v5440_v39 = vld [vmem:[%s11272_s14 + $0x10] sm:$0xff] }
 0x8b0   : > { %v4235_v17 = vmul.f32 %v4230_v63, %v8868_v13  ;;  %v4236_v29 = vmul.f32 %v4226_v7, %v8865_v12  ;;  %v4218_v60 = vpop.permute.xlu1 %4217  ;;  %5298 = vrot.lane.b32.xlu0 %v9978_v19, %s11368_s30  ;;  %v5483_v63 = vld [vmem:[%s11274_s16 + $0x8] sm:$0xff] }
 0x8b1   : > { %v4225_v18 = vsel %vm839_vm1, %v4210_v31, %v4218_v60  ;;  %v4229_v22 = vsel %vm839_vm1, %v4218_v60, %v4210_v31 }
 0x8b2   : > { %v4233_v28 = vmul.f32 %v4229_v22, %v8868_v13  ;;  %v4234_v23 = vmul.f32 %v4225_v18, %v8865_v12  ;;  %5296 = vrot.lane.b32.xlu1 %v9982_v53, %s11368_s30  ;;  %v4216_v21 = vpop.permute.xlu0 %4215  ;;  %v5482_v18 = vld [vmem:[%s11274_s16] sm:$0xff] }
 0x8b3   : > { %v7715_v22 = vld [vmem:[%s11271_s13 + $0x20] sm:$0xff] }
 0x8b4   : > { %v8090_v25 = vpack.c.bf16 %v4235_v17, %v4233_v28  ;;  %v4214_v61 = vpop.permute.xlu1 %4213  ;;  %5306 = vrot.lane.b32.xlu0 %v9986_v36, %s11368_s30  ;;  %v8088_v52 = vpack.c.bf16 %v4236_v29, %v4234_v23 }
 0x8b6   : > { %5304 = vrot.lane.b32.xlu1 %v9990_v20, %s11368_s30  ;;  %8089 = vmatprep.subr.bf16.mxu0 %v8088_v52  ;;  %v4224_v57 = vpop.permute.xlu0 %4223  ;;  %v5485_v52 = vld [vmem:[%s11274_s16 + $0x18] sm:$0xff] }
 0x8b7   : > { %8091 = vmatpush1.bf16.msra.mxu0 %v8090_v25  ;;  %v4228_v3 = vsel %vm839_vm1, %v4216_v21, %v4224_v57  ;;  %v4232_v42 = vsel %vm839_vm1, %v4224_v57, %v4216_v21 }
 0x8b8   : > { %v4239_v56 = vmul.f32 %v4232_v42, %v8868_v13  ;;  %v4240_v2 = vmul.f32 %v4228_v3, %v8865_v12  ;;  %v4222_v8 = vpop.permute.xlu1 %4221  ;;  %5449 = vperm.xlu0 %8509, %v5439_v6   ;;  %v5484_v42 = vld [vmem:[%s11274_s16 + $0x10] sm:$0xff] }
 0x8b9   : > { %v4227_v30 = vsel %vm839_vm1, %v4214_v61, %v4222_v8  ;;  %v4231_v4 = vsel %vm839_vm1, %v4222_v8, %v4214_v61 }
 0x8ba   : > { %v4237_v10 = vmul.f32 %v4231_v4, %v8868_v13  ;;  %v4238_v49 = vmul.f32 %v4227_v30, %v8865_v12  ;;  %5444 = vperm.xlu1 %8510, %v5438_v62   ;;  %v4176_v40 = vpop.permute.xlu0 %4175  ;;  %v7716_v62 = vld [vmem:[%s11271_s13 + $0x28] sm:$0xff] }
 0x8bc   : > { %v8094_v31 = vpack.c.bf16 %v4239_v56, %v4237_v10  ;;  %v4174_v11 = vpop.permute.xlu1 %4173  ;;  %5459 = vperm.xlu0 %8509, %v5441_v55   ;;  %v8092_v7 = vpack.c.bf16 %v4240_v2, %v4238_v49  ;;  %v7717_v10 = vld [vmem:[%s11271_s13 + $0x30] sm:$0xff] }
 0x8be   : > { %5454 = vperm.xlu1 %8510, %v5440_v39   ;;  %8093 = vmatprep.subr.bf16.mxu0 %v8092_v7  ;;  %v4184_v17 = vpop.permute.xlu0 %4183 }
 0x8bf   : > { %8095 = vmatpush1.bf16.msra.mxu0 %v8094_v31  ;;  %v4190_v29 = vsel %vm814_vm0, %v4176_v40, %v4184_v17  ;;  %v4194_v60 = vsel %vm814_vm0, %v4184_v17, %v4176_v40 }
 0x8c0   : > { %v4199_v28 = vmul.f32 %v4194_v60, %v8874_v15  ;;  %v4200_v23 = vmul.f32 %v4190_v29, %v8871_v14  ;;  %v4182_v21 = vpop.permute.xlu1 %4181  ;;  %5493 = vperm.xlu0 %8509, %v5483_v63   ;;  %v7718_v29 = vld [vmem:[%s11271_s13 + $0x38] sm:$0xff] }
 0x8c1   : > { %v4189_v25 = vsel %vm814_vm0, %v4174_v11, %v4182_v21  ;;  %v4193_v61 = vsel %vm814_vm0, %v4182_v21, %v4174_v11 }
 0x8c2   : > { %v4197_v6 = vmul.f32 %v4193_v61, %v8874_v15  ;;  %v4198_v57 = vmul.f32 %v4189_v25, %v8871_v14  ;;  %5488 = vperm.xlu1 %8510, %v5482_v18   ;;  %7719 = vmatmul.mubr.msk.f32.vlgmr.msra.gmra.mrb[16].mxu0 %vm2059_vm9, %v7715_v22  ;;  %v4180_v3 = vpop.permute.xlu0 %4179  ;;  %v4205_v25 = vld [vmem:[%s11271_s13] sm:$0xff] }
 0x8c3   : > { %4328 = vmatprep.mubr.f32.mxu0 %v11317_v0 }
 0x8c4   : > { %v8098_v56 = vpack.c.bf16 %v4199_v28, %v4197_v6  ;;  %v4178_v2 = vpop.permute.xlu1 %4177  ;;  %5503 = vperm.xlu0 %8509, %v5485_v52   ;;  %v8096_v8 = vpack.c.bf16 %v4200_v23, %v4198_v57 }
 0x8c6   : > { %5498 = vperm.xlu1 %8510, %v5484_v42   ;;  %7720 = vmatmul.mubr.msk.f32.gmra.mrb[18].mxu0 %vm2059_vm9, %v7716_v62  ;;  %v4188_v30 = vpop.permute.xlu0 %4187 }
 0x8c7   : > { %8097 = vmatprep.subr.bf16.mxu0 %v8096_v8  ;;  %v4192_v4 = vsel %vm814_vm0, %v4180_v3, %v4188_v30  ;;  %v4196_v55 = vsel %vm814_vm0, %v4188_v30, %v4180_v3  ;;  %4334 = vmatprep.mubr.f32.mxu0 %v11317_v0 }
 0x8c8   : > { %8099 = vmatpush1.bf16.msra.mxu0 %v8098_v56  ;;  %v4203_v49 = vmul.f32 %v4196_v55, %v8874_v15  ;;  %v4204_v40 = vmul.f32 %v4192_v4, %v8871_v14  ;;  %v4186_v39 = vpop.permute.xlu1 %4185 }
 0x8c9   : > { %v4191_v31 = vsel %vm814_vm0, %v4178_v2, %v4186_v39  ;;  %v4195_v11 = vsel %vm814_vm0, %v4186_v39, %v4178_v2  ;;  %v4206_v2 = vld [vmem:[%s11271_s13 + $0x8] sm:$0xff] }
 0x8ca   : > { %v4201_v7 = vmul.f32 %v4195_v11, %v8874_v15  ;;  %v4202_v63 = vmul.f32 %v4191_v31, %v8871_v14  ;;  %7721 = vmatmul.mubr.msk.f32.gmra.mrb[20].mxu0 %vm2059_vm9, %v7717_v10  ;;  %v4451_v17 = vpop.permute.xlu0 %4450 }
 0x8cb   : > { %4340 = vmatprep.mubr.f32.mxu0 %v11317_v0 }
 0x8cc   : > { %v8102_v60 = vpack.c.bf16 %v4203_v49, %v4201_v7  ;;  %v4449_v18 = vpop.permute.xlu1 %4448  ;;  %v8100_v22 = vpack.c.bf16 %v4204_v40, %v4202_v63  ;;  %v4207_v40 = vld [vmem:[%s11271_s13 + $0x10] sm:$0xff] }
 0x8ce   : > { %7722 = vmatmul.mubr.msk.f32.gmra.mrb[22].mxu0 %vm2059_vm9, %v7718_v29  ;;  %8101 = vmatprep.subr.bf16.mxu0 %v8100_v22  ;;  %v4459_v28 = vpop.permute.xlu0 %4458 }
 0x8cf   : > { %8103 = vmatpush1.bf16.msra.mxu0 %v8102_v60  ;;  %v4465_v23 = vsel %vm1069_vm2, %v4451_v17, %v4459_v28  ;;  %v4469_v21 = vsel %vm1069_vm2, %v4459_v28, %v4451_v17  ;;  %4423 = vmatprep.mubr.f32.mxu0 %v11317_v0 }
 0x8d0   : > { %v4474_v61 = vmul.f32 %v4469_v21, %v8941_v46  ;;  %v4475_v52 = vmul.f32 %v4465_v23, %v8892_v26  ;;  %v4457_v6 = vpop.permute.xlu1 %4456 }
 0x8d1   : > { %v4464_v57 = vsel %vm1069_vm2, %v4449_v18, %v4457_v6  ;;  %v4468_v3 = vsel %vm1069_vm2, %v4457_v6, %v4449_v18  ;;  %v4208_v18 = vld [vmem:[%s11271_s13 + $0x18] sm:$0xff] }
 0x8d2   : > { %v4472_v42 = vmul.f32 %v4468_v3, %v8941_v46  ;;  %v4473_v62 = vmul.f32 %v4464_v57, %v8892_v26  ;;  %7723 = vmatmul.mubr.msk.f32.vlgmr.msra.gmra.mrb[16].mxu0 %vm2059_vm9, %v4205_v25  ;;  %v4455_v56 = vpop.permute.xlu0 %4454 }
 0x8d3   : > { %4429 = vmatprep.mubr.f32.mxu0 %v11317_v0 }
 0x8d4   : > { %v8106_v8 = vpack.c.bf16 %v4474_v61, %v4472_v42  ;;  %v4453_v30 = vpop.permute.xlu1 %4452  ;;  %v8104_v4 = vpack.c.bf16 %v4475_v52, %v4473_v62  ;;  %v7727_v52 = vld [vmem:[%s11271_s13 + $0x40] sm:$0xff] }
 0x8d6   : > { %7724 = vmatmul.mubr.msk.f32.gmra.mrb[18].mxu0 %vm2059_vm9, %v4206_v2  ;;  %8105 = vmatprep.subr.bf16.mxu0 %v8104_v4  ;;  %v4463_v55 = vpop.permute.xlu0 %4462 }
 0x8d7   : > { %8107 = vmatpush1.bf16.msra.mxu0 %v8106_v8  ;;  %v4467_v10 = vsel %vm1069_vm2, %v4455_v56, %v4463_v55  ;;  %v4471_v49 = vsel %vm1069_vm2, %v4463_v55, %v4455_v56  ;;  %4435 = vmatprep.mubr.f32.mxu0 %v11317_v0 }
 0x8d8   : > { %v4478_v39 = vmul.f32 %v4471_v49, %v8941_v46  ;;  %v4479_v31 = vmul.f32 %v4467_v10, %v8892_v26  ;;  %v4461_v11 = vpop.permute.xlu1 %4460 }
 0x8d9   : > { %v4466_v7 = vsel %vm1069_vm2, %v4453_v30, %v4461_v11  ;;  %v4470_v63 = vsel %vm1069_vm2, %v4461_v11, %v4453_v30  ;;  %v7728_v30 = vld [vmem:[%s11271_s13 + $0x48] sm:$0xff] }
 0x8da   : > { %v4476_v17 = vmul.f32 %v4470_v63, %v8941_v46  ;;  %v4477_v29 = vmul.f32 %v4466_v7, %v8892_v26  ;;  %7725 = vmatmul.mubr.msk.f32.gmra.mrb[20].mxu0 %vm2059_vm9, %v4207_v40  ;;  %v4597_v60 = vpop.permute.xlu0 %4596 }
 0x8db   : > { %4441 = vmatprep.mubr.f32.mxu0 %v11317_v0 }
 0x8dc   : > { %v8110_v22 = vpack.c.bf16 %v4478_v39, %v4476_v17  ;;  %v4595_v28 = vpop.permute.xlu1 %4594  ;;  %v8108_v23 = vpack.c.bf16 %v4479_v31, %v4477_v29  ;;  %v7729_v31 = vld [vmem:[%s11271_s13 + $0x50] sm:$0xff] }
 0x8de   : > { %7726 = vmatmul.mubr.msk.f32.gmra.mrb[22].mxu0 %vm2059_vm9, %v4208_v18  ;;  %8109 = vmatprep.subr.bf16.mxu0 %v8108_v23  ;;  %v4605_v21 = vpop.permute.xlu0 %4604 }
 0x8df   : > { %8111 = vmatpush1.bf16.msra.mxu0 %v8110_v22  ;;  %v4611_v25 = vsel %vm1205_vm4, %v4597_v60, %v4605_v21  ;;  %v4615_v61 = vsel %vm1205_vm4, %v4605_v21, %v4597_v60  ;;  %4561 = vmatprep.mubr.f32.mxu0 %v11317_v0 }
 0x8e0   : > { %v4620_v6 = vmul.f32 %v4615_v61, %v9009_v16  ;;  %v4621_v57 = vmul.f32 %v4611_v25, %v8946_v48  ;;  %v4603_v3 = vpop.permute.xlu1 %4602 }
 0x8e1   : > { %v4610_v42 = vsel %vm1205_vm4, %v4595_v28, %v4603_v3  ;;  %v4614_v62 = vsel %vm1205_vm4, %v4603_v3, %v4595_v28  ;;  %v7730_v28 = vld [vmem:[%s11271_s13 + $0x58] sm:$0xff] }
 0x8e2   : > { %v4618_v56 = vmul.f32 %v4614_v62, %v9009_v16  ;;  %v4619_v2 = vmul.f32 %v4610_v42, %v8946_v48  ;;  %7731 = vmatmul.mubr.msk.f32.vlgmr.msra.gmra.mrb[16].mxu0 %vm2059_vm9, %v7727_v52  ;;  %v4601_v8 = vpop.permute.xlu0 %4600  ;;  %v8120_v52 = vpack.c.bf16 %v9969_v27, %v9974_v9  ;;  %v8122_v62 = vpack.c.bf16 %v9962_v33, %v9964_v50 }
 0x8e3   : > { %4567 = vmatprep.mubr.f32.mxu0 %v11317_v0  ;;  %v8126_v33 = vpack.c.bf16 %v9978_v19, %v9982_v53 }
 0x8e4   : > { %v8114_v4 = vpack.c.bf16 %v4620_v6, %v4618_v56  ;;  %v4599_v55 = vpop.permute.xlu1 %4598  ;;  %v8112_v10 = vpack.c.bf16 %v4621_v57, %v4619_v2  ;;  %v7735_v57 = vld [vmem:[%s11271_s13 + $0x60] sm:$0xff]  ;;  %v8124_v2 = vpack.c.bf16 %v9986_v36, %v9990_v20  ;;  %v7737_v36 = vld [vmem:[%s11271_s13 + $0x70] sm:$0xff] }
 0x8e6   : > { %7732 = vmatmul.mubr.msk.f32.gmra.mrb[18].mxu0 %vm2059_vm9, %v7728_v30  ;;  %8113 = vmatprep.subr.bf16.mxu0 %v8112_v10  ;;  %v4609_v49 = vpop.permute.xlu0 %4608 }
 0x8e7   : > { %8115 = vmatpush1.bf16.msra.mxu0 %v8114_v4  ;;  %v4613_v40 = vsel %vm1205_vm4, %v4601_v8, %v4609_v49  ;;  %v4617_v39 = vsel %vm1205_vm4, %v4609_v49, %v4601_v8  ;;  %4573 = vmatprep.mubr.f32.mxu0 %v11317_v0  ;;  %v7736_v8 = vld [vmem:[%s11271_s13 + $0x68] sm:$0xff] }
 0x8e8   : > { %v4624_v11 = vmul.f32 %v4617_v39, %v9009_v16  ;;  %v4625_v7 = vmul.f32 %v4613_v40, %v8946_v48  ;;  %v4607_v63 = vpop.permute.xlu1 %4606  ;;  %v7738_v40 = vld [vmem:[%s11271_s13 + $0x78] sm:$0xff] }
 0x8e9   : > { %v4612_v17 = vsel %vm1205_vm4, %v4599_v55, %v4607_v63  ;;  %v4616_v29 = vsel %vm1205_vm4, %v4607_v63, %v4599_v55 }
 0x8ea   : > { %v4622_v60 = vmul.f32 %v4616_v29, %v9009_v16  ;;  %v4623_v18 = vmul.f32 %v4612_v17, %v8946_v48  ;;  %7733 = vmatmul.mubr.msk.f32.gmra.mrb[20].mxu0 %vm2059_vm9, %v7729_v31  ;;  %v4857_v22 = vpop.permute.xlu0 %4856 }
 0x8eb   : > { %4579 = vmatprep.mubr.f32.mxu0 %v11317_v0 }
 0x8ec   : > { %v8118_v23 = vpack.c.bf16 %v4624_v11, %v4622_v60  ;;  %v4855_v21 = vpop.permute.xlu1 %4854  ;;  %v8116_v25 = vpack.c.bf16 %v4625_v7, %v4623_v18 }
 0x8ee   : > { %7734 = vmatmul.mubr.msk.f32.gmra.mrb[22].mxu0 %vm2059_vm9, %v7730_v28  ;;  %8117 = vmatprep.subr.bf16.mxu0 %v8116_v25  ;;  %v4865_v61 = vpop.permute.xlu0 %4864 }
 0x8ef   : > { %8119 = vmatpush1.bf16.msra.mxu0 %v8118_v23  ;;  %v4875_v6 = vsel %vm1455_vm6, %v4865_v61, %v4857_v22  ;;  %4707 = vmatprep.mubr.f32.mxu0 %v11317_v0  ;;  %v4871_v55 = vsel %vm1455_vm6, %v4857_v22, %v4865_v61  ;;  %v7743_v22 = vld [vmem:[%s11271_s13 + $0x80] sm:$0xff] }
 0x8f0   : > { %v4863_v3 = vpop.permute.xlu1 %4862  ;;  %8121 = vmatprep.subr.bf16.mxu0 %v8120_v52  ;;  %v4881_v27 = vmul.f32 %v4875_v6, %v9047_v24  ;;  %v4880_v31 = vmul.f32 %v4871_v55, %v9080_v32 }
 0x8f1   : > { %v4874_v42 = vsel %vm1455_vm6, %v4863_v3, %v4855_v21  ;;  %v4870_v10 = vsel %vm1455_vm6, %v4855_v21, %v4863_v3 }
 0x8f2   : > { %v4879_v9 = vmul.f32 %v4874_v42, %v9047_v24  ;;  %7739 = vmatmul.mubr.msk.f32.vlgmr.msra.gmra.mrb[16].mxu0 %vm2059_vm9, %v7735_v57  ;;  %v4861_v56 = vpop.permute.xlu0 %4860  ;;  %v4878_v11 = vmul.f32 %v4870_v10, %v9080_v32  ;;  %v7744_v42 = vld [vmem:[%s11271_s13 + $0x88] sm:$0xff] }
 0x8f3   : > { %8123 = vmatpush1.bf16.msra.mxu0 %v8122_v62  ;;  %4713 = vmatprep.mubr.f32.mxu0 %v11317_v0 }
 0x8f4   : > { %v4859_v30 = vpop.permute.xlu1 %4858  ;;  %8125 = vmatprep.subr.bf16.mxu0 %v8124_v2  ;;  %v8128_v4 = vpack.c.bf16 %v4881_v27, %v4879_v9  ;;  %v8130_v21 = vpack.c.bf16 %v4880_v31, %v4878_v11  ;;  %v7745_v2 = vld [vmem:[%s11271_s13 + $0x90] sm:$0xff] }
 0x8f6   : > { %7740 = vmatmul.mubr.msk.f32.gmra.mrb[18].mxu0 %vm2059_vm9, %v7736_v8  ;;  %v4869_v50 = vpop.permute.xlu0 %4868 }
 0x8f7   : > { %8127 = vmatpush1.bf16.msra.mxu0 %v8126_v33  ;;  %4719 = vmatprep.mubr.f32.mxu0 %v11317_v0  ;;  %v4877_v53 = vsel %vm1455_vm6, %v4869_v50, %v4861_v56  ;;  %v4873_v7 = vsel %vm1455_vm6, %v4861_v56, %v4869_v50 }
 0x8f8   : > { %v4867_v20 = vpop.permute.xlu1 %4866  ;;  %8129 = vmatprep.subr.bf16.mxu0 %v8128_v4  ;;  %v4885_v63 = vmul.f32 %v4877_v53, %v9047_v24  ;;  %v4884_v25 = vmul.f32 %v4873_v7, %v9080_v32  ;;  %v7751_v7 = vld [vmem:[%s11271_s13 + $0xa0] sm:$0xff] }
 0x8f9   : > { %v4876_v49 = vsel %vm1455_vm6, %v4867_v20, %v4859_v30  ;;  %v4872_v17 = vsel %vm1455_vm6, %v4859_v30, %v4867_v20  ;;  %v7746_v20 = vld [vmem:[%s11271_s13 + $0x98] sm:$0xff] }
 0x8fa   : > { %7741 = vmatmul.mubr.msk.f32.gmra.mrb[20].mxu0 %vm2059_vm9, %v7737_v36  ;;  %v5003_v19 = vpop.permute.xlu0 %5002  ;;  %v4883_v29 = vmul.f32 %v4876_v49, %v9047_v24  ;;  %v4882_v61 = vmul.f32 %v4872_v17, %v9080_v32 }
 0x8fb   : > { %4725 = vmatprep.mubr.f32.mxu0 %v11317_v0 }
 0x8fc   : > { %v5001_v39 = vpop.permute.xlu1 %5000  ;;  %v8132_v57 = vpack.c.bf16 %v4885_v63, %v4883_v29  ;;  %v8134_v9 = vpack.c.bf16 %v4884_v25, %v4882_v61  ;;  %v7752_v25 = vld [vmem:[%s11271_s13 + $0xa8] sm:$0xff] }
 0x8fe   : > { %7742 = vmatmul.mubr.msk.f32.gmra.mrb[22].mxu0 %vm2059_vm9, %v7738_v40  ;;  %v5011_v60 = vpop.permute.xlu0 %5010 }
 0x8ff   : > { %v5021_v18 = vsel %vm1591_vm7, %v5011_v60, %v5003_v19  ;;  %4821 = vmatprep.mubr.f32.mxu0 %v11317_v0  ;;  %v5017_v30 = vsel %vm1591_vm7, %v5003_v19, %v5011_v60 }
 0x900   : > { %v5027_v28 = vmul.f32 %v5021_v18, %v9087_v34  ;;  %v5009_v23 = vpop.permute.xlu1 %5008  ;;  %v5026_v10 = vmul.f32 %v5017_v30, %v9120_v43 }
 0x901   : > { %v5020_v52 = vsel %vm1591_vm7, %v5009_v23, %v5001_v39  ;;  %v5016_v33 = vsel %vm1591_vm7, %v5001_v39, %v5009_v23 }
 0x902   : > { %v5025_v6 = vmul.f32 %v5020_v52, %v9087_v34  ;;  %7747 = vmatmul.mubr.msk.f32.vlgmr.msra.gmra.mrb[16].mxu0 %vm2059_vm9, %v7743_v22  ;;  %v5007_v3 = vpop.permute.xlu0 %5006  ;;  %v5024_v19 = vmul.f32 %v5016_v33, %v9120_v43 }
 0x903   : > { %8131 = vmatpush1.bf16.msra.mxu0 %v8130_v21  ;;  %4827 = vmatprep.mubr.f32.mxu0 %v11317_v0 }
 0x904   : > { %8133 = vmatprep.subr.bf16.mxu0 %v8132_v57  ;;  %v5005_v62 = vpop.permute.xlu1 %5004  ;;  %v8136_v27 = vpack.c.bf16 %v5027_v28, %v5025_v6  ;;  %v8138_v29 = vpack.c.bf16 %v5026_v10, %v5024_v19 }
 0x906   : > { %7748 = vmatmul.mubr.msk.f32.gmra.mrb[18].mxu0 %vm2059_vm9, %v7744_v42  ;;  %v5015_v56 = vpop.permute.xlu0 %5014 }
 0x907   : > { %8135 = vmatpush1.bf16.msra.mxu0 %v8134_v9  ;;  %4833 = vmatprep.mubr.f32.mxu0 %v11317_v0  ;;  %v5023_v4 = vsel %vm1591_vm7, %v5015_v56, %v5007_v3  ;;  %v5019_v53 = vsel %vm1591_vm7, %v5007_v3, %v5015_v56  ;;  %v7753_v3 = vld [vmem:[%s11271_s13 + $0xb0] sm:$0xff] }
 0x908   : > { %8137 = vmatprep.subr.bf16.mxu0 %v8136_v27  ;;  %v5013_v8 = vpop.permute.xlu1 %5012  ;;  %v5031_v49 = vmul.f32 %v5023_v4, %v9087_v34  ;;  %v5030_v60 = vmul.f32 %v5019_v53, %v9120_v43  ;;  %v7759_v53 = vld [vmem:[%s11271_s13 + $0xc0] sm:$0xff] }
 0x909   : > { %v5022_v36 = vsel %vm1591_vm7, %v5013_v8, %v5005_v62  ;;  %v5018_v40 = vsel %vm1591_vm7, %v5005_v62, %v5013_v8  ;;  %v7754_v8 = vld [vmem:[%s11271_s13 + $0xb8] sm:$0xff] }
 0x90a   : > { %7749 = vmatmul.mubr.msk.f32.gmra.mrb[20].mxu0 %vm2059_vm9, %v7745_v2  ;;  %v5149_v50 = vpop.permute.xlu0 %5148  ;;  %v5029_v39 = vmul.f32 %v5022_v36, %v9087_v34  ;;  %v5028_v18 = vmul.f32 %v5018_v40, %v9120_v43 }
 0x90b   : > { %4839 = vmatprep.mubr.f32.mxu0 %v11317_v0 }
 0x90c   : > { %v5147_v55 = vpop.permute.xlu1 %5146  ;;  %v8140_v23 = vpack.c.bf16 %v5031_v49, %v5029_v39  ;;  %v8142_v6 = vpack.c.bf16 %v5030_v60, %v5028_v18  ;;  %v7760_v60 = vld [vmem:[%s11271_s13 + $0xc8] sm:$0xff] }
 0x90e   : > { %7750 = vmatmul.mubr.msk.f32.gmra.mrb[22].mxu0 %vm2059_vm9, %v7746_v20  ;;  %v5157_v31 = vpop.permute.xlu0 %5156 }
 0x90f   : > { %v5167_v11 = vsel %vm1727_vm8, %v5157_v31, %v5149_v50  ;;  %4967 = vmatprep.mubr.f32.mxu0 %v11317_v0  ;;  %v5163_v62 = vsel %vm1727_vm8, %v5149_v50, %v5157_v31 }
 0x910   : > { %v5173_v63 = vmul.f32 %v5167_v11, %v9127_v45  ;;  %v5155_v17 = vpop.permute.xlu1 %5154  ;;  %v5172_v33 = vmul.f32 %v5163_v62, %v9156_v54 }
 0x911   : > { %v5166_v22 = vsel %vm1727_vm8, %v5155_v17, %v5147_v55  ;;  %v5162_v27 = vsel %vm1727_vm8, %v5147_v55, %v5155_v17 }
 0x912   : > { %v5171_v28 = vmul.f32 %v5166_v22, %v9127_v45  ;;  %7755 = vmatmul.mubr.msk.f32.vlgmr.msra.gmra.mrb[16].mxu0 %vm2059_vm9, %v7751_v7  ;;  %v5153_v21 = vpop.permute.xlu0 %5152  ;;  %v5170_v50 = vmul.f32 %v5162_v27, %v9156_v54 }
 0x913   : > { %8139 = vmatpush1.bf16.msra.mxu0 %v8138_v29  ;;  %4973 = vmatprep.mubr.f32.mxu0 %v11317_v0 }
 0x914   : > { %8141 = vmatprep.subr.bf16.mxu0 %v8140_v23  ;;  %v5151_v61 = vpop.permute.xlu1 %5150  ;;  %v8144_v52 = vpack.c.bf16 %v5173_v63, %v5171_v28  ;;  %v8146_v39 = vpack.c.bf16 %v5172_v33, %v5170_v50  ;;  %v7761_v23 = vld [vmem:[%s11271_s13 + $0xd0] sm:$0xff] }
 0x916   : > { %7756 = vmatmul.mubr.msk.f32.gmra.mrb[18].mxu0 %vm2059_vm9, %v7752_v25  ;;  %v5161_v57 = vpop.permute.xlu0 %5160 }
 0x917   : > { %8143 = vmatpush1.bf16.msra.mxu0 %v8142_v6  ;;  %4979 = vmatprep.mubr.f32.mxu0 %v11317_v0  ;;  %v5169_v56 = vsel %vm1727_vm8, %v5161_v57, %v5153_v21  ;;  %v5165_v4 = vsel %vm1727_vm8, %v5153_v21, %v5161_v57 }
 0x918   : > { %8145 = vmatprep.subr.bf16.mxu0 %v8144_v52  ;;  %v5159_v42 = vpop.permute.xlu1 %5158  ;;  %v5177_v36 = vmul.f32 %v5169_v56, %v9127_v45  ;;  %v5176_v31 = vmul.f32 %v5165_v4, %v9156_v54 }
 0x919   : > { %v5168_v2 = vsel %vm1727_vm8, %v5159_v42, %v5151_v61  ;;  %v5164_v20 = vsel %vm1727_vm8, %v5151_v61, %v5159_v42 }
 0x91a   : > { %7757 = vmatmul.mubr.msk.f32.gmra.mrb[20].mxu0 %vm2059_vm9, %v7753_v3  ;;  %v5295_v9 = vpop.permute.xlu0 %5294  ;;  %v5175_v55 = vmul.f32 %v5168_v2, %v9127_v45  ;;  %v5174_v11 = vmul.f32 %v5164_v20, %v9156_v54  ;;  %v7762_v3 = vld [vmem:[%s11271_s13 + $0xd8] sm:$0xff] }
 0x91b   : > { %4985 = vmatprep.mubr.f32.mxu0 %v11317_v0 }
 0x91c   : > { %v5293_v30 = vpop.permute.xlu1 %5292  ;;  %v8148_v17 = vpack.c.bf16 %v5177_v36, %v5175_v55  ;;  %v8150_v28 = vpack.c.bf16 %v5176_v31, %v5174_v11  ;;  %v7768_v36 = vld [vmem:[%s11271_s13 + $0xe8] sm:$0xff]  ;;  %v7769_v55 = vld [vmem:[%s11271_s13 + $0xf0] sm:$0xff]  ;;  %v5611_v11 = vld [vmem:[%s11275_s17 + $0x18] sm:$0xff] }
 0x91d   : > { %v5610_v31 = vld [vmem:[%s11275_s17 + $0x10] sm:$0xff] }
 0x91e   : > { %7758 = vmatmul.mubr.msk.f32.gmra.mrb[22].mxu0 %vm2059_vm9, %v7754_v8  ;;  %v5303_v10 = vpop.permute.xlu0 %5302  ;;  %v7767_v8 = vld [vmem:[%s11271_s13 + $0xe0] sm:$0xff] }
 0x91f   : > { %v5313_v19 = vsel %vm1863_vm5, %v5303_v10, %v5295_v9  ;;  %5113 = vmatprep.mubr.f32.mxu0 %v11317_v0  ;;  %v5309_v61 = vsel %vm1863_vm5, %v5295_v9, %v5303_v10  ;;  %v8665_v10 = vmov 0.0|0.0  }
 0x920   : > { %v5319_v49 = vmul.f32 %v5313_v19, %v8976_v59  ;;  %v5301_v40 = vpop.permute.xlu1 %5300  ;;  %v5318_v42 = vmul.f32 %v5309_v61, %v8973_v58  ;;  %v7770_v19 = vld [vmem:[%s11271_s13 + $0xf8] sm:$0xff] }
 0x921   : > { %v5312_v7 = vsel %vm1863_vm5, %v5301_v40, %v5293_v30  ;;  %v5308_v52 = vsel %vm1863_vm5, %v5293_v30, %v5301_v40  ;;  %v7775_v40 = vld [vmem:[%s11271_s13 + $0x100] sm:$0xff] }
 0x922   : > { %v5317_v63 = vmul.f32 %v5312_v7, %v8976_v59  ;;  %7763 = vmatmul.mubr.msk.f32.vlgmr.msra.gmra.mrb[16].mxu0 %vm2059_vm9, %v7759_v53  ;;  %v5299_v29 = vpop.permute.xlu0 %5298  ;;  %v5316_v62 = vmul.f32 %v5308_v52, %v8973_v58  ;;  %v5608_v53 = vld [vmem:[%s11275_s17] sm:$0xff]  ;;  %v7776_v7 = vld [vmem:[%s11271_s13 + $0x108] sm:$0xff] }
 0x923   : > { %8147 = vmatpush1.bf16.msra.mxu0 %v8146_v39  ;;  %5119 = vmatprep.mubr.f32.mxu0 %v11317_v0 }
 0x924   : > { %8149 = vmatprep.subr.bf16.mxu0 %v8148_v17  ;;  %v5297_v18 = vpop.permute.xlu1 %5296  ;;  %v8152_v22 = vpack.c.bf16 %v5319_v49, %v5317_v63  ;;  %v8154_v30 = vpack.c.bf16 %v5318_v42, %v5316_v62  ;;  %v5609_v49 = vld [vmem:[%s11275_s17 + $0x8] sm:$0xff]  ;;  %v8172_v63 = vpack.c.bf16 %v5611_v11, %v5610_v31  ;;  %v7777_v17 = vld [vmem:[%s11271_s13 + $0x110] sm:$0xff] }
 0x925   : > { %v8169_v39 = vpack.c.bf16 %v5609_v49, %v5608_v53  ;;  %v5950_v11 = vld [vmem:[%s11278_s20 + $0x10] sm:$0xff] }
 0x926   : > { %7764 = vmatmul.mubr.msk.f32.gmra.mrb[18].mxu0 %vm2059_vm9, %v7760_v60  ;;  %v5307_v21 = vpop.permute.xlu0 %5306  ;;  %v5607_v60 = vld [vmem:[%s796_s24] sm:$0xff] }
 0x927   : > { %8151 = vmatpush1.bf16.msra.mxu0 %v8150_v28  ;;  %5125 = vmatprep.mubr.f32.mxu0 %v11317_v0  ;;  %v5315_v6 = vsel %vm1863_vm5, %v5307_v21, %v5299_v29  ;;  %v5311_v27 = vsel %vm1863_vm5, %v5299_v29, %v5307_v21  ;;  %v7778_v29 = vld [vmem:[%s11271_s13 + $0x118] sm:$0xff] }
 0x928   : > { %8153 = vmatprep.subr.bf16.mxu0 %v8152_v22  ;;  %v5305_v25 = vpop.permute.xlu1 %5304  ;;  %v5323_v9 = vmul.f32 %v5315_v6, %v8976_v59  ;;  %v5322_v33 = vmul.f32 %v5311_v27, %v8973_v58 }
 0x929   : > { %v5314_v57 = vsel %vm1863_vm5, %v5305_v25, %v5297_v18  ;;  %v5310_v56 = vsel %vm1863_vm5, %v5297_v18, %v5305_v25 }
 0x92a   : > { %7765 = vmatmul.mubr.msk.f32.gmra.mrb[20].mxu0 %vm2059_vm9, %v7761_v23  ;;  %v5321_v2 = vmul.f32 %v5314_v57, %v8976_v59  ;;  %v5320_v50 = vmul.f32 %v5310_v56, %v8973_v58 }
 0x92b   : > { %5131 = vmatprep.mubr.f32.mxu0 %v11317_v0 }
 0x92c   : > { %v8156_v4 = vpack.c.bf16 %v5323_v9, %v5321_v2  ;;  %v8158_v20 = vpack.c.bf16 %v5322_v33, %v5320_v50 }
 0x92e   : > { %7766 = vmatmul.mubr.msk.f32.gmra.mrb[22].mxu0 %vm2059_vm9, %v7762_v3 }
 0x92f   : > { %5259 = vmatprep.mubr.f32.mxu0 %v11317_v0 }
 0x932   : > { %7771 = vmatmul.mubr.msk.f32.vlgmr.msra.gmra.mrb[16].mxu0 %vm2059_vm9, %v7767_v8 }
 0x933   : > { %8155 = vmatpush1.bf16.msra.mxu0 %v8154_v30  ;;  %5265 = vmatprep.mubr.f32.mxu0 %v11317_v0 }
 0x934   : > { %8157 = vmatprep.subr.bf16.mxu0 %v8156_v4 }
 0x936   : > { %7772 = vmatmul.mubr.msk.f32.gmra.mrb[18].mxu0 %vm2059_vm9, %v7768_v36 }
 0x937   : > { %8159 = vmatpush1.bf16.msra.mxu0 %v8158_v20  ;;  %5271 = vmatprep.mubr.f32.mxu0 %v11317_v0  ;;  %v5450_v23 = vpop.permute.xlu0 %5449 }
 0x938   : > { %8168 = vmatprep.subr.bf16.mxu0 %v8665_v10 }
 0x939   : > { %v5445_v28 = vpop.permute.xlu1 %5444 }
 0x93a   : > { %7773 = vmatmul.mubr.msk.f32.gmra.mrb[20].mxu0 %vm2059_vm9, %v7769_v55 }
 0x93b   : > { %5277 = vmatprep.mubr.f32.mxu0 %v11317_v0 }
 0x93d   : > { %v5455_v8 = vpop.permute.xlu1 %5454 }
 0x93e   : > { %7774 = vmatmul.mubr.msk.f32.gmra.mrb[22].mxu0 %vm2059_vm9, %v7770_v19 }
 0x93f   : > { %5405 = vmatprep.mubr.f32.mxu0 %v11317_v0 }
 0x942   : > { %7779 = vmatmul.mubr.msk.f32.vlgmr.msra.gmra.mrb[16].mxu0 %vm2059_vm9, %v7775_v40 }
 0x943   : > { %5411 = vmatprep.mubr.f32.mxu0 %v11317_v0  ;;  %8170 = vmatpush3.bf16.msra.mxu0 %v8169_v39 }
 0x944   : > { %8171 = vmatprep.subr.bf16.mxu0 %v8665_v10 }
 0x946   : > { %7780 = vmatmul.mubr.msk.f32.gmra.mrb[18].mxu0 %vm2059_vm9, %v7776_v7  ;;  %v5480_v7 = vld [vmem:[%s11273_s15 + $0x10] sm:$0xff] }
 0x947   : > { %5417 = vmatprep.mubr.f32.mxu0 %v11317_v0  ;;  %8173 = vmatpush3.bf16.msra.mxu0 %v8172_v63  ;;  %v5951_v63 = vld [vmem:[%s11278_s20 + $0x18] sm:$0xff] }
 0x94a   : > { %7781 = vmatmul.mubr.msk.f32.gmra.mrb[20].mxu0 %vm2059_vm9, %v7777_v17  ;;  %v5481_v17 = vld [vmem:[%s11273_s15 + $0x18] sm:$0xff] }
 0x94b   : > { %5423 = vmatprep.mubr.f32.mxu0 %v11317_v0 }
 0x94e   : > { %7782 = vmatmul.mubr.msk.f32.gmra.mrb[22].mxu0 %vm2059_vm9, %v7778_v29  ;;  %v5489_v29 = vpop.permute.xlu1 %5488 }
 0x94f   : > { %7953 = vmatprep.mubr.msk.f32.mxu0 %vm8666_vm10, %v11317_v0 }
 0x952   : > { %7954 = vmatmul.mubr.msk.f32.vlgmr.msra.gmra.mrb[24].mxu0 %vm2059_vm9, %v5607_v60  ;;  %v5499_v60 = vpop.permute.xlu1 %5498 }
 0xa15   : > { %v5407_v18 = vpop.f32.mrb[16].mxu0 }
 0xa16   : > { %v5409_v22 = vpop.f32.mrb[17].mxu0  ;;  %v5462_v61 = vadd.f32 %v5445_v28, %v5407_v18 }
 0xa17   : > { %v5463_v21 = vadd.f32 %v5445_v28, %v5409_v22 }
 0xa18   : > { %v10541_v9 = vadd.f32 %v5462_v61, %v9216_v1  ;;  %v7787_v1 = vld [vmem:[%s11276_s18] ss:$0 sm:$0xff] }
 0xa19   : > { %v5413_v25 = vpop.f32.mrb[18].mxu0  ;;  %v10535_v42 = vadd.f32 %v5463_v21, %v9218_v35 }
 0xa1a   : > { %v5464_v52 = vadd.f32 %v5450_v23, %v5413_v25  ;;  %v5415_v6 = vpop.f32.mrb[19].mxu0 }
 0xa1b   : > { %v5465_v57 = vadd.f32 %v5450_v23, %v5415_v6 }
 0xa1c   : > { %v10532_v3 = vadd.f32 %v5464_v52, %v9226_v41  ;;  %v5460_v41 = vpop.permute.xlu0 %5459 }
 0xa1d   : > { %v10538_v62 = vadd.f32 %v5465_v57, %v9228_v44  ;;  %v5419_v27 = vpop.f32.mrb[20].mxu0 }
 0xa1e   : > { %v5421_v56 = vpop.f32.mrb[21].mxu0  ;;  %v8162_v30 = vpack.c.bf16 %v10532_v3, %v10541_v9  ;;  %v5466_v35 = vadd.f32 %v5455_v8, %v5419_v27 }
 0xa1f   : > { %v8160_v2 = vpack.c.bf16 %v10538_v62, %v10535_v42  ;;  %v5467_v33 = vadd.f32 %v5455_v8, %v5421_v56 }
 0xa20   : > { %v10560_v53 = vadd.f32 %v5466_v35, %v9230_v47  ;;  %v5949_v47 = vld [vmem:[%s11278_s20 + $0x8] sm:$0xff]  ;;  %v5494_v23 = vpop.permute.xlu0 %5493 }
 0xa21   : > { %v5425_v50 = vpop.f32.mrb[22].mxu0  ;;  %8161 = vmatprep.subr.bf16.mxu1 %v8160_v2  ;;  %v10554_v55 = vadd.f32 %v5467_v33, %v9232_v51  ;;  %v5479_v51 = vld [vmem:[%s11273_s15 + $0x8] sm:$0xff] }
 0xa22   : > { %v5468_v4 = vadd.f32 %v5460_v41, %v5425_v50  ;;  %v5427_v44 = vpop.f32.mrb[23].mxu0  ;;  %8163 = vmatpush1.bf16.msra.mxu1 %v8162_v30 }
 0xa23   : > { %v5469_v36 = vadd.f32 %v5460_v41, %v5427_v44 }
 0xa24   : > { %v10551_v20 = vadd.f32 %v5468_v4, %v9220_v37  ;;  %v5948_v37 = vld [vmem:[%s11278_s20] sm:$0xff]  ;;  %v5504_v30 = vpop.permute.xlu0 %5503 }
 0xa25   : > { %v10557_v10 = vadd.f32 %v5469_v36, %v9222_v38  ;;  %v5688_v19 = vpop.f32.mrb[24].mxu0  ;;  %v5478_v38 = vld [vmem:[%s11273_s15] sm:$0xff] }
 0xa26   : > { %v5689_v49 = vadd.f32 %v7787_v1, %v5688_v19  ;;  %v7955_v40 = vpop.f32.mrb[25].mxu0  ;;  %v8166_v31 = vpack.c.bf16 %v10551_v20, %v10560_v53 }
 0xa27   : > { %v8164_v39 = vpack.c.bf16 %v10557_v10, %v10554_v55 }
 0xa28   : > { %5798 = vrot.lane.b32.xlu1 %v5689_v49, %s8667_s8 }
 0xa29   : > { %8165 = vmatprep.subr.bf16.mxu1 %v8164_v39 }
 0xa2a   : > { %8167 = vmatpush1.bf16.msra.mxu1 %v8166_v31 }
 0xa2c   : > { %5954 = vperm.xlu1 %8510, %v5948_v37  }
 0xa2d   : > { %7783 = vmatmul.mubr.msk.f32.vlgmr.msra.gmra.mrb[20].mxu1 %vm2059_vm9, %v5478_v38 }
 0xa2e   : > { %5588 = vmatprep.mubr.f32.mxu1 %v11317_v0 }
 0xa30   : > { %5959 = vperm.xlu1 %8510, %v5949_v47  }
 0xa31   : > { %7784 = vmatmul.mubr.msk.f32.gmra.mrb[22].mxu1 %vm2059_vm9, %v5479_v51 }
 0xa32   : > { %5594 = vmatprep.mubr.f32.mxu1 %v11317_v0 }
 0xa34   : > { %5964 = vperm.xlu1 %8510, %v5950_v11  }
 0xa35   : > { %7785 = vmatmul.mubr.msk.f32.gmra.mrb[24].mxu1 %vm2059_vm9, %v5480_v7 }
 0xa36   : > { %5600 = vmatprep.mubr.f32.mxu1 %v11317_v0 }
 0xa38   : > { %5969 = vperm.xlu1 %8510, %v5951_v63  }
 0xa39   : > { %7786 = vmatmul.mubr.msk.f32.gmra.mrb[26].mxu1 %vm2059_vm9, %v5481_v17 }
 0xa3a   : > { %5759 = vmatprep.mubr.f32.mxu1 %v11317_v0 }
 0xa9a   : > { %v5799_v18 = vpop.permute.xlu1 %5798 }
 0xa9b   : > { %5801 = vxpose.xlu0.b32.start.end [1/1] (short) (narrow) %v5799_v18, 32 }
 0xb00   : > { %v5584_v22 = vpop.f32.mrb[20].mxu1 }
 0xb01   : > { %v5586_v28 = vpop.f32.mrb[21].mxu1  ;;  %v5585_v25 = vadd.f32 %v5584_v22, %v5489_v29 }
 0xb02   : > { %v5587_v6 = vadd.f32 %v5586_v28, %v5489_v29 }
 0xb04   : > { %v5590_v21 = vpop.f32.mrb[22].mxu1 }
 0xb05   : > { %v5591_v61 = vadd.f32 %v5590_v21, %v5494_v23  ;;  %v5592_v52 = vpop.f32.mrb[23].mxu1 }
 0xb06   : > { %v5593_v57 = vadd.f32 %v5592_v52, %v5494_v23 }
 0xb07   : > { %v8176_v27 = vpack.c.bf16 %v5591_v61, %v5585_v25 }
 0xb08   : > { %v8174_v56 = vpack.c.bf16 %v5593_v57, %v5587_v6  ;;  %v5596_v2 = vpop.f32.mrb[24].mxu1 }
 0xb09   : > { %v5598_v8 = vpop.f32.mrb[25].mxu1  ;;  %v5597_v33 = vadd.f32 %v5596_v2, %v5499_v60 }
 0xb0a   : > { %8175 = vmatprep.subr.bf16.mxu1 %v8174_v56  ;;  %v5599_v4 = vadd.f32 %v5598_v8, %v5499_v60 }
 0xb0b   : > { %8177 = vmatpush1.bf16.msra.mxu1 %v8176_v27 }
 0xb0c   : > { %v5602_v41 = vpop.f32.mrb[26].mxu1 }
 0xb0d   : > { %v5603_v50 = vadd.f32 %v5602_v41, %v5504_v30  ;;  %v5604_v35 = vpop.f32.mrb[27].mxu1 }
 0xb0e   : > { %v5605_v44 = vadd.f32 %v5604_v35, %v5504_v30 }
 0xb0f   : > { %v8180_v36 = vpack.c.bf16 %v5603_v50, %v5597_v33 }
 0xb10   : > { %v8178_v1 = vpack.c.bf16 %v5605_v44, %v5599_v4 }
 0xb12   : > { %8179 = vmatprep.subr.bf16.mxu1 %v8178_v1 }
 0xb13   : > { %8181 = vmatpush1.bf16.msra.mxu1 %v8180_v36 }
 0xb16   : > { %7789 = vmatmul.mubr.msk.f32.vlgmr.msra.gmra.mrb[28].mxu1 %vm2059_vm9, %v5689_v49 }
 0xb17   : > { %5909 = vmatprep.mubr.f32.mxu1 %v11317_v0 }
 0xb1b   : > { %v5817_v25 = vpop.trf.xlu0 }
 0xb1f   : > { %v5818_v52 = vpop.trf.xlu0 }
 0xb23   : > { %v5819_v57 = vpop.trf.xlu0 }
 0xb27   : > { %v5820_v27 = vpop.trf.xlu0 }
 0xbe9   : > { %v5761_v19 = vpop.f32.mrb[28].mxu1 }
 0xbea   : > { %v5766_v40 = vmul.f32 0.17677669, %v5761_v19  ;;  %v5763_v39 = vpop.f32.mrb[29].mxu1 }
 0xbeb   : > { %v5767_v31 = vmul.f32 0.17677669, %v5763_v39 }
 0xbec   : > { %v5768_v37 = vrot.slane %v5766_v40, 4 }
 0xbed   : > { %v5774_v38 = vrot.slane %v5767_v31, 4 }
 0xbee   : > { %v5769_v47 = vmax.f32 %v5766_v40, %v5768_v37 }
 0xbef   : > { %v5775_v51 = vmax.f32 %v5767_v31, %v5774_v38 }
 0xbf0   : > { %v5770_v11 = vrot.slane %v5769_v47, 2 }
 0xbf1   : > { %v5776_v7 = vrot.slane %v5775_v51, 2 }
 0xbf2   : > { %v5771_v63 = vmax.f32 %v5769_v47, %v5770_v11 }
 0xbf3   : > { %v5777_v17 = vmax.f32 %v5775_v51, %v5776_v7 }
 0xbf4   : > { %v5772_v29 = vrot.slane %v5771_v63, 1 }
 0xbf5   : > { %v5778_v60 = vrot.slane %v5777_v17, 1 }
 0xbf6   : > { %v5773_v18 = vmax.f32 %v5771_v63, %v5772_v29 }
 0xbf7   : > { %v5779_v22 = vmax.f32 %v5777_v17, %v5778_v60 }
 0xbf8   : > { %v5780_v28 = vsub.f32 %v5766_v40, %v5773_v18 }
 0xbf9   : > { %v5781_v49 = vsub.f32 %v5767_v31, %v5779_v22 }
 0xbfa   : > { %v5782_v23 = vmul.f32 1.442695, %v5780_v28 }
 0xbfb   : > { %v5784_v21 = vmul.f32 1.442695, %v5781_v49 }
 0xbfd   : > { %8591 = vpow2.f32 %v5784_v21 }
 0xbfe   : > { %8593 = vpow2.f32 %v5782_v23 }
 0xc07   : > { %v8592_v61 = vpop.eup %8591 }
 0xc08   : > { %v8594_v6 = vpop.eup %8593  ;;  %5845 = vmatprep.subr.mxu1 %v8592_v61  ;;  %v5792_v2 = vrot.slane %v8592_v61, 4 }
 0xc09   : > { %5846 = vmatpush1.msra.mxu1 %v8594_v6  ;;  %v5786_v56 = vrot.slane %v8594_v6, 4 }
 0xc0a   : > { %7790 = vmatmul.mubr.msk.f32.vlgmr.msra.gmra.mrb[30].mxu1 %vm862_vm3, %v5817_v25  ;;  %v5793_v30 = vadd.f32 %v8592_v61, %v5792_v2  ;;  %v5955_v2 = vpop.permute.xlu1 %5954 }
 0xc0b   : > { %5915 = vmatprep.mubr.f32.mxu1 %v11317_v0  ;;  %v5787_v8 = vadd.f32 %v8594_v6, %v5786_v56  ;;  %v5945_v6 = vld [vmem:[%s11277_s19 + $0x8] sm:$0xff]  ;;  %v10630_v56 = vld [vmem:[%s11359_s4] sm:$0xff] }
 0xc0c   : > { %v5794_v33 = vrot.slane %v5793_v30, 2 }
 0xc0d   : > { %v5788_v41 = vrot.slane %v5787_v8, 2 }
 0xc0e   : > { %7791 = vmatmul.mubr.msk.f32.gmra.mrb[32].mxu1 %vm862_vm3, %v5818_v52  ;;  %v5795_v35 = vadd.f32 %v5794_v33, %v5793_v30  ;;  %v5944_v52 = vld [vmem:[%s11277_s19] sm:$0xff]  ;;  %v5960_v30 = vpop.permute.xlu1 %5959 }
 0xc0f   : > { %5921 = vmatprep.mubr.f32.mxu1 %v11317_v0  ;;  %v5789_v50 = vadd.f32 %v5788_v41, %v5787_v8 }
 0xc10   : > { %v5796_v44 = vrot.slane %v5795_v35, 1 }
 0xc11   : > { %v5790_v4 = vrot.slane %v5789_v50, 1 }
 0xc12   : > { %7792 = vmatmul.mubr.msk.f32.gmra.mrb[34].mxu1 %vm862_vm3, %v5819_v57  ;;  %v5797_v1 = vadd.f32 %v5796_v44, %v5795_v35  ;;  %v5946_v57 = vld [vmem:[%s11277_s19 + $0x10] sm:$0xff] }
 0xc13   : > { %5927 = vmatprep.mubr.f32.mxu1 %v11317_v0  ;;  %v5791_v36 = vadd.f32 %v5790_v4, %v5789_v50 }
 0xc15   : > { %8595 = vrcp.f32 %v5791_v36 }
 0xc16   : > { %7793 = vmatmul.mubr.msk.f32.gmra.mrb[36].mxu1 %vm862_vm3, %v5820_v27  ;;  %8597 = vrcp.f32 %v5797_v1  ;;  %v5947_v27 = vld [vmem:[%s11277_s19 + $0x18] sm:$0xff] }
 0xc17   : > { %6048 = vmatprep.mubr.f32.mxu1 %v11317_v0 }
 0xc1f   : > { %v8596_v19 = vpop.eup %8595 }
 0xc20   : > { %v8598_v39 = vpop.eup %8597 }
 0xcdd   : > { %v5911_v40 = vpop.f32.mrb[30].mxu1 }
 0xcde   : > { %v5936_v31 = vmul.f32 %v8596_v19, %v5911_v40  ;;  %v5913_v37 = vpop.f32.mrb[31].mxu1 }
 0xcdf   : > { %v5937_v38 = vmul.f32 %v8598_v39, %v5913_v37  ;;  %v5965_v37 = vpop.permute.xlu1 %5964 }
 0xce1   : > { %v5917_v47 = vpop.f32.mrb[32].mxu1 }
 0xce2   : > { %v5938_v51 = vmul.f32 %v8596_v19, %v5917_v47  ;;  %v5919_v11 = vpop.f32.mrb[33].mxu1 }
 0xce3   : > { %v5939_v7 = vmul.f32 %v8598_v39, %v5919_v11 }
 0xce4   : > { %v8184_v63 = vpack.c.bf16 %v5938_v51, %v5936_v31 }
 0xce5   : > { %v8182_v17 = vpack.c.bf16 %v5939_v7, %v5937_v38  ;;  %v5923_v29 = vpop.f32.mrb[34].mxu1 }
 0xce6   : > { %v5940_v60 = vmul.f32 %v8596_v19, %v5923_v29  ;;  %v5925_v18 = vpop.f32.mrb[35].mxu1 }
 0xce7   : > { %v5941_v22 = vmul.f32 %v8598_v39, %v5925_v18  ;;  %8183 = vmatprep.subr.bf16.mxu1 %v8182_v17 }
 0xce8   : > { %8185 = vmatpush1.bf16.msra.mxu1 %v8184_v63 }
 0xce9   : > { %v5929_v28 = vpop.f32.mrb[36].mxu1 }
 0xcea   : > { %v5942_v49 = vmul.f32 %v8596_v19, %v5929_v28  ;;  %v5931_v23 = vpop.f32.mrb[37].mxu1 }
 0xceb   : > { %v5943_v21 = vmul.f32 %v8598_v39, %v5931_v23 }
 0xcec   : > { %v8188_v25 = vpack.c.bf16 %v5942_v49, %v5940_v60 }
 0xced   : > { %v8186_v61 = vpack.c.bf16 %v5943_v21, %v5941_v22 }
 0xcef   : > { %8187 = vmatprep.subr.bf16.mxu1 %v8186_v61 }
 0xcf0   : > { %8189 = vmatpush1.bf16.msra.mxu1 %v8188_v25 }
 0xcf3   : > { %7794 = vmatmul.mubr.msk.f32.vlgmr.msra.gmra.mrb[38].mxu1 %vm2059_vm9, %v5944_v52 }
 0xcf4   : > { %6054 = vmatprep.mubr.f32.mxu1 %v11317_v0 }
 0xcf7   : > { %7795 = vmatmul.mubr.msk.f32.gmra.mrb[40].mxu1 %vm2059_vm9, %v5945_v6 }
 0xcf8   : > { %6060 = vmatprep.mubr.f32.mxu1 %v11317_v0 }
 0xcfb   : > { %7796 = vmatmul.mubr.msk.f32.gmra.mrb[42].mxu1 %vm2059_vm9, %v5946_v57 }
 0xcfc   : > { %6066 = vmatprep.mubr.f32.mxu1 %v11317_v0 }
 0xcff   : > { %7797 = vmatmul.mubr.msk.f32.gmra.mrb[44].mxu1 %vm2059_vm9, %v5947_v27  ;;  %v6363_v27 = vld [vmem:[%s11279_s21] sm:$0xff] }
 0xd00   : > { %7964 = vmatprep.mubr.msk.f32.mxu1 %vm2059_vm9, %v10630_v56 }
 0xdc6   : > { %v6050_v8 = vpop.f32.mrb[38].mxu1 }
 0xdc7   : > { %v6051_v41 = vadd.f32 %v6050_v8, %v5955_v2  ;;  %v6052_v33 = vpop.f32.mrb[39].mxu1  ;;  %v6364_v8 = vld [vmem:[%s11279_s21 + $0x8] sm:$0xff] }
 0xdc8   : > { %v6053_v50 = vadd.f32 %v6052_v33, %v5955_v2  ;;  %v6395_v2 = vld [vmem:[%s11373_s10] sm:$0xff] }
 0xdc9   : > { %v10635_v35 = vadd.f32 %v6051_v41, %v10541_v9  ;;  %v6366_v41 = vld [vmem:[%s11279_s21 + $0x18] sm:$0xff] }
 0xdca   : > { %v10638_v4 = vadd.f32 %v6053_v50, %v10535_v42  ;;  %v6056_v44 = vpop.f32.mrb[40].mxu1 }
 0xdcb   : > { %v6057_v36 = vadd.f32 %v6056_v44, %v5960_v30  ;;  %v6058_v1 = vpop.f32.mrb[41].mxu1  ;;  %v6093_v19 = vmul.f32 %v10635_v35, %v10635_v35 }
 0xdcc   : > { %v6059_v40 = vadd.f32 %v6058_v1, %v5960_v30  ;;  %v6081_v39 = vadd.f32 %v10638_v4, %v10635_v35  ;;  %v6094_v31 = vmul.f32 %v10638_v4, %v10638_v4  ;;  %v6396_v30 = vld [vmem:[%s11373_s10 + $0x8] sm:$0xff] }
 0xdcd   : > { %v10647_v9 = vadd.f32 %v6057_v36, %v10532_v3 }
 0xdce   : > { %v10650_v42 = vadd.f32 %v6059_v40, %v10538_v62  ;;  %v6062_v38 = vpop.f32.mrb[42].mxu1  ;;  %6082 = vadd.xlane.f32.xlu1 %v6081_v39  ;;  %v6101_v11 = vadd.f32 %v6094_v31, %v6093_v19  ;;  %v5970_v62 = vpop.permute.xlu1 %5969 }
 0xdcf   : > { %v6063_v47 = vadd.f32 %v6062_v38, %v5965_v37  ;;  %v6064_v51 = vpop.f32.mrb[43].mxu1  ;;  %v6095_v17 = vmul.f32 %v10647_v9, %v10647_v9  ;;  %v8644_v38 = vld [vmem:[%s11359_s4 + $0x8] sm:$0xff] }
 0xdd0   : > { %v6065_v7 = vadd.f32 %v6064_v51, %v5965_v37  ;;  %v6084_v63 = vadd.f32 %v10650_v42, %v10647_v9  ;;  %v6096_v29 = vmul.f32 %v10650_v42, %v10650_v42  ;;  %v8645_v51 = vld [vmem:[%s11359_s4 + $0x10] sm:$0xff] }
 0xdd1   : > { %v10659_v60 = vadd.f32 %v6063_v47, %v10560_v53 }
 0xdd2   : > { %v6068_v3 = vpop.f32.mrb[44].mxu1  ;;  %6085 = vadd.xlane.f32.xlu0 %v6084_v63  ;;  %6102 = vadd.xlane.f32.xlu1 %v6101_v11  ;;  %v10662_v22 = vadd.f32 %v6065_v7, %v10554_v55  ;;  %v6104_v23 = vadd.f32 %v6096_v29, %v6095_v17  ;;  %v8646_v7 = vld [vmem:[%s11359_s4 + $0x18] sm:$0xff] }
 0xdd3   : > { %v6070_v18 = vpop.f32.mrb[45].mxu1  ;;  %v6069_v28 = vadd.f32 %v6068_v3, %v5970_v62  ;;  %v6097_v55 = vmul.f32 %v10659_v60, %v10659_v60 }
 0xdd4   : > { %v6071_v49 = vadd.f32 %v6070_v18, %v5970_v62  ;;  %v6087_v61 = vadd.f32 %v10662_v22, %v10659_v60  ;;  %v6098_v52 = vmul.f32 %v10662_v22, %v10662_v22  ;;  %v6365_v18 = vld [vmem:[%s11279_s21 + $0x10] sm:$0xff] }
 0xdd5   : > { %v10665_v21 = vadd.f32 %v6069_v28, %v10551_v20 }
 0xdd6   : > { %6105 = vadd.xlane.f32.xlu1 %v6104_v23  ;;  %v10668_v25 = vadd.f32 %v6071_v49, %v10557_v10  ;;  %v6107_v6 = vadd.f32 %v6098_v52, %v6097_v55 }
 0xdd7   : > { %v6099_v20 = vmul.f32 %v10665_v21, %v10665_v21 }
 0xdd8   : > { %v6090_v53 = vadd.f32 %v10668_v25, %v10665_v21  ;;  %v6100_v10 = vmul.f32 %v10668_v25, %v10668_v25 }
 0xdda   : > { %6088 = vadd.xlane.f32.xlu1 %v6087_v61  ;;  %v6110_v57 = vadd.f32 %v6100_v10, %v6099_v20 }
 0xdde   : > { %6091 = vadd.xlane.f32.xlu1 %v6090_v53 }
 0xde2   : > { %6108 = vadd.xlane.f32.xlu1 %v6107_v6 }
 0xde6   : > { %6111 = vadd.xlane.f32.xlu1 %v6110_v57 }
 0xde8   : > { %6369 = vperm.xlu0 %8509, %v6363_v27  }
 0xdec   : > { %6401 = vperm.xlu0 %8509, %v6395_v2  }
 0xdf7   : > { %6374 = vperm.xlu1 %8510, %v6364_v8  }
 0xdfb   : > { %6406 = vperm.xlu1 %8510, %v6396_v30  }
 0xdff   : > { %6384 = vperm.xlu1 %8510, %v6366_v41  }
 0xe5b   : > { %v6083_v33 = vpop.xlane.xlu1 %6082 }
 0xe5f   : > { %v6086_v50 = vpop.xlane.xlu0 %6085  ;;  %v6103_v44 = vpop.xlane.xlu1 %6102 }
 0xe60   : > { %v8190_v36 = vpack.c.bf16 %v6086_v50, %v6083_v33 }
 0xe62   : > { %8191 = vmatprep.subr.bf16.mxu1 %v8190_v36 }
 0xe63   : > { %8193 = vmatpush3.bf16.msra.mxu1 %v8190_v36  ;;  %v6106_v1 = vpop.xlane.xlu1 %6105 }
 0xe64   : > { %v8198_v31 = vpack.c.bf16 %v6106_v1, %v6103_v44 }
 0xe67   : > { %v6089_v19 = vpop.xlane.xlu1 %6088 }
 0xe6b   : > { %v6092_v40 = vpop.xlane.xlu1 %6091 }
 0xe6c   : > { %v8194_v39 = vpack.c.bf16 %v6092_v40, %v6089_v19 }
 0xe6e   : > { %8195 = vmatprep.subr.bf16.mxu1 %v8194_v39 }
 0xe6f   : > { %8197 = vmatpush3.bf16.msra.mxu1 %v8194_v39  ;;  %v6109_v37 = vpop.xlane.xlu1 %6108 }
 0xe70   : > { %8199 = vmatprep.subr.bf16.mxu1 %v8198_v31 }
 0xe72   : > { %7965 = vmatmul.mubr.msk.f32.vlgmr.msra.gmra.mrb[46].mxu1 %vm2059_vm9, %v8644_v38 }
 0xe73   : > { %8201 = vmatpush3.bf16.msra.mxu1 %v8198_v31  ;;  %v6112_v47 = vpop.xlane.xlu1 %6111  ;;  %7967 = vmatprep.mubr.msk.f32.mxu1 %vm2059_vm9, %v8645_v51 }
 0xe74   : > { %v8202_v11 = vpack.c.bf16 %v6112_v47, %v6109_v37  ;;  %v6397_v37 = vld [vmem:[%s11373_s10 + $0x10] sm:$0xff]  ;;  %v6398_v47 = vld [vmem:[%s11373_s10 + $0x18] sm:$0xff] }
 0xe76   : > { %7968 = vmatmul.mubr.msk.f32.gmra.mrb[48].mxu1 %vm2059_vm9, %v8646_v7  ;;  %8203 = vmatprep.subr.bf16.mxu1 %v8202_v11 }
 0xe77   : > { %8205 = vmatpush3.bf16.msra.mxu1 %v8202_v11  ;;  %7978 = vmatprep.mubr.msk.f32.mxu1 %vm2059_vm9, %v10630_v56 }
 0xe7a   : > { %7979 = vmatmul.mubr.msk.f32.vlgmr.msra.gmra.mrb[50].mxu1 %vm2059_vm9, %v8644_v38 }
 0xe7b   : > { %7981 = vmatprep.mubr.msk.f32.mxu1 %vm2059_vm9, %v8645_v51  ;;  %v6375_v51 = vpop.permute.xlu1 %6374 }
 0xe7e   : > { %7982 = vmatmul.mubr.msk.f32.gmra.mrb[52].mxu1 %vm2059_vm9, %v8646_v7 }
 0xe7f   : > { %6617 = vmatprep.mubr.f32.mxu1 %v11317_v0  ;;  %v6407_v11 = vpop.permute.xlu1 %6406 }
 0xe83   : > { %v10724_v7 = vpop.permute.xlu1 %6384 }
 0xf45   : > { %v7966_v63 = vpop.f32.mrb[46].mxu1 }
 0xf46   : > { %v6199_v17 = vmul.f32 0.0009765625, %v7966_v63  ;;  %v6179_v29 = vpop.f32.mrb[47].mxu1 }
 0xf47   : > { %v6198_v3 = vmul.f32 0.0009765625, %v6179_v29 }
 0xf48   : > { %6306 = vperm.xlu0 %8509, %v6199_v17   ;;  %v6292_v23 = vmul.f32 %v6199_v17, %v6199_v17  ;;  %v6370_v17 = vpop.permute.xlu0 %6369 }
 0xf49   : > { %6301 = vperm.xlu1 %8510, %v6198_v3   ;;  %v7969_v62 = vpop.f32.mrb[48].mxu1  ;;  %v6291_v55 = vmul.f32 %v6198_v3, %v6198_v3 }
 0xf4a   : > { %v6201_v56 = vmul.f32 0.0009765625, %v7969_v62  ;;  %v6189_v28 = vpop.f32.mrb[49].mxu1 }
 0xf4b   : > { %v6200_v52 = vmul.f32 0.0009765625, %v6189_v28 }
 0xf4c   : > { %6379 = vperm.xlu0 %8509, %v6365_v18   ;;  %v6294_v27 = vmul.f32 %v6201_v56, %v6201_v56  ;;  %v6402_v3 = vpop.permute.xlu0 %6401 }
 0xf4d   : > { %6316 = vperm.xlu1 %8510, %v6201_v56   ;;  %v7980_v49 = vpop.f32.mrb[50].mxu1  ;;  %v6293_v41 = vmul.f32 %v6200_v52, %v6200_v52 }
 0xf4e   : > { %v6288_v61 = vmul.f32 0.0009765625, %v7980_v49  ;;  %v6268_v53 = vpop.f32.mrb[51].mxu1 }
 0xf4f   : > { %v6287_v6 = vmul.f32 0.0009765625, %v6268_v53 }
 0xf50   : > { %v6296_v20 = vsub.f32 %v6288_v61, %v6292_v23 }
 0xf51   : > { %v6295_v10 = vsub.f32 %v6287_v6, %v6291_v55  ;;  %6311 = vperm.xlu1 %8510, %v6200_v52   ;;  %v7983_v57 = vpop.f32.mrb[52].mxu1 }
 0xf52   : > { %v6328_v2 = vadd.f32 1e-05, %v6296_v20  ;;  %v6290_v8 = vmul.f32 0.0009765625, %v7983_v57  ;;  %v6278_v30 = vpop.f32.mrb[53].mxu1 }
 0xf53   : > { %v6289_v33 = vmul.f32 0.0009765625, %v6278_v30  ;;  %v6327_v50 = vadd.f32 1e-05, %v6295_v10 }
 0xf54   : > { %8599 = vrsqrt.f32 %v6328_v2  ;;  %v6298_v44 = vsub.f32 %v6290_v8, %v6294_v27 }
 0xf55   : > { %v6297_v36 = vsub.f32 %v6289_v33, %v6293_v41  ;;  %8601 = vrsqrt.f32 %v6327_v50 }
 0xf56   : > { %v6330_v19 = vadd.f32 1e-05, %v6298_v44 }
 0xf57   : > { %v6329_v1 = vadd.f32 1e-05, %v6297_v36 }
 0xf59   : > { %8603 = vrsqrt.f32 %v6329_v1 }
 0xf5a   : > { %8605 = vrsqrt.f32 %v6330_v19 }
 0xf5e   : > { %v8600_v40 = vpop.eup %8599 }
 0xf5f   : > { %6342 = vperm.xlu1 %8510, %v8600_v40   ;;  %v8602_v39 = vpop.eup %8601 }
 0xf63   : > { %v8604_v31 = vpop.eup %8603  ;;  %6337 = vperm.xlu1 %8510, %v8602_v39  }
 0xf64   : > { %6347 = vperm.xlu0 %8509, %v8604_v31   ;;  %v8606_v38 = vpop.eup %8605 }
 0xf67   : > { %6352 = vperm.xlu1 %8510, %v8606_v38  }
 0xf68   : > { %6411 = vperm.xlu0 %8509, %v6397_v37  }
 0xf6b   : > { %6416 = vperm.xlu1 %8510, %v6398_v47  }
 0xfc7   : > { %v6307_v62 = vpop.permute.xlu0 %6306 }
 0xfc8   : > { %v6302_v63 = vpop.permute.xlu1 %6301  ;;  %v6321_v56 = vsub.f32 %v10647_v9, %v6307_v62  ;;  %v6322_v28 = vsub.f32 %v10650_v42, %v6307_v62 }
 0xfc9   : > { %v6319_v53 = vsub.f32 %v10635_v35, %v6302_v63  ;;  %v6320_v55 = vsub.f32 %v10638_v4, %v6302_v63 }
 0xfcc   : > { %v6317_v29 = vpop.permute.xlu1 %6316 }
 0xfcd   : > { %v6326_v42 = vsub.f32 %v10668_v25, %v6317_v29 }
 0xfd0   : > { %v10726_v18 = vpop.permute.xlu1 %6311 }
 0xfde   : > { %v6343_v49 = vpop.permute.xlu1 %6342 }
 0xfdf   : > { %v6357_v23 = vmul.f32 %v6343_v49, %v6321_v56  ;;  %v6358_v61 = vmul.f32 %v6343_v49, %v6322_v28  ;;  %v6380_v28 = vpop.permute.xlu0 %6379  ;;  %v6325_v49 = vsub.f32 %v10665_v21, %v6317_v29  ;;  %v6324_v29 = vsub.f32 %v10662_v22, %v10726_v18 }
 0xfe1   : > { %v6389_v52 = vmul.f32 %v6375_v51, %v6357_v23  ;;  %v6390_v6 = vmul.f32 %v6375_v51, %v6358_v61 }
 0xfe2   : > { %v6338_v20 = vpop.permute.xlu1 %6337 }
 0xfe3   : > { %v6421_v10 = vadd.f32 %v6407_v11, %v6389_v52  ;;  %v6422_v57 = vadd.f32 %v6407_v11, %v6390_v6  ;;  %v6355_v27 = vmul.f32 %v6338_v20, %v6319_v53  ;;  %v6356_v2 = vmul.f32 %v6338_v20, %v6320_v55  ;;  %v6348_v61 = vpop.permute.xlu0 %6347 }
 0xfe4   : > { %v6323_v55 = vsub.f32 %v10659_v60, %v10726_v18 }
 0xfe5   : > { %v7808_v8 = vmul.f32 -1.442695, %v6421_v10  ;;  %v7809_v30 = vmul.f32 -1.442695, %v6422_v57  ;;  %v6387_v41 = vmul.f32 %v6370_v17, %v6355_v27  ;;  %v6388_v9 = vmul.f32 %v6370_v17, %v6356_v2 }
 0xfe6   : > { %v6353_v33 = vpop.permute.xlu1 %6352  ;;  %v6359_v52 = vmul.f32 %v6348_v61, %v6323_v55 }
 0xfe7   : > { %8607 = vpow2.f32 %v7808_v8  ;;  %v6419_v50 = vadd.f32 %v6402_v3, %v6387_v41  ;;  %v6420_v44 = vadd.f32 %v6402_v3, %v6388_v9  ;;  %v6362_v35 = vmul.f32 %v6353_v33, %v6326_v42 }
 0xfe8   : > { %8609 = vpow2.f32 %v7809_v30  ;;  %v6361_v53 = vmul.f32 %v6353_v33, %v6325_v49  ;;  %v6391_v20 = vmul.f32 %v6380_v28, %v6359_v52 }
 0xfe9   : > { %v7806_v4 = vmul.f32 -1.442695, %v6419_v50  ;;  %v7807_v36 = vmul.f32 -1.442695, %v6420_v44  ;;  %v6394_v1 = vmul.f32 %v10724_v7, %v6362_v35 }
 0xfea   : > { %v6393_v6 = vmul.f32 %v10724_v7, %v6361_v53  ;;  %v6417_v21 = vpop.permute.xlu1 %6416 }
 0xfeb   : > { %8611 = vpow2.f32 %v7806_v4  ;;  %v6426_v2 = vadd.f32 %v6417_v21, %v6394_v1 }
 0xfec   : > { %8613 = vpow2.f32 %v7807_v36  ;;  %v6425_v27 = vadd.f32 %v6417_v21, %v6393_v6 }
 0xfed   : > { %v7813_v30 = vmul.f32 -1.442695, %v6426_v2 }
 0xfee   : > { %v7812_v8 = vmul.f32 -1.442695, %v6425_v27 }
 0xff1   : > { %v8608_v19 = vpop.eup %8607 }
 0xff2   : > { %v8610_v40 = vpop.eup %8609  ;;  %v6453_v39 = vadd.f32 1.0, %v8608_v19 }
 0xff3   : > { %v6454_v31 = vadd.f32 1.0, %v8610_v40 }
 0xff4   : > { %8615 = vrcp.f32 %v6453_v39 }
 0xff5   : > { %v8612_v37 = vpop.eup %8611  ;;  %8617 = vrcp.f32 %v6454_v31 }
 0xff6   : > { %v8614_v38 = vpop.eup %8613  ;;  %v6451_v25 = vadd.f32 1.0, %v8612_v37 }
 0xff7   : > { %v6452_v47 = vadd.f32 1.0, %v8614_v38 }
 0xff8   : > { %8619 = vrcp.f32 %v6451_v25 }
 0xff9   : > { %8621 = vrcp.f32 %v6452_v47 }
 0xffa   : > { %8623 = vpow2.f32 %v7812_v8 }
 0xffe   : > { %v8616_v51 = vpop.eup %8615 }
 0xfff   : > { %v10734_v11 = vmul.f32 %v8616_v51, %v6421_v10  ;;  %v8618_v63 = vpop.eup %8617  ;;  %v6360_v10 = vmul.f32 %v6348_v61, %v6324_v29 }
0x1000   : > { %v10738_v3 = vmul.f32 %v8618_v63, %v6422_v57  ;;  %v6412_v57 = vpop.permute.xlu0 %6411 }
0x1001   : > { %6518 = vrot.lane.b32.xlu1 %v10734_v11, %s11361_s1  ;;  %v6423_v60 = vadd.f32 %v6412_v57, %v6391_v20  ;;  %v6392_v7 = vmul.f32 %v6380_v28, %v6360_v10 }
0x1002   : > { %v8620_v17 = vpop.eup %8619 }
0x1003   : > { %v10740_v62 = vmul.f32 %v8620_v17, %v6419_v50  ;;  %v8622_v56 = vpop.eup %8621  ;;  %v7810_v22 = vmul.f32 -1.442695, %v6423_v60  ;;  %v6424_v18 = vadd.f32 %v6412_v57, %v6392_v7 }
0x1004   : > { %v10747_v23 = vmul.f32 %v8622_v56, %v6420_v44  ;;  %v8624_v9 = vpop.eup %8623 }
0x1005   : > { %6526 = vrot.lane.b32.xlu1 %v10738_v3, %s11361_s1  ;;  %6516 = vrot.lane.b32.xlu0 %v10740_v62, %s11361_s1  ;;  %8625 = vpow2.f32 %v7810_v22  ;;  %v7811_v41 = vmul.f32 -1.442695, %v6424_v18  ;;  %v6457_v33 = vadd.f32 1.0, %v8624_v9 }
0x1006   : > { %8627 = vpow2.f32 %v7813_v30 }
0x1007   : > { %8629 = vpow2.f32 %v7811_v41 }
0x1008   : > { %8631 = vrcp.f32 %v6457_v33 }
0x1009   : > { %6485 = vrot.lane.b32.xlu1 %v10734_v11, %s11362_s5  ;;  %6524 = vrot.lane.b32.xlu0 %v10747_v23, %s11361_s1 }
0x100d   : > { %6493 = vrot.lane.b32.xlu1 %v10738_v3, %s11362_s5  ;;  %6483 = vrot.lane.b32.xlu0 %v10740_v62, %s11362_s5 }
0x100f   : > { %v8626_v42 = vpop.eup %8625 }
0x1010   : > { %v8628_v50 = vpop.eup %8627  ;;  %v6455_v44 = vadd.f32 1.0, %v8626_v42 }
0x1011   : > { %6700 = vrot.lane.b32.xlu1 %v10734_v11, %s11363_s7  ;;  %6491 = vrot.lane.b32.xlu0 %v10747_v23, %s11362_s5  ;;  %v6458_v35 = vadd.f32 1.0, %v8628_v50  ;;  %v8630_v4 = vpop.eup %8629 }
0x1012   : > { %8633 = vrcp.f32 %v6455_v44  ;;  %v6456_v36 = vadd.f32 1.0, %v8630_v4  ;;  %v8632_v1 = vpop.eup %8631 }
0x1013   : > { %8635 = vrcp.f32 %v6458_v35  ;;  %v10802_v40 = vmul.f32 %v8632_v1, %v6425_v27 }
0x1014   : > { %8637 = vrcp.f32 %v6456_v36 }
0x1015   : > { %6708 = vrot.lane.b32.xlu1 %v10738_v3, %s11363_s7  ;;  %6698 = vrot.lane.b32.xlu0 %v10740_v62, %s11363_s7 }
0x1019   : > { %6810 = vrot.lane.b32.xlu1 %v10734_v11, %s11364_s6  ;;  %6706 = vrot.lane.b32.xlu0 %v10747_v23, %s11363_s7 }
0x101c   : > { %v8634_v19 = vpop.eup %8633 }
0x101d   : > { %6818 = vrot.lane.b32.xlu1 %v10738_v3, %s11364_s6  ;;  %6808 = vrot.lane.b32.xlu0 %v10740_v62, %s11364_s6  ;;  %v8636_v39 = vpop.eup %8635  ;;  %v10808_v31 = vmul.f32 %v8634_v19, %v6423_v60 }
0x101e   : > { %v10810_v37 = vmul.f32 %v8636_v39, %v6426_v2  ;;  %v8638_v38 = vpop.eup %8637 }
0x101f   : > { %v10816_v25 = vmul.f32 %v8638_v38, %v6424_v18 }
0x1021   : > { %6998 = vrot.lane.b32.xlu1 %v10734_v11, %s11365_s26  ;;  %6816 = vrot.lane.b32.xlu0 %v10747_v23, %s11364_s6 }
0x1025   : > { %7006 = vrot.lane.b32.xlu1 %v10738_v3, %s11365_s26  ;;  %6996 = vrot.lane.b32.xlu0 %v10740_v62, %s11365_s26 }
0x1029   : > { %7108 = vrot.lane.b32.xlu1 %v10734_v11, %s11366_s0  ;;  %7004 = vrot.lane.b32.xlu0 %v10747_v23, %s11365_s26 }
0x102d   : > { %7116 = vrot.lane.b32.xlu1 %v10738_v3, %s11366_s0  ;;  %7106 = vrot.lane.b32.xlu0 %v10740_v62, %s11366_s0 }
0x1031   : > { %7218 = vrot.lane.b32.xlu1 %v10734_v11, %s11367_s27  ;;  %7114 = vrot.lane.b32.xlu0 %v10747_v23, %s11366_s0 }
0x1035   : > { %7226 = vrot.lane.b32.xlu1 %v10738_v3, %s11367_s27  ;;  %7216 = vrot.lane.b32.xlu0 %v10740_v62, %s11367_s27 }
0x1039   : > { %7224 = vrot.lane.b32.xlu0 %v10747_v23, %s11367_s27  ;;  %6522 = vrot.lane.b32.xlu1 %v10802_v40, %s11361_s1 }
0x103d   : > { %6520 = vrot.lane.b32.xlu0 %v10808_v31, %s11361_s1  ;;  %6530 = vrot.lane.b32.xlu1 %v10810_v37, %s11361_s1 }
0x1041   : > { %6528 = vrot.lane.b32.xlu0 %v10816_v25, %s11361_s1  ;;  %6489 = vrot.lane.b32.xlu1 %v10802_v40, %s11362_s5 }
0x1045   : > { %6487 = vrot.lane.b32.xlu0 %v10808_v31, %s11362_s5  ;;  %6497 = vrot.lane.b32.xlu1 %v10810_v37, %s11362_s5 }
0x1049   : > { %6495 = vrot.lane.b32.xlu0 %v10816_v25, %s11362_s5  ;;  %6704 = vrot.lane.b32.xlu1 %v10802_v40, %s11363_s7 }
0x104d   : > { %6702 = vrot.lane.b32.xlu0 %v10808_v31, %s11363_s7  ;;  %6712 = vrot.lane.b32.xlu1 %v10810_v37, %s11363_s7 }
0x1051   : > { %6710 = vrot.lane.b32.xlu0 %v10816_v25, %s11363_s7  ;;  %6814 = vrot.lane.b32.xlu1 %v10802_v40, %s11364_s6  ;;  %s11374_s7 = sld [smem:[#allocation25_spill]] }
0x1055   : > { %6812 = vrot.lane.b32.xlu0 %v10808_v31, %s11364_s6  ;;  %6822 = vrot.lane.b32.xlu1 %v10810_v37, %s11364_s6 }
0x1057   : > { %v7436_v27 = vld [vmem:[%s11374_s7] sm:$0xf] }
0x1059   : > { %6820 = vrot.lane.b32.xlu0 %v10816_v25, %s11364_s6  ;;  %7002 = vrot.lane.b32.xlu1 %v10802_v40, %s11365_s26 }
0x105d   : > { %7326 = vrot.lane.b32.xlu0 %v10740_v62, %s11368_s30  ;;  %7010 = vrot.lane.b32.xlu1 %v10810_v37, %s11365_s26 }
0x1061   : > { %7334 = vrot.lane.b32.xlu0 %v10747_v23, %s11368_s30  ;;  %7112 = vrot.lane.b32.xlu1 %v10802_v40, %s11366_s0 }
0x1065   : > { %7000 = vrot.lane.b32.xlu0 %v10808_v31, %s11365_s26  ;;  %7120 = vrot.lane.b32.xlu1 %v10810_v37, %s11366_s0 }
0x1069   : > { %7008 = vrot.lane.b32.xlu0 %v10816_v25, %s11365_s26  ;;  %7222 = vrot.lane.b32.xlu1 %v10802_v40, %s11367_s27 }
0x106d   : > { %7110 = vrot.lane.b32.xlu0 %v10808_v31, %s11366_s0  ;;  %7230 = vrot.lane.b32.xlu1 %v10810_v37, %s11367_s27 }
0x1071   : > { %7118 = vrot.lane.b32.xlu0 %v10816_v25, %s11366_s0  ;;  %7328 = vrot.lane.b32.xlu1 %v10734_v11, %s11368_s30  ;;  %s11379_s0 = sld [smem:[#allocation24_spill]] }
0x1073   : > { %v6519_v47 = vpop.permute.xlu1 %6518 }
0x1075   : > { %7220 = vrot.lane.b32.xlu0 %v10808_v31, %s11367_s27  ;;  %7336 = vrot.lane.b32.xlu1 %v10738_v3, %s11368_s30 }
0x1077   : > { %v6517_v51 = vpop.permute.xlu0 %6516  ;;  %v6527_v63 = vpop.permute.xlu1 %6526  ;;  %v7829_v5 = vld [vmem:[%s11379_s0 + $0x20] sm:$0xf] }
0x1078   : > { %v6537_v17 = vsel %vm839_vm1, %v6527_v63, %v6519_v47  ;;  %v6533_v56 = vsel %vm839_vm1, %v6519_v47, %v6527_v63 }
0x1079   : > { %7228 = vrot.lane.b32.xlu0 %v10816_v25, %s11367_s27  ;;  %7332 = vrot.lane.b32.xlu1 %v10802_v40, %s11368_s30  ;;  %v6542_v61 = vmul.f32 %v6537_v17, %v8868_v13  ;;  %v6543_v52 = vmul.f32 %v6533_v56, %v8865_v12  ;;  %s11393_s27 = sshll.u32 %s11397_s2, 3 }
0x107a   : > { %s801_s24 = scalar_lea.vmem %s11394_s22, %s11393_s27 }
0x107b   : > { %v6525_v28 = vpop.permute.xlu0 %6524  ;;  %v10882_v49 = vpop.permute.xlu1 %6485 }
0x107c   : > { %v6532_v53 = vsel %vm839_vm1, %v6517_v51, %v6525_v28  ;;  %v6536_v55 = vsel %vm839_vm1, %v6525_v28, %v6517_v51 }
0x107d   : > { %v6540_v6 = vmul.f32 %v6536_v55, %v8868_v13  ;;  %v6541_v21 = vmul.f32 %v6532_v53, %v8865_v12  ;;  %7330 = vrot.lane.b32.xlu0 %v10808_v31, %s11368_s30  ;;  %7340 = vrot.lane.b32.xlu1 %v10810_v37, %s11368_s30 }
0x107f   : > { %v8208_v29 = vpack.c.bf16 %v6542_v61, %v6540_v6  ;;  %v6484_v20 = vpop.permute.xlu0 %6483  ;;  %v6494_v10 = vpop.permute.xlu1 %6493  ;;  %v8206_v57 = vpack.c.bf16 %v6543_v52, %v6541_v21 }
0x1081   : > { %7338 = vrot.lane.b32.xlu0 %v10816_v25, %s11368_s30  ;;  %8207 = vmatprep.subr.bf16.mxu1 %v8206_v57 }
0x1082   : > { %8209 = vmatpush1.bf16.msra.mxu1 %v8208_v29 }
0x1083   : > { %v6492_v60 = vpop.permute.xlu0 %6491  ;;  %v10901_v7 = vpop.permute.xlu1 %6700 }
0x1084   : > { %v6499_v53 = vsel %vm814_vm0, %v6484_v20, %v6492_v60 }
0x1085   : > { %7439 = vperm.xlu0 %8509, %v7436_v27  }
0x1087   : > { %v10903_v2 = vpop.permute.xlu0 %6698  ;;  %v10905_v8 = vpop.permute.xlu1 %6708 }
0x108b   : > { %v10907_v22 = vpop.permute.xlu0 %6706  ;;  %v10909_v18 = vpop.permute.xlu1 %6810 }
0x108f   : > { %v10911_v30 = vpop.permute.xlu0 %6808  ;;  %v10913_v41 = vpop.permute.xlu1 %6818 }
0x1093   : > { %v10915_v9 = vpop.permute.xlu0 %6816  ;;  %v10917_v42 = vpop.permute.xlu1 %6998 }
0x1097   : > { %v10919_v33 = vpop.permute.xlu0 %6996  ;;  %v10921_v50 = vpop.permute.xlu1 %7006 }
0x1098   : > { %v7013_v44 = vsel %vm1455_vm6, %v10917_v42, %v10921_v50 }
0x1099   : > { %v10936_v1 = vmul.f32 %v7013_v44, %v9080_v32 }
0x109b   : > { %v10927_v35 = vpop.permute.xlu0 %7004  ;;  %v10929_v4 = vpop.permute.xlu1 %7108 }
0x109c   : > { %v7012_v36 = vsel %vm1455_vm6, %v10919_v33, %v10927_v35 }
0x109d   : > { %v10939_v19 = vmul.f32 %v7012_v36, %v9080_v32  ;;  %v6503_v36 = vsel %vm814_vm0, %v6492_v60, %v6484_v20  ;;  %v6504_v20 = vsel %vm814_vm0, %v6494_v10, %v10882_v49 }
0x109f   : > { %v10943_v38 = vpop.permute.xlu0 %7106  ;;  %v10945_v47 = vpop.permute.xlu1 %7116 }
0x10a0   : > { %v7123_v51 = vsel %vm1591_vm7, %v10929_v4, %v10945_v47 }
0x10a1   : > { %v10960_v28 = vmul.f32 %v7123_v51, %v9120_v43 }
0x10a3   : > { %v10951_v63 = vpop.permute.xlu0 %7114  ;;  %v10953_v17 = vpop.permute.xlu1 %7218  ;;  %11375 = vst [vmem:[#allocation8_spill] sm:$0xff] %v10960_v28 }
0x10a4   : > { %v7122_v56 = vsel %vm1591_vm7, %v10943_v38, %v10951_v63 }
0x10a5   : > { %v10963_v61 = vmul.f32 %v7122_v56, %v9120_v43 }
0x10a7   : > { %11376 = vst [vmem:[#allocation9_spill] sm:$0xff] %v10963_v61  ;;  %v10967_v55 = vpop.permute.xlu0 %7216  ;;  %v10969_v52 = vpop.permute.xlu1 %7226 }
0x10a8   : > { %v7233_v6 = vsel %vm1727_vm8, %v10953_v17, %v10969_v52 }
0x10a9   : > { %v10982_v27 = vmul.f32 %v7233_v6, %v9156_v54  ;;  %v6500_v6 = vsel %vm814_vm0, %v10882_v49, %v6494_v10 }
0x10aa   : > { %v6510_v60 = vmul.f32 %v6500_v6, %v8871_v14 }
0x10ab   : > { %v10975_v21 = vpop.permute.xlu0 %7224  ;;  %v6523_v29 = vpop.permute.xlu1 %6522  ;;  %11377 = vst [vmem:[#allocation10_spill] sm:$0xff] %v10982_v27 }
0x10ac   : > { %v7232_v57 = vsel %vm1727_vm8, %v10967_v55, %v10975_v21 }
0x10ad   : > { %v10985_v44 = vmul.f32 %v7232_v57, %v9156_v54 }
0x10af   : > { %11378 = vst [vmem:[#allocation11_spill] sm:$0xff] %v10985_v44  ;;  %v6521_v51 = vpop.permute.xlu0 %6520  ;;  %v6531_v56 = vpop.permute.xlu1 %6530  ;;  %v6508_v44 = vmul.f32 %v6499_v53, %v8871_v14  ;;  %v6507_v53 = vmul.f32 %v6503_v36, %v8874_v15 }
0x10b0   : > { %v6535_v39 = vsel %vm839_vm1, %v6523_v29, %v6531_v56  ;;  %v6539_v0 = vsel %vm839_vm1, %v6531_v56, %v6523_v29 }
0x10b1   : > { %v6546_v54 = vmul.f32 %v6539_v0, %v8868_v13  ;;  %v6547_v29 = vmul.f32 %v6535_v39, %v8865_v12  ;;  %v6509_v0 = vmul.f32 %v6504_v20, %v8874_v15  ;;  %v6715_v39 = vsel %vm1069_vm2, %v10901_v7, %v10905_v8 }
0x10b3   : > { %v6529_v57 = vpop.permute.xlu0 %6528  ;;  %v6490_v58 = vpop.permute.xlu1 %6489  ;;  %v8216_v10 = vpack.c.bf16 %v6509_v0, %v6507_v53 }
0x10b4   : > { %v6534_v27 = vsel %vm839_vm1, %v6521_v51, %v6529_v57  ;;  %v6538_v59 = vsel %vm839_vm1, %v6529_v57, %v6521_v51 }
0x10b5   : > { %v6544_v56 = vmul.f32 %v6538_v59, %v8868_v13  ;;  %v6545_v61 = vmul.f32 %v6534_v27, %v8865_v12  ;;  %v6714_v13 = vsel %vm1069_vm2, %v10903_v2, %v10907_v22  ;;  %v8214_v12 = vpack.c.bf16 %v6510_v60, %v6508_v44 }
0x10b6   : > { %v6718_v44 = vsel %vm1069_vm2, %v10907_v22, %v10903_v2  ;;  %v6719_v2 = vsel %vm1069_vm2, %v10905_v8, %v10901_v7  ;;  %v11380_v22 = vmov 0.0  }
0x10b7   : > { %v8212_v28 = vpack.c.bf16 %v6546_v54, %v6544_v56  ;;  %v6488_v43 = vpop.permute.xlu0 %6487  ;;  %v6498_v45 = vpop.permute.xlu1 %6497  ;;  %v8210_v51 = vpack.c.bf16 %v6547_v29, %v6545_v61  ;;  %v7814_v54 = vld [vmem:[%s11379_s0 + $0x4] sm:$0xf]  ;;  %v6722_v56 = vmul.f32 %v6718_v44, %v8941_v46 }
0x10b8   : > { %v6502_v59 = vsel %vm814_vm0, %v6490_v58, %v6498_v45  ;;  %v6506_v49 = vsel %vm814_vm0, %v6498_v45, %v6490_v58  ;;  %v6723_v58 = vmul.f32 %v6714_v13, %v8892_v26  ;;  %v6515_v13 = vld [vmem:[%s11379_s0] sm:$0xf] }
0x10b9   : > { %8211 = vmatprep.subr.bf16.mxu1 %v8210_v51  ;;  %v6513_v36 = vmul.f32 %v6506_v49, %v8874_v15  ;;  %v6514_v6 = vmul.f32 %v6502_v59, %v8871_v14  ;;  %v6824_v51 = vsel %vm1205_vm4, %v10911_v30, %v10915_v9  ;;  %v6825_v59 = vsel %vm1205_vm4, %v10909_v18, %v10913_v41 }
0x10ba   : > { %8213 = vmatpush1.bf16.msra.mxu1 %v8212_v28 }
0x10bb   : > { %v6496_v61 = vpop.permute.xlu0 %6495  ;;  %8215 = vmatprep.subr.bf16.mxu1 %v8214_v12  ;;  %v6705_v27 = vpop.permute.xlu1 %6704 }
0x10bc   : > { %v6501_v45 = vsel %vm814_vm0, %v6488_v43, %v6496_v61  ;;  %v6505_v28 = vsel %vm814_vm0, %v6496_v61, %v6488_v43  ;;  %v6725_v43 = vmul.f32 %v6715_v39, %v8892_v26  ;;  %v6833_v39 = vmul.f32 %v6824_v51, %v8946_v48 }
0x10bd   : > { %v6511_v57 = vmul.f32 %v6505_v28, %v8874_v15  ;;  %v6512_v29 = vmul.f32 %v6501_v45, %v8871_v14  ;;  %7815 = vmatmul.mubr.msk.f32.vlgmr.msra.gmra.mrb[54].mxu1 %vm2059_vm9, %v7814_v54  ;;  %v6724_v14 = vmul.f32 %v6719_v2, %v8941_v46 }
0x10be   : > { %8217 = vmatpush1.bf16.msra.mxu1 %v8216_v10  ;;  %6691 = vmatprep.mubr.f32.mxu1 %v11380_v22  ;;  %v8222_v7 = vpack.c.bf16 %v6725_v43, %v6723_v58  ;;  %v6828_v10 = vsel %vm1205_vm4, %v10915_v9, %v10911_v30  ;;  %v6829_v30 = vsel %vm1205_vm4, %v10913_v41, %v10909_v18  ;;  %v7817_v18 = vld [vmem:[%s11379_s0 + $0x8] sm:$0xf] }
0x10bf   : > { %v8220_v20 = vpack.c.bf16 %v6513_v36, %v6511_v57  ;;  %v6703_v60 = vpop.permute.xlu0 %6702  ;;  %v6713_v53 = vpop.permute.xlu1 %6712  ;;  %v8218_v15 = vpack.c.bf16 %v6514_v6, %v6512_v29  ;;  %v8224_v12 = vpack.c.bf16 %v6724_v14, %v6722_v56  ;;  %v6835_v9 = vmul.f32 %v6825_v59, %v8946_v48 }
0x10c0   : > { %v6717_v8 = vsel %vm1069_vm2, %v6705_v27, %v6713_v53  ;;  %v6721_v0 = vsel %vm1069_vm2, %v6713_v53, %v6705_v27  ;;  %v6834_v2 = vmul.f32 %v6829_v30, %v9009_v16 }
0x10c1   : > { %8219 = vmatprep.subr.bf16.mxu1 %v8218_v15  ;;  %v6728_v44 = vmul.f32 %v6721_v0, %v8941_v46  ;;  %v6729_v58 = vmul.f32 %v6717_v8, %v8892_v26 }
0x10c2   : > { %8221 = vmatpush1.bf16.msra.mxu1 %v8220_v20 }
0x10c3   : > { %v6711_v49 = vpop.permute.xlu0 %6710  ;;  %8223 = vmatprep.subr.bf16.mxu1 %v8222_v7  ;;  %v6815_v54 = vpop.permute.xlu1 %6814 }
0x10c4   : > { %v6716_v61 = vsel %vm1069_vm2, %v6703_v60, %v6711_v49  ;;  %v6720_v27 = vsel %vm1069_vm2, %v6711_v49, %v6703_v60  ;;  %v8238_v49 = vpack.c.bf16 %v10738_v3, %v10747_v23  ;;  %v8240_v3 = vpack.c.bf16 %v10734_v11, %v10740_v62 }
0x10c5   : > { %v6726_v45 = vmul.f32 %v6720_v27, %v8941_v46  ;;  %v6727_v28 = vmul.f32 %v6716_v61, %v8892_v26  ;;  %7816 = vmatmul.mubr.msk.f32.vlgmr.msra.gmra.mrb[54].mxu1 %vm2059_vm9, %v6515_v13  ;;  %v6832_v46 = vmul.f32 %v6828_v10, %v9009_v16  ;;  %v8230_v26 = vpack.c.bf16 %v6835_v9, %v6833_v39 }
0x10c6   : > { %8225 = vmatpush1.bf16.msra.mxu1 %v8224_v12  ;;  %6799 = vmatprep.mubr.f32.mxu1 %v11380_v22  ;;  %v7017_v39 = vsel %vm1455_vm6, %v10921_v50, %v10917_v42  ;;  %v8244_v42 = vpack.c.bf16 %v10802_v40, %v10808_v31  ;;  %v7126_v11 = vsel %vm1591_vm7, %v10951_v63, %v10943_v38  ;;  %v7821_v50 = vld [vmem:[%s11379_s0 + $0x10] sm:$0xf] }
0x10c7   : > { %v8228_v36 = vpack.c.bf16 %v6728_v44, %v6726_v45  ;;  %v6813_v6 = vpop.permute.xlu0 %6812  ;;  %v6823_v57 = vpop.permute.xlu1 %6822  ;;  %v8226_v29 = vpack.c.bf16 %v6729_v58, %v6727_v28  ;;  %v8232_v60 = vpack.c.bf16 %v6834_v2, %v6832_v46  ;;  %v7127_v31 = vsel %vm1591_vm7, %v10945_v47, %v10929_v4 }
0x10c8   : > { %v6827_v43 = vsel %vm1205_vm4, %v6815_v54, %v6823_v57  ;;  %v6831_v56 = vsel %vm1205_vm4, %v6823_v57, %v6815_v54  ;;  %v7131_v38 = vmul.f32 %v7126_v11, %v9087_v34  ;;  %v11381_v4 = vpack.c.bf16 %v10936_v1, %v10939_v19  ;;  %v7823_v19 = vld [vmem:[%s11379_s0 + $0x14] sm:$0xf]  ;;  %v11388_v11 = vld [vmem:[#allocation4_spill] sm:$0xff] }
0x10c9   : > { %8227 = vmatprep.subr.bf16.mxu1 %v8226_v29  ;;  %v6838_v14 = vmul.f32 %v6831_v56, %v9009_v16  ;;  %v6839_v51 = vmul.f32 %v6827_v43, %v8946_v48  ;;  %v7133_v47 = vmul.f32 %v7127_v31, %v9087_v34 }
0x10ca   : > { %8229 = vmatpush1.bf16.msra.mxu1 %v8228_v36 }
0x10cb   : > { %v6821_v41 = vpop.permute.xlu0 %6820  ;;  %8231 = vmatprep.subr.bf16.mxu1 %v8230_v26  ;;  %v7003_v20 = vpop.permute.xlu1 %7002 }
0x10cc   : > { %v6826_v53 = vsel %vm1205_vm4, %v6813_v6, %v6821_v41  ;;  %v6830_v15 = vsel %vm1205_vm4, %v6821_v41, %v6813_v6  ;;  %v11383_v41 = vld [vmem:[#allocation5_spill] sm:$0xff] }
0x10cd   : > { %v6836_v7 = vmul.f32 %v6830_v15, %v9009_v16  ;;  %v6837_v8 = vmul.f32 %v6826_v53, %v8946_v48  ;;  %7818 = vmatmul.mubr.msk.f32.vlgmr.msra.gmra.mrb[54].mxu1 %vm2059_vm9, %v7817_v18  ;;  %v7016_v16 = vsel %vm1455_vm6, %v10927_v35, %v10919_v33  ;;  %v7819_v48 = vld [vmem:[%s11379_s0 + $0xc] sm:$0xf]  ;;  %v8242_v33 = vpack.c.bf16 %v10810_v37, %v10816_v25 }
0x10ce   : > { %8233 = vmatpush1.bf16.msra.mxu1 %v8232_v60  ;;  %6909 = vmatprep.mubr.f32.mxu1 %v11380_v22  ;;  %v7021_v23 = vmul.f32 %v7016_v16, %v9047_v24  ;;  %v7023_v35 = vmul.f32 %v7017_v39, %v9047_v24 }
0x10cf   : > { %v8236_v0 = vpack.c.bf16 %v6838_v14, %v6836_v7  ;;  %v11106_v13 = vpop.permute.xlu0 %7326  ;;  %v7011_v12 = vpop.permute.xlu1 %7010  ;;  %v8234_v59 = vpack.c.bf16 %v6839_v51, %v6837_v8  ;;  %v11384_v14 = vld [vmem:[#allocation8_spill] sm:$0xff] }
0x10d0   : > { %v8246_v62 = vpack.c.bf16 %v7023_v35, %v7021_v23  ;;  %v7015_v37 = vsel %vm1455_vm6, %v7003_v20, %v7011_v12  ;;  %v7019_v25 = vsel %vm1455_vm6, %v7011_v12, %v7003_v20  ;;  %v11387_v23 = vld [vmem:[#allocation7_spill] sm:$0xff] }
0x10d1   : > { %8235 = vmatprep.subr.bf16.mxu1 %v8234_v59  ;;  %v7026_v45 = vmul.f32 %v7015_v37, %v9080_v32  ;;  %v7027_v28 = vmul.f32 %v7019_v25, %v9047_v24 }
0x10d2   : > { %8237 = vmatpush1.bf16.msra.mxu1 %v8236_v0 }
0x10d3   : > { %v11117_v54 = vpop.permute.xlu0 %7334  ;;  %8239 = vmatprep.subr.bf16.mxu1 %v8238_v49  ;;  %v7113_v10 = vpop.permute.xlu1 %7112 }
0x10d4   : > { %v7342_v31 = vsel %vm1863_vm5, %v11106_v13, %v11117_v54 }
0x10d5   : > { %7820 = vmatmul.mubr.msk.f32.vlgmr.msra.gmra.mrb[54].mxu1 %vm2059_vm9, %v7819_v48  ;;  %v7825_v48 = vld [vmem:[%s11379_s0 + $0x18] sm:$0xf] }
0x10d6   : > { %8241 = vmatpush1.bf16.msra.mxu1 %v8240_v3  ;;  %6987 = vmatprep.mubr.f32.mxu1 %v11380_v22 }
0x10d7   : > { %v7001_v61 = vpop.permute.xlu0 %7000  ;;  %8243 = vmatprep.subr.bf16.mxu1 %v8242_v33  ;;  %v7121_v27 = vpop.permute.xlu1 %7120 }
0x10d8   : > { %v7125_v46 = vsel %vm1591_vm7, %v7113_v10, %v7121_v27  ;;  %v7129_v1 = vsel %vm1591_vm7, %v7121_v27, %v7113_v10  ;;  %v7346_v10 = vsel %vm1863_vm5, %v11117_v54, %v11106_v13  ;;  %v7827_v13 = vld [vmem:[%s11379_s0 + $0x1c] sm:$0xf] }
0x10d9   : > { %v7136_v20 = vmul.f32 %v7125_v46, %v11383_v41  ;;  %v7137_v60 = vmul.f32 %v7129_v1, %v9087_v34 }
0x10da   : > { %8245 = vmatpush1.bf16.msra.mxu1 %v8244_v42 }
0x10db   : > { %v7009_v44 = vpop.permute.xlu0 %7008  ;;  %8247 = vmatprep.subr.bf16.mxu1 %v8246_v62  ;;  %v7223_v40 = vpop.permute.xlu1 %7222 }
0x10dc   : > { %v7014_v63 = vsel %vm1455_vm6, %v7001_v61, %v7009_v44  ;;  %v7018_v58 = vsel %vm1455_vm6, %v7009_v44, %v7001_v61  ;;  %v11390_v44 = vld [vmem:[#allocation11_spill] sm:$0xff] }
0x10dd   : > { %v7024_v30 = vmul.f32 %v7014_v63, %v9080_v32  ;;  %v7025_v9 = vmul.f32 %v7018_v58, %v9047_v24  ;;  %7822 = vmatmul.mubr.msk.f32.vlgmr.msra.gmra.mrb[54].mxu1 %vm2059_vm9, %v7821_v50  ;;  %v7236_v32 = vsel %vm1727_vm8, %v10975_v21, %v10967_v55  ;;  %v8254_v24 = vpack.c.bf16 %v7133_v47, %v7131_v38  ;;  %v11382_v21 = vld [vmem:[#allocation6_spill] sm:$0xff] }
0x10de   : > { %8249 = vmatpush1.bf16.msra.mxu1 %v11381_v4  ;;  %7097 = vmatprep.mubr.f32.mxu1 %v11380_v22  ;;  %v7237_v55 = vsel %vm1727_vm8, %v10969_v52, %v10953_v17  ;;  %v7241_v43 = vmul.f32 %v7236_v32, %v11382_v21  ;;  %v11385_v17 = vld [vmem:[#allocation9_spill] sm:$0xff]  ;;  %v11389_v50 = vld [vmem:[#allocation10_spill] sm:$0xff]  ;;  %v7351_v38 = vmul.f32 %v7346_v10, %v11388_v11 }
0x10df   : > { %v8252_v36 = vpack.c.bf16 %v7026_v45, %v7024_v30  ;;  %v7111_v6 = vpop.permute.xlu0 %7110  ;;  %v7231_v57 = vpop.permute.xlu1 %7230  ;;  %v8250_v29 = vpack.c.bf16 %v7027_v28, %v7025_v9  ;;  %v11386_v52 = vpack.c.bf16 %v11384_v14, %v11385_v17  ;;  %v7243_v51 = vmul.f32 %v7237_v55, %v11382_v21  ;;  %v11392_v30 = vld [vmem:[#allocation3_spill] sm:$0xff] }
0x10e0   : > { %v7235_v59 = vsel %vm1727_vm8, %v7223_v40, %v7231_v57  ;;  %v7350_v47 = vmul.f32 %v7342_v31, %v11392_v30 }
0x10e1   : > { %8251 = vmatprep.subr.bf16.mxu1 %v8250_v29  ;;  %v8262_v49 = vpack.c.bf16 %v7243_v51, %v7241_v43  ;;  %v7246_v33 = vmul.f32 %v7235_v59, %v11387_v23 }
0x10e2   : > { %8253 = vmatpush1.bf16.msra.mxu1 %v8252_v36 }
0x10e3   : > { %v7119_v26 = vpop.permute.xlu0 %7118  ;;  %8255 = vmatprep.subr.bf16.mxu1 %v8254_v24  ;;  %v7329_v2 = vpop.permute.xlu1 %7328 }
0x10e4   : > { %v7124_v56 = vsel %vm1591_vm7, %v7111_v6, %v7119_v26  ;;  %v7128_v18 = vsel %vm1591_vm7, %v7119_v26, %v7111_v6 }
0x10e5   : > { %v7134_v53 = vmul.f32 %v7124_v56, %v11383_v41  ;;  %v7135_v15 = vmul.f32 %v7128_v18, %v9087_v34  ;;  %7824 = vmatmul.mubr.msk.f32.vlgmr.msra.gmra.mrb[54].mxu1 %vm2059_vm9, %v7823_v19  ;;  %v7239_v34 = vsel %vm1727_vm8, %v7231_v57, %v7223_v40  ;;  %v11391_v40 = vpack.c.bf16 %v11389_v50, %v11390_v44 }
0x10e6   : > { %8257 = vmatpush1.bf16.msra.mxu1 %v11386_v52  ;;  %7207 = vmatprep.mubr.f32.mxu1 %v11380_v22  ;;  %v7247_v35 = vmul.f32 %v7239_v34, %v11382_v21 }
0x10e7   : > { %v8260_v7 = vpack.c.bf16 %v7136_v20, %v7134_v53  ;;  %v7221_v8 = vpop.permute.xlu0 %7220  ;;  %v7337_v0 = vpop.permute.xlu1 %7336  ;;  %v8258_v12 = vpack.c.bf16 %v7137_v60, %v7135_v15 }
0x10e8   : > { %v7347_v16 = vsel %vm1863_vm5, %v7337_v0, %v7329_v2  ;;  %v7343_v42 = vsel %vm1863_vm5, %v7329_v2, %v7337_v0 }
0x10e9   : > { %8259 = vmatprep.subr.bf16.mxu1 %v8258_v12  ;;  %v7353_v62 = vmul.f32 %v7347_v16, %v11388_v11  ;;  %v7352_v9 = vmul.f32 %v7343_v42, %v11392_v30 }
0x10ea   : > { %8261 = vmatpush1.bf16.msra.mxu1 %v8260_v7 }
0x10eb   : > { %v7229_v39 = vpop.permute.xlu0 %7228  ;;  %8263 = vmatprep.subr.bf16.mxu1 %v8262_v49  ;;  %v7333_v3 = vpop.permute.xlu1 %7332  ;;  %v8270_v4 = vpack.c.bf16 %v7353_v62, %v7351_v38  ;;  %v8272_v57 = vpack.c.bf16 %v7352_v9, %v7350_v47 }
0x10ec   : > { %v7234_v61 = vsel %vm1727_vm8, %v7221_v8, %v7229_v39  ;;  %v7238_v27 = vsel %vm1727_vm8, %v7229_v39, %v7221_v8 }
0x10ed   : > { %v7244_v37 = vmul.f32 %v7234_v61, %v11387_v23  ;;  %v7245_v25 = vmul.f32 %v7238_v27, %v11382_v21  ;;  %7826 = vmatmul.mubr.msk.f32.vlgmr.msra.gmra.mrb[54].mxu1 %vm2059_vm9, %v7825_v48 }
0x10ee   : > { %8265 = vmatpush1.bf16.msra.mxu1 %v11391_v40  ;;  %7317 = vmatprep.mubr.f32.mxu1 %v11380_v22 }
0x10ef   : > { %v8268_v63 = vpack.c.bf16 %v7246_v33, %v7244_v37  ;;  %v7331_v58 = vpop.permute.xlu0 %7330  ;;  %v7341_v45 = vpop.permute.xlu1 %7340  ;;  %v8266_v28 = vpack.c.bf16 %v7247_v35, %v7245_v25 }
0x10f0   : > { %v7345_v36 = vsel %vm1863_vm5, %v7333_v3, %v7341_v45  ;;  %v7349_v6 = vsel %vm1863_vm5, %v7341_v45, %v7333_v3 }
0x10f1   : > { %8267 = vmatprep.subr.bf16.mxu1 %v8266_v28  ;;  %v7356_v24 = vmul.f32 %v7345_v36, %v11392_v30  ;;  %v7357_v46 = vmul.f32 %v7349_v6, %v11388_v11 }
0x10f2   : > { %8269 = vmatpush1.bf16.msra.mxu1 %v8268_v63 }
0x10f3   : > { %v7339_v54 = vpop.permute.xlu0 %7338  ;;  %8271 = vmatprep.subr.bf16.mxu1 %v8270_v4 }
0x10f4   : > { %v7344_v29 = vsel %vm1863_vm5, %v7331_v58, %v7339_v54  ;;  %v7348_v32 = vsel %vm1863_vm5, %v7339_v54, %v7331_v58 }
0x10f5   : > { %v7354_v1 = vmul.f32 %v7344_v29, %v11392_v30  ;;  %v7355_v19 = vmul.f32 %v7348_v32, %v11388_v11  ;;  %7828 = vmatmul.mubr.msk.f32.vlgmr.msra.gmra.mrb[54].mxu1 %vm2059_vm9, %v7827_v13 }
0x10f6   : > { %8273 = vmatpush1.bf16.msra.mxu1 %v8272_v57  ;;  %7427 = vmatprep.mubr.f32.mxu1 %v11380_v22 }
0x10f7   : > { %v8276_v26 = vpack.c.bf16 %v7356_v24, %v7354_v1  ;;  %v8274_v2 = vpack.c.bf16 %v7357_v46, %v7355_v19 }
0x10f9   : > { %8275 = vmatprep.subr.bf16.mxu1 %v8274_v2 }
0x10fa   : > { %8277 = vmatpush1.bf16.msra.mxu1 %v8276_v26 }
0x10fd   : > { %7830 = vmatmul.mubr.msk.f32.vlgmr.msra.gmra.mrb[54].mxu1 %vm2059_vm9, %v7829_v5 }
0x1104   : > { %v7440_v55 = vpop.permute.xlu0 %7439 }
0x11d0   : > { %v7429_v21 = vpop.f32.mrb[54].mxu1 }
0x11d1   : > { %v7442_v43 = vadd.f32 %v7440_v55, %v7429_v21  ;;  %v7431_v56 = vpop.f32.mrb[55].mxu1 }
0x11d2   : > { %v7443_v18 = vadd.f32 %v7440_v55, %v7431_v56 }
0x11d4   : > { %v7446_v22 = vcombine.low %v7442_v43, %v7443_v18 }
0x11d6   : > { %7448 = vst [vmem:[%s801_s24] sm:$0xff] %v7446_v22 }
0x11d7 PF: > { %s11395_s25 = sld [smem:[#allocation2_spill]] }
0x11dd   : > { %s35_s29 = sadd.s32 1, %s11395_s25  }
0x11de   : > { %p32_p4 = scmp.ge.s32.totalorder %s35_s29, 4  }
0x11e0   :  { %34 = sbr.rel (!%p32_p4) target bundleno = 16 (0x10), region = 195 }

</bundles_post_ra>
